<compile_context>
chip_gen: v7x
topology: tpu7x:2x2x1
jax: 0.10.0
libtpu: 0.0.40
codegen_flags: <defaults>
</compile_context>

<pallas_src>
import jax
import jax.numpy as jnp
from jax.experimental import pallas as pl
from jax.experimental.pallas import tpu as pltpu

BN_EPS = 1e-5   # PyTorch BatchNorm1d default
TILE_N = 256    # N-tile of the shared 1024-wide hidden dim (4 tiles; 2 per TensorCore on v7x)


def head_kernel(pooled_ref, meta_ref,
                w1_ref, b1_ref,
                wm1_ref, bm1_ref,
                wm2_ref, bm2_ref,
                wm3_ref, bm3_ref,
                wfc_ref,
                y_ref):
    """Computes one N-tile (256 columns of the shared 1024-wide hidden dim) of the head."""
    bf16 = jnp.bfloat16
    f32 = jnp.float32

    # ---- x = self.l1(pooled)[:, tile]   (bf16 weights/activations, f32 accumulation) ----
    x = jnp.dot(pooled_ref[...].astype(bf16), w1_ref[...],
                preferred_element_type=f32) + b1_ref[...]                      # (bs, TN)

    # ---- meta branch (tile-invariant up to the 1536-wide hidden; recompute is ~1 MFLOP) ----
    h = jnp.dot(meta_ref[...], wm1_ref[...],
                preferred_element_type=f32) + bm1_ref[...]                     # (bs, 512)  f32
    # Linear(512,1536) with eval-mode BatchNorm1d(1536) folded into weights/bias.
    h = jnp.dot(h.astype(bf16), wm2_ref[...],
                preferred_element_type=f32) + bm2_ref[...]                     # (bs, 1536)
    h = jnp.dot(h.astype(bf16), wm3_ref[...],
                preferred_element_type=f32) + bm3_ref[...]                     # (bs, TN)
    # Dropout(0.2) = identity in eval.  Mish = h * tanh(softplus(h)), stable softplus.
    sp = jnp.maximum(h, 0.0) + jnp.log1p(jnp.exp(-jnp.abs(h)))
    f = h * jnp.tanh(sp)

    # ---- self.fc contribution of this tile: (x * f) * wfc_row  (VPU, lane-dense store).
    # The lane sum over the full 1024 spans the parallel grid axis, so it is finished in the
    # wrapper with a trivial (bs, 1024) reduce + bias.
    y_ref[...] = x * f * wfc_ref[...]


def prepare_params(params):
    """One-time parameter prep: fold BN into the 512->1536 linear, quantize big weights to bf16."""
    scale = params["bn_g"] * jax.lax.rsqrt(params["bn_v"] + BN_EPS)            # (1, 1536)
    return {
        "w1": params["w1"].astype(jnp.bfloat16),                               # (2048, 1024)
        "b1": params["b1"],                                                    # (1, 1024) f32
        "wm1": params["wm1"],                                                  # (11, 512) tiny -> keep f32
        "bm1": params["bm1"],
        "wm2": (params["wm2"] * scale).astype(jnp.bfloat16),                   # BN folded, (512, 1536)
        "bm2": (params["bm2"] - params["bn_m"]) * scale + params["bn_b"],
        "wm3": params["wm3"].astype(jnp.bfloat16),                             # (1536, 1024)
        "bm3": params["bm3"],
        "wfc_row": params["wfc"].reshape(1, -1),                               # (1, 1024) f32
        "bfc": params["bfc"],                                                  # (1, 1)
    }


@jax.jit
def res50meta_v2_head(feat_nchw, meta, kp):
    """feat_nchw: stand-in for self.model.features(x), shape (bs, 2048, H, W) NCHW."""
    bs = feat_nchw.shape[0]
    # F.adaptive_avg_pool2d(x, 1).view(bs, -1): spatial mean done here (plain XLA reduce) so the
    # kernel streams the 16 KB pooled tensor instead of a transposed copy of the feature map.
    pooled = jnp.mean(feat_nchw.astype(jnp.float32), axis=(2, 3))              # (bs, 2048)

    n_out = kp["w1"].shape[1]                                                  # 1024
    assert n_out % TILE_N == 0
    n_tiles = n_out // TILE_N

    def whole(a):      # fetched once per core (constant block index -> no re-DMA across tiles)
        return pl.BlockSpec(a.shape, lambda j: (0, 0))

    def coltile(a):    # N-tiled along the output columns
        return pl.BlockSpec((a.shape[0], TILE_N), lambda j: (0, j))

    args = (pooled, meta,
            kp["w1"], kp["b1"],
            kp["wm1"], kp["bm1"],
            kp["wm2"], kp["bm2"],
            kp["wm3"], kp["bm3"],
            kp["wfc_row"])

    in_specs = [
        whole(pooled),            # (bs, 2048)
        whole(meta),              # (bs, 11)
        coltile(kp["w1"]),        # (2048, TN) bf16
        coltile(kp["b1"]),        # (1, TN)
        whole(kp["wm1"]),         # (11, 512)
        whole(kp["bm1"]),         # (1, 512)
        whole(kp["wm2"]),         # (512, 1536) bf16
        whole(kp["bm2"]),         # (1, 1536)
        coltile(kp["wm3"]),       # (1536, TN) bf16
        coltile(kp["bm3"]),       # (1, TN)
        coltile(kp["wfc_row"]),   # (1, TN)
    ]

    y = pl.pallas_call(
        head_kernel,
        grid=(n_tiles,),
        out_shape=jax.ShapeDtypeStruct((bs, n_out), jnp.float32),
        in_specs=in_specs,
        out_specs=pl.BlockSpec((bs, TILE_N), lambda j: (0, j)),
        compiler_params=pltpu.CompilerParams(
            dimension_semantics=("parallel",),
            vmem_limit_bytes=32 * 1024 * 1024),
    )(*args)

    # Finish Linear(1024, 1): cross-tile lane sum + bias.
    return jnp.sum(y, axis=-1, keepdims=True) + kp["bfc"]


# ---------------- deterministic parameter init (PyTorch nn.Linear style) ----------------
def _linear_params(key, fan_in, fan_out):
    kw, kb = jax.random.split(key)
    bound = 1.0 / (fan_in ** 0.5)
    w = jax.random.uniform(kw, (fan_out, fan_in), jnp.float32, -bound, bound)  # torch layout
    b = jax.random.uniform(kb, (fan_out,), jnp.float32, -bound, bound)
    return w.T, b.reshape(1, fan_out)        # kernel layout: (in, out), (1, out)


def _reference_f32(feat_nchw, meta, p):
    """Plain-JAX f32 reference mirroring the PyTorch forward (post-backbone, eval mode)."""
    bs = feat_nchw.shape[0]
    pooled = jnp.mean(feat_nchw, axis=(2, 3)).reshape(bs, -1)
    x = pooled @ p["w1"] + p["b1"]
    h = meta @ p["wm1"] + p["bm1"]
    h = h @ p["wm2"] + p["bm2"]
    h = (h - p["bn_m"]) * jax.lax.rsqrt(p["bn_v"] + BN_EPS) * p["bn_g"] + p["bn_b"]
    h = h @ p["wm3"] + p["bm3"]
    f = h * jnp.tanh(jax.nn.softplus(h))     # Mish; Dropout(0.2) = identity in eval
    return (x * f) @ p["wfc"] + p["bfc"]


def _reference_matched(feat_nchw, meta, kp):
    """Reference with the same bf16-weight / bf16-activation quantization as the kernel."""
    bf16, f32 = jnp.bfloat16, jnp.float32
    pooled = jnp.mean(feat_nchw, axis=(2, 3))
    x = jnp.dot(pooled.astype(bf16), kp["w1"], preferred_element_type=f32) + kp["b1"]
    h = jnp.dot(meta, kp["wm1"], preferred_element_type=f32) + kp["bm1"]
    h = jnp.dot(h.astype(bf16), kp["wm2"], preferred_element_type=f32) + kp["bm2"]
    h = jnp.dot(h.astype(bf16), kp["wm3"], preferred_element_type=f32) + kp["bm3"]
    sp = jnp.maximum(h, 0.0) + jnp.log1p(jnp.exp(-jnp.abs(h)))
    f = h * jnp.tanh(sp)
    return jnp.sum(x * f * kp["wfc_row"], axis=-1, keepdims=True) + kp["bfc"]


if __name__ == "__main__":
    key = jax.random.PRNGKey(0)
    ks = jax.random.split(key, 11)

    # Small, module-consistent shapes: bs=2, backbone feature map (2, 2048, 7, 7), meta (2, 11).
    bs, C, H, W = 2, 2048, 7, 7
    feat = 0.1 * jax.random.normal(ks[0], (bs, C, H, W), jnp.float32)  # stand-in for features(x)
    meta = jax.random.normal(ks[1], (bs, 11), jnp.float32)

    params = {}
    params["w1"],  params["b1"]  = _linear_params(ks[2], 2048, 1024)   # self.l1
    params["wm1"], params["bm1"] = _linear_params(ks[3], 11, 512)      # meta[0]
    params["wm2"], params["bm2"] = _linear_params(ks[4], 512, 1536)    # meta[1]
    params["wm3"], params["bm3"] = _linear_params(ks[5], 1536, 1024)   # meta[3]
    params["wfc"], params["bfc"] = _linear_params(ks[6], 1024, 1)      # self.fc
    # BatchNorm1d(1536) eval-mode affine params / running stats (non-trivial -> exercises folding).
    params["bn_g"] = jax.random.uniform(ks[7], (1, 1536), jnp.float32, 0.5, 1.5)
    params["bn_b"] = 0.1 * jax.random.normal(ks[8], (1, 1536), jnp.float32)
    params["bn_m"] = 0.1 * jax.random.normal(ks[9], (1, 1536), jnp.float32)
    params["bn_v"] = jax.random.uniform(ks[10], (1, 1536), jnp.float32, 0.5, 1.5)

    kp = prepare_params(params)

    out = jax.block_until_ready(res50meta_v2_head(feat, meta, kp))
    assert out.shape == (bs, 1), out.shape

    ref_q = _reference_matched(feat, meta, kp)     # identical quantization -> tight tolerance
    ref_f = _reference_f32(feat, meta, params)     # original f32 module math -> loose tolerance
    assert jnp.allclose(out, ref_q, atol=2e-3, rtol=2e-3), (out, ref_q)
    assert jnp.allclose(out, ref_f, atol=1e-2, rtol=5e-2), (out, ref_f)
    print("KERNEL_OK")
</pallas_src>

<mosaic_0001>
module attributes {stable_mosaic.version = 11 : i64} {
  func.func @head_kernel(%arg0: i32, %arg1: memref<2x2048xf32, #tpu.memory_space<vmem>>, %arg2: memref<2x11xf32, #tpu.memory_space<vmem>>, %arg3: memref<2048x256xbf16, #tpu.memory_space<vmem>>, %arg4: memref<1x256xf32, #tpu.memory_space<vmem>>, %arg5: memref<11x512xf32, #tpu.memory_space<vmem>>, %arg6: memref<1x512xf32, #tpu.memory_space<vmem>>, %arg7: memref<512x1536xbf16, #tpu.memory_space<vmem>>, %arg8: memref<1x1536xf32, #tpu.memory_space<vmem>>, %arg9: memref<1536x256xbf16, #tpu.memory_space<vmem>>, %arg10: memref<1x256xf32, #tpu.memory_space<vmem>>, %arg11: memref<1x256xf32, #tpu.memory_space<vmem>>, %arg12: memref<2x256xf32, #tpu.memory_space<vmem>>) attributes {dimension_semantics = [#tpu.dimension_semantics<parallel>], iteration_bounds = array<i64: 4>, scalar_prefetch = 0 : i64, scratch_operands = 0 : i64, tpu.core_type = #tpu.core_type<tc>, window_params = [{pipeline_mode = #tpu.pipeline_mode<synchronous>, transform_indices = @transform_0, window_bounds = array<i64: 2, 2048>}, {pipeline_mode = #tpu.pipeline_mode<synchronous>, transform_indices = @transform_1, window_bounds = array<i64: 2, 11>}, {transform_indices = @transform_2, window_bounds = array<i64: 2048, 256>}, {transform_indices = @transform_3, window_bounds = array<i64: 1, 256>}, {pipeline_mode = #tpu.pipeline_mode<synchronous>, transform_indices = @transform_4, window_bounds = array<i64: 11, 512>}, {pipeline_mode = #tpu.pipeline_mode<synchronous>, transform_indices = @transform_5, window_bounds = array<i64: 1, 512>}, {pipeline_mode = #tpu.pipeline_mode<synchronous>, transform_indices = @transform_6, window_bounds = array<i64: 512, 1536>}, {pipeline_mode = #tpu.pipeline_mode<synchronous>, transform_indices = @transform_7, window_bounds = array<i64: 1, 1536>}, {transform_indices = @transform_8, window_bounds = array<i64: 1536, 256>}, {transform_indices = @transform_9, window_bounds = array<i64: 1, 256>}, {transform_indices = @transform_10, window_bounds = array<i64: 1, 256>}, {transform_indices = @transform_11, window_bounds = array<i64: 2, 256>}]} {
    %c0 = arith.constant 0 : index
    %c0_0 = arith.constant 0 : index
    %0 = vector.load %arg1[%c0, %c0_0] : memref<2x2048xf32, #tpu.memory_space<vmem>>, vector<2x2048xf32>
    %1 = arith.truncf %0 : vector<2x2048xf32> to vector<2x2048xbf16>
    %c0_1 = arith.constant 0 : index
    %c0_2 = arith.constant 0 : index
    %2 = vector.load %arg3[%c0_1, %c0_2] : memref<2048x256xbf16, #tpu.memory_space<vmem>>, vector<2048x256xbf16>
    %cst = arith.constant dense<0.000000e+00> : vector<2x256xf32>
    %3 = tpu.matmul %1, %2, %cst {dimension_numbers = #tpu.dot_dimension_numbers<[1], [0], [0], [1], [0, 0, 1, 1], [], []>} : vector<2x2048xbf16>, vector<2048x256xbf16>, vector<2x256xf32> -> vector<2x256xf32>
    %c0_3 = arith.constant 0 : index
    %c0_4 = arith.constant 0 : index
    %4 = vector.load %arg4[%c0_3, %c0_4] : memref<1x256xf32, #tpu.memory_space<vmem>>, vector<1x256xf32>
    %5 = vector.broadcast %4 : vector<1x256xf32> to vector<2x256xf32>
    %6 = arith.addf %3, %5 : vector<2x256xf32>
    %c0_5 = arith.constant 0 : index
    %c0_6 = arith.constant 0 : index
    %7 = vector.load %arg2[%c0_5, %c0_6] : memref<2x11xf32, #tpu.memory_space<vmem>>, vector<2x11xf32>
    %c0_7 = arith.constant 0 : index
    %c0_8 = arith.constant 0 : index
    %8 = vector.load %arg5[%c0_7, %c0_8] : memref<11x512xf32, #tpu.memory_space<vmem>>, vector<11x512xf32>
    %cst_9 = arith.constant dense<0.000000e+00> : vector<2x512xf32>
    %9 = tpu.matmul %7, %8, %cst_9 {dimension_numbers = #tpu.dot_dimension_numbers<[1], [0], [0], [1], [0, 0, 1, 1], [], []>} : vector<2x11xf32>, vector<11x512xf32>, vector<2x512xf32> -> vector<2x512xf32>
    %c0_10 = arith.constant 0 : index
    %c0_11 = arith.constant 0 : index
    %10 = vector.load %arg6[%c0_10, %c0_11] : memref<1x512xf32, #tpu.memory_space<vmem>>, vector<1x512xf32>
    %11 = vector.broadcast %10 : vector<1x512xf32> to vector<2x512xf32>
    %12 = arith.addf %9, %11 : vector<2x512xf32>
    %13 = arith.truncf %12 : vector<2x512xf32> to vector<2x512xbf16>
    %c0_12 = arith.constant 0 : index
    %c0_13 = arith.constant 0 : index
    %14 = vector.load %arg7[%c0_12, %c0_13] : memref<512x1536xbf16, #tpu.memory_space<vmem>>, vector<512x1536xbf16>
    %cst_14 = arith.constant dense<0.000000e+00> : vector<2x1536xf32>
    %15 = tpu.matmul %13, %14, %cst_14 {dimension_numbers = #tpu.dot_dimension_numbers<[1], [0], [0], [1], [0, 0, 1, 1], [], []>} : vector<2x512xbf16>, vector<512x1536xbf16>, vector<2x1536xf32> -> vector<2x1536xf32>
    %c0_15 = arith.constant 0 : index
    %c0_16 = arith.constant 0 : index
    %16 = vector.load %arg8[%c0_15, %c0_16] : memref<1x1536xf32, #tpu.memory_space<vmem>>, vector<1x1536xf32>
    %17 = vector.broadcast %16 : vector<1x1536xf32> to vector<2x1536xf32>
    %18 = arith.addf %15, %17 : vector<2x1536xf32>
    %19 = arith.truncf %18 : vector<2x1536xf32> to vector<2x1536xbf16>
    %c0_17 = arith.constant 0 : index
    %c0_18 = arith.constant 0 : index
    %20 = vector.load %arg9[%c0_17, %c0_18] : memref<1536x256xbf16, #tpu.memory_space<vmem>>, vector<1536x256xbf16>
    %cst_19 = arith.constant dense<0.000000e+00> : vector<2x256xf32>
    %21 = tpu.matmul %19, %20, %cst_19 {dimension_numbers = #tpu.dot_dimension_numbers<[1], [0], [0], [1], [0, 0, 1, 1], [], []>} : vector<2x1536xbf16>, vector<1536x256xbf16>, vector<2x256xf32> -> vector<2x256xf32>
    %c0_20 = arith.constant 0 : index
    %c0_21 = arith.constant 0 : index
    %22 = vector.load %arg10[%c0_20, %c0_21] : memref<1x256xf32, #tpu.memory_space<vmem>>, vector<1x256xf32>
    %23 = vector.broadcast %22 : vector<1x256xf32> to vector<2x256xf32>
    %24 = arith.addf %21, %23 : vector<2x256xf32>
    %cst_22 = arith.constant 0.000000e+00 : f32
    %25 = vector.broadcast %cst_22 : f32 to vector<2x256xf32>
    %26 = arith.maximumf %24, %25 : vector<2x256xf32>
    %27 = math.absf %24 : vector<2x256xf32>
    %cst_23 = arith.constant 0.000000e+00 : f32
    %28 = vector.broadcast %cst_23 : f32 to vector<2x256xf32>
    %29 = arith.subf %28, %27 : vector<2x256xf32>
    %30 = math.exp %29 : vector<2x256xf32>
    %31 = math.log1p %30 : vector<2x256xf32>
    %32 = arith.addf %26, %31 : vector<2x256xf32>
    %33 = math.tanh %32 : vector<2x256xf32>
    %34 = arith.mulf %24, %33 : vector<2x256xf32>
    %35 = arith.mulf %6, %34 : vector<2x256xf32>
    %c0_24 = arith.constant 0 : index
    %c0_25 = arith.constant 0 : index
    %36 = vector.load %arg11[%c0_24, %c0_25] : memref<1x256xf32, #tpu.memory_space<vmem>>, vector<1x256xf32>
    %37 = vector.broadcast %36 : vector<1x256xf32> to vector<2x256xf32>
    %38 = arith.mulf %35, %37 : vector<2x256xf32>
    %c0_26 = arith.constant 0 : index
    %c0_27 = arith.constant 0 : index
    %39 = vector.load %arg12[%c0_26, %c0_27] : memref<2x256xf32, #tpu.memory_space<vmem>>, vector<2x256xf32>
    tpu.vector_store %arg12[%c0_26, %c0_27], %38 {strides = array<i32>} : memref<2x256xf32, #tpu.memory_space<vmem>>, vector<2x256xf32>,
    return
  }
  func.func @transform_0(%arg0: i32) -> (i32, i32) {
    %c0_i32 = arith.constant 0 : i32
    %c0_i32_0 = arith.constant 0 : i32
    %c0_i32_1 = arith.constant 0 : i32
    return %c0_i32, %c0_i32_0 : i32, i32
  }
  func.func @transform_1(%arg0: i32) -> (i32, i32) {
    %c0_i32 = arith.constant 0 : i32
    %c0_i32_0 = arith.constant 0 : i32
    %c0_i32_1 = arith.constant 0 : i32
    return %c0_i32, %c0_i32_0 : i32, i32
  }
  func.func @transform_2(%arg0: i32) -> (i32, i32) {
    %c0_i32 = arith.constant 0 : i32
    %c0_i32_0 = arith.constant 0 : i32
    return %c0_i32, %arg0 : i32, i32
  }
  func.func @transform_3(%arg0: i32) -> (i32, i32) {
    %c0_i32 = arith.constant 0 : i32
    %c0_i32_0 = arith.constant 0 : i32
    return %c0_i32, %arg0 : i32, i32
  }
  func.func @transform_4(%arg0: i32) -> (i32, i32) {
    %c0_i32 = arith.constant 0 : i32
    %c0_i32_0 = arith.constant 0 : i32
    %c0_i32_1 = arith.constant 0 : i32
    return %c0_i32, %c0_i32_0 : i32, i32
  }
  func.func @transform_5(%arg0: i32) -> (i32, i32) {
    %c0_i32 = arith.constant 0 : i32
    %c0_i32_0 = arith.constant 0 : i32
    %c0_i32_1 = arith.constant 0 : i32
    return %c0_i32, %c0_i32_0 : i32, i32
  }
  func.func @transform_6(%arg0: i32) -> (i32, i32) {
    %c0_i32 = arith.constant 0 : i32
    %c0_i32_0 = arith.constant 0 : i32
    %c0_i32_1 = arith.constant 0 : i32
    return %c0_i32, %c0_i32_0 : i32, i32
  }
  func.func @transform_7(%arg0: i32) -> (i32, i32) {
    %c0_i32 = arith.constant 0 : i32
    %c0_i32_0 = arith.constant 0 : i32
    %c0_i32_1 = arith.constant 0 : i32
    return %c0_i32, %c0_i32_0 : i32, i32
  }
  func.func @transform_8(%arg0: i32) -> (i32, i32) {
    %c0_i32 = arith.constant 0 : i32
    %c0_i32_0 = arith.constant 0 : i32
    return %c0_i32, %arg0 : i32, i32
  }
  func.func @transform_9(%arg0: i32) -> (i32, i32) {
    %c0_i32 = arith.constant 0 : i32
    %c0_i32_0 = arith.constant 0 : i32
    return %c0_i32, %arg0 : i32, i32
  }
  func.func @transform_10(%arg0: i32) -> (i32, i32) {
    %c0_i32 = arith.constant 0 : i32
    %c0_i32_0 = arith.constant 0 : i32
    return %c0_i32, %arg0 : i32, i32
  }
  func.func @transform_11(%arg0: i32) -> (i32, i32) {
    %c0_i32 = arith.constant 0 : i32
    %c0_i32_0 = arith.constant 0 : i32
    return %c0_i32, %arg0 : i32, i32
  }
}

</mosaic_0001>

<bundles_post_ra>
// kernel: res50meta_v2_head.1
= control target key start
LH: loop header
LB: loop body
LE: loop exit
PB: predicated region body
PF: predicated region fallthrough
CT: control target
= control target key end

     0   :  { %s11192_s0 = inlined_call_operand.vmem [shape: f32[2,2048], index: 0, kind: input, shape index: {}]   ;;  %s11193_s1 = inlined_call_operand.hbm [shape: f32[2,11], index: 1, kind: input, shape index: {}]   ;;  %s11194_s2 = inlined_call_operand.hbm [shape: bf16[2048,1024], index: 2, kind: input, shape index: {}]   ;;  %s11195_s3 = inlined_call_operand.hbm [shape: f32[1,1024], index: 3, kind: input, shape index: {}]   ;;  %s11196_s4 = inlined_call_operand.hbm [shape: f32[11,512], index: 4, kind: input, shape index: {}]   ;;  %s11197_s5 = inlined_call_operand.hbm [shape: f32[1,512], index: 5, kind: input, shape index: {}]   ;;  %s11198_s6 = inlined_call_operand.hbm [shape: bf16[512,1536], index: 6, kind: input, shape index: {}]   ;;  %s11199_s7 = inlined_call_operand.hbm [shape: f32[1,1536], index: 7, kind: input, shape index: {}]   ;;  %s11200_s8 = inlined_call_operand.hbm [shape: bf16[1536,1024], index: 8, kind: input, shape index: {}]   ;;  %s11201_s9 = inlined_call_operand.hbm [shape: f32[1,1024], index: 9, kind: input, shape index: {}]   ;;  %s11202_s10 = inlined_call_operand.hbm [shape: f32[1,1024], index: 10, kind: input, shape index: {}]   ;;  %s11203_s11 = inlined_call_operand.vmem [shape: f32[2,1024], index: 11, kind: output, shape index: {}]  }
   0x1   :  { %11227 = sst [smem:[#allocation28_spill]] %s11192_s0 }
   0x2   :  { %11228 = sst [smem:[#allocation29_spill]] %s11194_s2 }
   0x3   :  { %11229 = sst [smem:[#allocation30_spill]] %s11196_s4 }
   0x4   :  { %11230 = sst [smem:[#allocation31_spill]] %s11198_s6 }
   0x5   :  { %11231 = sst [smem:[#allocation32_spill]] %s11200_s8 }
   0x6   :  { %11232 = sst [smem:[#allocation33_spill]] %s11203_s11 }
   0x7   :  { %16 = vsyncpa [#allocation3], 0 }
   0x8   :  { %17 = vsyncpa [#allocation5], 0 }
   0x9   :  { %19 = vsyncpa [#allocation5 + $0x1], 0 }
   0xa   :  { %20 = vsyncpa [#allocation8], 0 }
   0xb   :  { %21 = vsyncpa [#allocation11], 0 }
   0xc   :  { %22 = vsyncpa [#allocation14], 0 }
   0xd   :  { %24 = vsyncpa [#allocation14 + $0x1], 0 }
   0xe   :  { %25 = vsyncpa [#allocation17], 0 }
   0xf   :  { %27 = vsyncpa [#allocation17 + $0x1], 0  ;;  %s10143_s17 = smov 0   ;;  %s10145_s18 = smov 0  }
  0x10   :  { %s10147_s19 = smov 0   ;;  %s10149_s20 = smov 0  }
  0x11 LB: > { %11233 = sst [smem:[#allocation24_spill]] %s10058_s19  ;;  %s10162_s21 = sadd.s32 4294967295, %s10062_s20   ;;  %s10062_s20 = sphi %s10149_s20, %s11272_s20   ;;  %s10058_s19 = sphi %s10147_s19, %s11274_s19   ;;  %s10054_s18 = sphi %s10145_s18, %s11276_s18   ;;  %s10050_s17 = sphi %s10143_s17, %s11275_s17  }
  0x12   : > { %p95_p0 = scmp.ne.s32.totalorder %s10054_s18, %s10050_s17  ;;  %p11204_p1 = scmp.eq.s32.totalorder %s10162_s21, 0 }
  0x13   : > { %p7355_p2 = scmp.ge.s32.totalorder %s10062_s20, 1  ;;  %p320_p3 = scmp.lt.s32.totalorder %s10062_s20, 5 }
  0x14   : > { %p10170_p4 = por %p11204_p1, %p95_p0  ;;  %s10064_s24 = smov [#allocation7]  }
  0x15   : > { %p10174_p5 = pnand %p7355_p2, %p320_p3  ;;  %s346_s25 = sshll.u32 %s10064_s24, 4  ;;  %s347_s25 = int_to_ptr.vmem [resolvable:$true] %s346_s25 }
  0x16   : > { %s11234_s22 = scalar_select %p10170_p4, 1, 0 }
  0x17   : > { %s11236_s23 = scalar_select %p10174_p5, 1, 0 }
  0x18   : > { %11235 = sst [smem:[#allocation25_spill]] %s11234_s22  ;;  %p8364_p6 = pneg %p10174_p5 }
  0x19   : > { %s10065_s27 = smov [#allocation10]   ;;  %s11238_s4 = sld [smem:[#allocation30_spill]] }
  0x1a   : > { %p10182_p7 = pnand %p8364_p6, %p11204_p1  ;;  %s370_s28 = sshll.u32 %s10065_s27, 4  ;;  %s10186_s28 = int_to_ptr.vmem [resolvable:$true] %s370_s28 }
  0x1c   : > { %s11237_s26 = scalar_select %p10182_p7, 1, 0 }
  0x1d   : > { %p10196_p9 = pneg %p10182_p7 }
  0x1f   : > { %s9718_s12 = scalar_lea.hbm %s11238_s4, 1024 }
  0x20   : > { %p9719_p8 = scmp.ne.s32.totalorder %s11238_s4, %s9718_s12  ;;  %p9725_p12 = scmp.lt.u32.totalorder %s9718_s12, %s11238_s4 }
  0x21   : > { %s11239_s15 = scalar_select %p10196_p9, 1, 0 }
  0x22   : > { %p9721_p10 = pnand %p10196_p9, %p9719_p8 }
  0x24   : > { %p9722_p11 = pneg %p9721_p10 }
  0x26   : > { %p9727_p13 = pnand %p9725_p12, %p9722_p11 }
  0x28   : > { %9730 = shalt.err (!%p9727_p13)
}
  0x29   : > { %s9731_s24 = scalar_lea.vmem %s347_s25, 1024  ;;  %p9739_p6 = scmp.lt.s32.totalorder %s347_s25, %s347_s25 }
  0x2a   : > { %p9732_p0 = scmp.ne.s32.totalorder %s347_s25, %s9731_s24  ;;  %p9740_p1 = scmp.lt.s32.totalorder %s9731_s24, %s9731_s24 }
  0x2c   : > { %p9734_p2 = pnand %p9732_p0, %p10196_p9  ;;  %p9741_p4 = por %p9740_p1, %p9739_p6 }
  0x2e   : > { %p9735_p3 = pneg %p9734_p2 }
  0x30   : > { %p9742_p5 = pnand %p9741_p4, %p9735_p3 }
  0x32   : > { %9745 = shalt.err (!%p9742_p5)
}
  0x33   : > { %s11208_s27 = smov 512   ;;  %s10067_s29 = smov 32  }
  0x34   : > { %8370 = dma.hbm_to_vmem [thread:$0]  (!%p10182_p7), %s11238_s4, 1024, %s347_s25, [#allocation8], %s11208_s27, %s11208_s27, %s10067_s29  }
  0x35   : > { %s11240_s6 = sld [smem:[#allocation31_spill]] }
  0x3b   : > { %s9746_s16 = scalar_lea.hbm %s11240_s6, 49152 }
  0x3c   : > { %p9747_p1 = scmp.ne.s32.totalorder %s11240_s6, %s9746_s16  ;;  %p9753_p8 = scmp.lt.u32.totalorder %s9746_s16, %s11240_s6 }
  0x3e   : > { %p9749_p4 = pnand %p9747_p1, %p10196_p9 }
  0x40   : > { %p9750_p5 = pneg %p9749_p4 }
  0x42   : > { %p9755_p10 = pnand %p9753_p8, %p9750_p5 }
  0x44   : > { %9758 = shalt.err (!%p9755_p10)
}
  0x45   : > { %s9759_s25 = scalar_lea.vmem %s10186_s28, 49152  ;;  %p9767_p0 = scmp.lt.s32.totalorder %s10186_s28, %s10186_s28 }
  0x46   : > { %p9760_p11 = scmp.ne.s32.totalorder %s10186_s28, %s9759_s25  ;;  %p9768_p2 = scmp.lt.s32.totalorder %s9759_s25, %s9759_s25 }
  0x48   : > { %p9762_p12 = pnand %p9760_p11, %p10196_p9  ;;  %p9769_p3 = por %p9768_p2, %p9767_p0 }
  0x4a   : > { %p9763_p13 = pneg %p9762_p12 }
  0x4c   : > { %p9770_p6 = pnand %p9769_p3, %p9763_p13 }
  0x4e   : > { %9773 = shalt.err (!%p9770_p6)
}
  0x4f   : > { %s10068_s29 = smov 768   ;;  %s10069_s0 = smov 48  }
  0x50   : > { %8376 = dma.hbm_to_vmem [thread:$0]  (!%p10182_p7), %s11240_s6, 49152, %s10186_s28, [#allocation11], %s10068_s29, %s10068_s29, %s10069_s0  }
  0x51   : > { %s10238_s12 = sadd.s32 1, %s10062_s20   ;;  %s82_s14 = sadd.s32 1, %s10058_s19 }
  0x52   : > { %11241 = sst [smem:[#allocation26_spill]] %s10238_s12  ;;  %s79_s13 = ssub.s32 %s10062_s20, %s10238_s12 }
  0x53   : > { %p80_p1 = scmp.eq.s32.totalorder %s79_s13, 0  ;;  %p89_p4 = scmp.ne.s32.totalorder %s10058_s19, %s10054_s18 }
  0x54   : > { %p90_p5 = scmp.eq.s32.totalorder %s10062_s20, 0  ;;  %p8401_p10 = scmp.lt.s32.totalorder %s10062_s20, 4 }
  0x55   : > { %s10247_s16 = scalar_select %p80_p1, %s10058_s19, %s82_s14  }
  0x56   : > { %p91_p8 = por %p90_p5, %p89_p4  ;;  %s11211_s17 = sand.u32 1, %s10062_s20  }
  0x57   : > { %11242 = sst [smem:[#allocation27_spill]] %s10247_s16  ;;  %s10252_s24 = sand.u32 1, %s10058_s19  }
  0x58   : > { %s7362_s25 = sshll.u32 %s10252_s24, 11  ;;  %s11210_s11 = sshll.u32 %s10062_s20, 7 }
  0x59   : > { %s11243_s2 = sld [smem:[#allocation29_spill]]  ;;  %s399_s30 = scalar_lea.vmem [#allocation4], %s7362_s25 }
  0x5a   : > { %s406_s13 = sshll.u32 %s399_s30, 4  ;;  %p10265_p11 = pnand %p8401_p10, %p91_p8  ;;  %s10263_s13 = int_to_ptr.vmem [resolvable:$true] %s406_s13 }
  0x5b   : > { %s10271_s27 = scalar_lea.sflag [#allocation5], %s11211_s17 }
  0x5c   : > { %s11244_s14 = scalar_select %p10265_p11, 1, 0 }
  0x5d   : > { %p10277_p13 = pneg %p10265_p11 }
  0x5f   : > { %s10261_s0 = scalar_lea.hbm %s11243_s2, %s11210_s11  ;;  %s9779_s30 = scalar_lea.hbm %s11243_s2, 131072 }
  0x60   : > { %s9774_s4 = scalar_lea.hbm %s10261_s0, 32768  ;;  %p9780_p3 = scmp.lt.u32.totalorder %s10261_s0, %s11243_s2 }
  0x61   : > { %p9775_p12 = scmp.ne.s32.totalorder %s10261_s0, %s9774_s4  ;;  %p9781_p6 = scmp.lt.u32.totalorder %s9779_s30, %s9774_s4 }
  0x62   : > { %s11245_s28 = scalar_select %p10277_p13, 1, 0 }
  0x63   : > { %p9777_p0 = pnand %p10277_p13, %p9775_p12  ;;  %p9782_p1 = por %p9781_p6, %p9780_p3 }
  0x64   : > { %p9783_p4 = scmp.lt.u32.totalorder %s9774_s4, %s10261_s0 }
  0x65   : > { %p9778_p2 = pneg %p9777_p0 }
  0x66   : > { %p9784_p5 = por %p9783_p4, %p9782_p1 }
  0x68   : > { %p9785_p8 = pnand %p9784_p5, %p9778_p2 }
  0x6a   : > { %9788 = shalt.err (!%p9785_p8)
}
  0x6b   : > { %s9789_s17 = scalar_lea.vmem %s10263_s13, 32768  ;;  %s10070_s25 = smov [#allocation4]  }
  0x6c   : > { %p9790_p10 = scmp.ne.s32.totalorder %s10263_s13, %s9789_s17  ;;  %s9794_s29 = sshll.u32 %s10070_s25, 4  ;;  %s9795_s29 = int_to_ptr.vmem [resolvable:$false] %s9794_s29 }
  0x6d   : > { %s9796_s6 = scalar_lea.vmem %s9795_s29, 65536  ;;  %p9797_p7 = scmp.lt.s32.totalorder %s10263_s13, %s9795_s29 }
  0x6e   : > { %p9792_p12 = pnand %p9790_p10, %p10277_p13  ;;  %p9798_p9 = scmp.lt.s32.totalorder %s9796_s6, %s9789_s17 }
  0x70   : > { %p9793_p0 = pneg %p9792_p12  ;;  %p9799_p3 = por %p9798_p9, %p9797_p7 }
  0x72   : > { %p9800_p6 = pnand %p9799_p3, %p9793_p0 }
  0x74   : > { %9803 = shalt.err (!%p9800_p6)
}
  0x75   : > { %s11221_s4 = smov 128   ;;  %s11222_s11 = smov 8  }
  0x76   : > { %s11246_s30 = smov 512   ;;  %s8332_s25 = smul.u32 1536, %s10252_s24 }
  0x77   : > { %8383 = dma.hbm_to_vmem [thread:$0]  (!%p10265_p11), %s10261_s0, 32768, %s10263_s13, %s10271_s27, %s11246_s30, %s11221_s4, %s11222_s11  }
  0x78   : > { %s11247_s17 = sshll.u32 %s10062_s20, 7  ;;  %s11248_s8 = sld [smem:[#allocation32_spill]] }
  0x79   : > { %s10073_s16 = smov [#allocation2]   ;;  %s439_s12 = scalar_lea.vmem [#allocation13], %s8332_s25 }
  0x7a   : > { %s336_s19 = sshll.u32 %s10073_s16, 4  ;;  %s446_s22 = sshll.u32 %s439_s12, 4  ;;  %s10312_s19 = int_to_ptr.vmem [resolvable:$true] %s336_s19  ;;  %s10314_s22 = int_to_ptr.vmem [resolvable:$true] %s446_s22 }
  0x7b   : > { %s10074_s0 = smov [#allocation9]   ;;  %s11249_s4 = sand.u32 1, %s10062_s20  }
  0x7c   : > { %s10316_s13 = sshll.u32 %s10074_s0, 4  ;;  %s10320_s11 = scalar_lea.sflag [#allocation14], %s11249_s4  ;;  %s361_s13 = int_to_ptr.vmem [resolvable:$true] %s10316_s13 }
  0x7e   : > { %s10310_s2 = scalar_lea.hbm %s11248_s8, %s11247_s17  ;;  %s9809_s25 = scalar_lea.hbm %s11248_s8, 98304 }
  0x7f   : > { %s9804_s17 = scalar_lea.hbm %s10310_s2, 24576  ;;  %p9810_p1 = scmp.lt.u32.totalorder %s10310_s2, %s11248_s8 }
  0x80   : > { %p9805_p7 = scmp.ne.s32.totalorder %s10310_s2, %s9804_s17  ;;  %p9811_p4 = scmp.lt.u32.totalorder %s9809_s25, %s9804_s17 }
  0x81   : > { %p9813_p8 = scmp.lt.u32.totalorder %s9804_s17, %s10310_s2 }
  0x82   : > { %p9807_p9 = pnand %p9805_p7, %p10277_p13  ;;  %p9812_p5 = por %p9811_p4, %p9810_p1 }
  0x84   : > { %p9808_p2 = pneg %p9807_p9  ;;  %p9814_p10 = por %p9813_p8, %p9812_p5 }
  0x86   : > { %p9815_p12 = pnand %p9814_p10, %p9808_p2 }
  0x88   : > { %9818 = shalt.err (!%p9815_p12)
}
  0x89   : > { %s9819_s4 = scalar_lea.vmem %s10314_s22, 24576  ;;  %s10075_s0 = smov [#allocation13]  }
  0x8a   : > { %p9820_p0 = scmp.ne.s32.totalorder %s10314_s22, %s9819_s4  ;;  %s9824_s29 = sshll.u32 %s10075_s0, 4  ;;  %s9825_s29 = int_to_ptr.vmem [resolvable:$false] %s9824_s29 }
  0x8b   : > { %s9826_s16 = scalar_lea.vmem %s9825_s29, 49152  ;;  %p9827_p7 = scmp.lt.s32.totalorder %s10314_s22, %s9825_s29 }
  0x8c   : > { %p9822_p3 = pnand %p9820_p0, %p10277_p13  ;;  %p9828_p9 = scmp.lt.s32.totalorder %s9826_s16, %s9819_s4 }
  0x8e   : > { %p9823_p6 = pneg %p9822_p3  ;;  %p9829_p1 = por %p9828_p9, %p9827_p7 }
  0x90   : > { %p9830_p4 = pnand %p9829_p1, %p9823_p6 }
  0x92   : > { %9833 = shalt.err (!%p9830_p4)
}
  0x93   : > { %s11250_s17 = smov 8   ;;  %s11251_s25 = smov 128  }
  0x94   : > { %8389 = dma.hbm_to_vmem [thread:$0]  (!%p10265_p11), %s10310_s2, 24576, %s10314_s22, %s10320_s11, %s11246_s30, %s11251_s25, %s11250_s17  }
  0x95   : > { %s9834_s0 = scalar_lea.hbm %s11193_s1, 32  ;;  %p11252_p5 = scmp.ne.s32.totalorder %s11239_s15, 0 }
  0x96   : > { %p9835_p2 = scmp.ne.s32.totalorder %s11193_s1, %s9834_s0  ;;  %p9841_p12 = scmp.lt.u32.totalorder %s9834_s0, %s11193_s1 }
  0x98   : > { %p9837_p8 = pnand %p9835_p2, %p11252_p5 }
  0x9a   : > { %p9838_p10 = pneg %p9837_p8 }
  0x9c   : > { %p9843_p0 = pnand %p9841_p12, %p9838_p10 }
  0x9e   : > { %9846 = shalt.err (!%p9843_p0)
}
  0x9f   : > { %s9847_s2 = scalar_lea.vmem %s10312_s19, 32  ;;  %p9855_p9 = scmp.lt.s32.totalorder %s10312_s19, %s10312_s19 }
  0xa0   : > { %p9848_p3 = scmp.ne.s32.totalorder %s10312_s19, %s9847_s2  ;;  %p9856_p1 = scmp.lt.s32.totalorder %s9847_s2, %s9847_s2 }
  0xa2   : > { %p9850_p6 = pnand %p9848_p3, %p11252_p5  ;;  %p9857_p4 = por %p9856_p1, %p9855_p9 }
  0xa4   : > { %p9851_p7 = pneg %p9850_p6 }
  0xa6   : > { %p9858_p2 = pnand %p9857_p4, %p9851_p7 }
  0xa8   : > { %9861 = shalt.err (!%p9858_p2)
}
  0xa9   : > { %p11253_p8 = scmp.ne.s32.totalorder %s11237_s26, 0  ;;  %s9862_s25 = scalar_lea.hbm %s11197_s5, 64 }
  0xaa   : > { %p9863_p10 = scmp.ne.s32.totalorder %s11197_s5, %s9862_s25  ;;  %p9869_p3 = scmp.lt.u32.totalorder %s9862_s25, %s11197_s5 }
  0xab   : > { %8367 = dma.hbm_to_vmem [thread:$0]  (!%p11253_p8), %s11193_s1, 32, %s10312_s19, [#allocation3]  }
  0xac   : > { %p9865_p12 = pnand %p9863_p10, %p11252_p5 }
  0xae   : > { %p9866_p0 = pneg %p9865_p12 }
  0xb0   : > { %p9871_p6 = pnand %p9869_p3, %p9866_p0 }
  0xb2   : > { %9874 = shalt.err (!%p9871_p6)
}
  0xb3   : > { %s9875_s4 = scalar_lea.vmem %s361_s13, 64  ;;  %p9883_p4 = scmp.lt.s32.totalorder %s361_s13, %s361_s13 }
  0xb4   : > { %p9876_p7 = scmp.ne.s32.totalorder %s361_s13, %s9875_s4  ;;  %p9884_p2 = scmp.lt.s32.totalorder %s9875_s4, %s9875_s4 }
  0xb6   : > { %p9878_p9 = pnand %p9876_p7, %p11252_p5  ;;  %p9885_p11 = por %p9884_p2, %p9883_p4 }
  0xb8   : > { %p9879_p1 = pneg %p9878_p9 }
  0xba   : > { %p9886_p13 = pnand %p9885_p11, %p9879_p1 }
  0xbc   : > { %9889 = shalt.err (!%p9886_p13)
}
  0xbd   : > { %8373 = dma.hbm_to_vmem [thread:$0]  (!%p11253_p8), %s11197_s5, 64, %s361_s13, [#allocation8]  }
  0xbe   : > { %s10076_s2 = smov [#allocation12]   ;;  %s10390_s22 = sshll.u32 %s10252_s24, 1 }
  0xbf   : > { %s384_s8 = sshll.u32 %s10076_s2, 4  ;;  %s9890_s25 = scalar_lea.hbm %s11199_s7, 192  ;;  %s385_s8 = int_to_ptr.vmem [resolvable:$true] %s384_s8 }
  0xc0   : > { %p9891_p11 = scmp.ne.s32.totalorder %s11199_s7, %s9890_s25  ;;  %p9897_p12 = scmp.lt.u32.totalorder %s9890_s25, %s11199_s7 }
  0xc2   : > { %p9893_p13 = pnand %p9891_p11, %p11252_p5 }
  0xc4   : > { %p9894_p10 = pneg %p9893_p13 }
  0xc6   : > { %p9899_p0 = pnand %p9897_p12, %p9894_p10 }
  0xc8   : > { %9902 = shalt.err (!%p9899_p0)
}
  0xc9   : > { %s9903_s13 = scalar_lea.vmem %s385_s8, 192  ;;  %p9911_p9 = scmp.lt.s32.totalorder %s385_s8, %s385_s8 }
  0xca   : > { %p9904_p3 = scmp.ne.s32.totalorder %s385_s8, %s9903_s13  ;;  %p9912_p1 = scmp.lt.s32.totalorder %s9903_s13, %s9903_s13 }
  0xcc   : > { %p9906_p6 = pnand %p9904_p3, %p11252_p5  ;;  %p9913_p4 = por %p9912_p1, %p9911_p9 }
  0xce   : > { %p9907_p7 = pneg %p9906_p6 }
  0xd0   : > { %p9914_p2 = pnand %p9913_p4, %p9907_p7 }
  0xd2   : > { %9917 = shalt.err (!%p9914_p2)
}
  0xd3   : > { %8379 = dma.hbm_to_vmem [thread:$0]  (!%p11253_p8), %s11199_s7, 192, %s385_s8, [#allocation11]  }
  0xd4   : > { %s10411_s16 = sshll.u32 %s10062_s20, 5  ;;  %s420_s15 = scalar_lea.vmem [#allocation6], %s10390_s22 }
  0xd5   : > { %s428_s2 = sshll.u32 %s420_s15, 4  ;;  %s426_s25 = scalar_lea.hbm %s11195_s3, %s10411_s16  ;;  %s429_s2 = int_to_ptr.vmem [resolvable:$true] %s428_s2 }
  0xd6   : > { %s9918_s12 = scalar_lea.hbm %s426_s25, 32  ;;  %p11254_p11 = scmp.ne.s32.totalorder %s11245_s28, 0 }
  0xd7   : > { %p9919_p5 = scmp.ne.s32.totalorder %s426_s25, %s9918_s12  ;;  %s9923_s0 = scalar_lea.hbm %s11195_s3, 128 }
  0xd8   : > { %p9924_p8 = scmp.lt.u32.totalorder %s426_s25, %s11195_s3  ;;  %p9925_p12 = scmp.lt.u32.totalorder %s9923_s0, %s9918_s12 }
  0xd9   : > { %p9921_p13 = pnand %p9919_p5, %p11254_p11  ;;  %p9927_p3 = scmp.lt.u32.totalorder %s9918_s12, %s426_s25 }
  0xda   : > { %p9926_p0 = por %p9925_p12, %p9924_p8 }
  0xdb   : > { %p9922_p10 = pneg %p9921_p13 }
  0xdc   : > { %p9928_p6 = por %p9927_p3, %p9926_p0 }
  0xde   : > { %p9929_p7 = pnand %p9928_p6, %p9922_p10 }
  0xe0   : > { %9932 = shalt.err (!%p9929_p7)
}
  0xe1   : > { %s9933_s29 = scalar_lea.vmem %s429_s2, 32  ;;  %s10077_s13 = smov [#allocation6]  }
  0xe2   : > { %p9934_p9 = scmp.ne.s32.totalorder %s429_s2, %s9933_s29  ;;  %s9938_s4 = sshll.u32 %s10077_s13, 4  ;;  %s9939_s4 = int_to_ptr.vmem [resolvable:$false] %s9938_s4 }
  0xe3   : > { %s9940_s19 = scalar_lea.vmem %s9939_s4, 64  ;;  %p9941_p2 = scmp.lt.s32.totalorder %s429_s2, %s9939_s4 }
  0xe4   : > { %p9936_p1 = pnand %p9934_p9, %p11254_p11  ;;  %p9942_p5 = scmp.lt.s32.totalorder %s9940_s19, %s9933_s29 }
  0xe6   : > { %p9937_p4 = pneg %p9936_p1  ;;  %p9943_p13 = por %p9942_p5, %p9941_p2 }
  0xe8   : > { %p9944_p8 = pnand %p9943_p13, %p9937_p4 }
  0xea   : > { %9947 = shalt.err (!%p9944_p8)
}
  0xeb   : > { %p11255_p12 = scmp.ne.s32.totalorder %s11244_s14, 0  ;;  %s10435_s17 = scalar_lea.hbm %s11201_s9, %s10411_s16 }
  0xec   : > { %s460_s12 = scalar_lea.vmem [#allocation15], %s10390_s22  ;;  %s9948_s6 = scalar_lea.hbm %s10435_s17, 32 }
  0xed   : > { %8386 = dma.hbm_to_vmem [thread:$0]  (!%p11255_p12), %s426_s25, 32, %s429_s2, %s10271_s27  }
  0xee   : > { %s468_s26 = sshll.u32 %s460_s12, 4  ;;  %p9949_p10 = scmp.ne.s32.totalorder %s10435_s17, %s9948_s6  ;;  %s469_s26 = int_to_ptr.vmem [resolvable:$true] %s468_s26 }
  0xef   : > { %s9953_s27 = scalar_lea.hbm %s11201_s9, 128  ;;  %p9954_p6 = scmp.lt.u32.totalorder %s10435_s17, %s11201_s9 }
  0xf0   : > { %p9951_p0 = pnand %p9949_p10, %p11254_p11  ;;  %p9955_p7 = scmp.lt.u32.totalorder %s9953_s27, %s9948_s6 }
  0xf1   : > { %p9957_p1 = scmp.lt.u32.totalorder %s9948_s6, %s10435_s17 }
  0xf2   : > { %p9952_p3 = pneg %p9951_p0  ;;  %p9956_p9 = por %p9955_p7, %p9954_p6 }
  0xf4   : > { %p9958_p4 = por %p9957_p1, %p9956_p9 }
  0xf6   : > { %p9959_p2 = pnand %p9958_p4, %p9952_p3 }
  0xf8   : > { %9962 = shalt.err (!%p9959_p2)
}
  0xf9   : > { %s9963_s20 = scalar_lea.vmem %s469_s26, 32  ;;  %s10078_s29 = smov [#allocation15]  }
  0xfa   : > { %p9964_p5 = scmp.ne.s32.totalorder %s469_s26, %s9963_s20  ;;  %s9968_s13 = sshll.u32 %s10078_s29, 4  ;;  %s9969_s13 = int_to_ptr.vmem [resolvable:$false] %s9968_s13 }
  0xfb   : > { %s9970_s4 = scalar_lea.vmem %s9969_s13, 64  ;;  %p9971_p10 = scmp.lt.s32.totalorder %s469_s26, %s9969_s13 }
  0xfc   : > { %p9966_p13 = pnand %p9964_p5, %p11254_p11  ;;  %p9972_p0 = scmp.lt.s32.totalorder %s9970_s4, %s9963_s20 }
  0xfe   : > { %p9967_p8 = pneg %p9966_p13  ;;  %p9973_p12 = por %p9972_p0, %p9971_p10 }
 0x100   : > { %p9974_p6 = pnand %p9973_p12, %p9967_p8 }
 0x102   : > { %9977 = shalt.err (!%p9974_p6)
}
 0x103   : > { %p11256_p7 = scmp.ne.s32.totalorder %s11244_s14, 0  ;;  %s10460_s30 = scalar_lea.hbm %s11202_s10, %s10411_s16 }
 0x104   : > { %s479_s12 = scalar_lea.vmem [#allocation16], %s10390_s22  ;;  %s476_s0 = scalar_lea.sflag [#allocation17], %s10252_s24 }
 0x105   : > { %8392 = dma.hbm_to_vmem [thread:$0]  (!%p11256_p7), %s10435_s17, 32, %s469_s26, %s10320_s11  }
 0x106   : > { %s487_s6 = sshll.u32 %s479_s12, 4  ;;  %s9978_s8 = scalar_lea.hbm %s10460_s30, 32  ;;  %s488_s6 = int_to_ptr.vmem [resolvable:$true] %s487_s6 }
 0x107   : > { %p9979_p12 = scmp.ne.s32.totalorder %s10460_s30, %s9978_s8  ;;  %s9983_s17 = scalar_lea.hbm %s11202_s10, 128 }
 0x108   : > { %p9984_p1 = scmp.lt.u32.totalorder %s10460_s30, %s11202_s10  ;;  %p9985_p4 = scmp.lt.u32.totalorder %s9983_s17, %s9978_s8 }
 0x109   : > { %p9981_p3 = pnand %p9979_p12, %p11254_p11  ;;  %p9987_p5 = scmp.lt.u32.totalorder %s9978_s8, %s10460_s30 }
 0x10a   : > { %p9986_p2 = por %p9985_p4, %p9984_p1 }
 0x10b   : > { %p9982_p9 = pneg %p9981_p3 }
 0x10c   : > { %p9988_p13 = por %p9987_p5, %p9986_p2 }
 0x10e   : > { %p9989_p8 = pnand %p9988_p13, %p9982_p9 }
 0x110   : > { %9992 = shalt.err (!%p9989_p8)
}
 0x111   : > { %s9993_s24 = scalar_lea.vmem %s488_s6, 32  ;;  %s10079_s22 = smov [#allocation16]  }
 0x112   : > { %p9994_p10 = scmp.ne.s32.totalorder %s488_s6, %s9993_s24  ;;  %s9998_s2 = sshll.u32 %s10079_s22, 4  ;;  %s9999_s2 = int_to_ptr.vmem [resolvable:$false] %s9998_s2 }
 0x113   : > { %s10000_s25 = scalar_lea.vmem %s9999_s2, 64  ;;  %p10001_p12 = scmp.lt.s32.totalorder %s488_s6, %s9999_s2 }
 0x114   : > { %p9996_p0 = pnand %p9994_p10, %p11254_p11  ;;  %p10002_p3 = scmp.lt.s32.totalorder %s10000_s25, %s9993_s24 }
 0x116   : > { %p9997_p6 = pneg %p9996_p0  ;;  %p10003_p7 = por %p10002_p3, %p10001_p12 }
 0x118   : > { %p10004_p1 = pnand %p10003_p7, %p9997_p6 }
 0x11a   : > { %10007 = shalt.err (!%p10004_p1)
}
 0x11b   : > { %p11257_p4 = scmp.ne.s32.totalorder %s11244_s14, 0  ;;  %p11258_p9 = scmp.ne.s32.totalorder %s11236_s23, 0 }
 0x11c   : > { %p11259_p2 = scmp.eq.s32.totalorder (!%p11258_p9), %s10162_s21, 0 }
 0x11d   : > { %8395 = dma.hbm_to_vmem [thread:$0]  (!%p11257_p4), %s10460_s30, 32, %s488_s6, %s476_s0  }
 0x11e   : > { %496 = sbr.rel (%p11258_p9) target bundleno = 1927 (0x787), region = 64 }
 0x125   : > { %10025 = dma.done.wait (%p11259_p2), [#allocation3], 32   ;;  %p11260_p11 = pmov %p11259_p2 }
 0x126   : > { %s11261_s28 = sld [smem:[#allocation25_spill]]  ;;  %s502_s20 = sand.u32 1, %s10162_s21  }
 0x127   : > { %10027 = vsyncadd (%p11260_p11), [#allocation3], 4294967264  ;;  %s504_s29 = sand.u32 1, %s10054_s18   ;;  %s503_s4 = scalar_lea.sflag [#allocation5], %s502_s20 }
 0x128   : > { %s7378_s13 = sshll.u32 %s504_s29, 11 }
 0x129   : > { %s10489_s19 = scalar_lea.vmem [#allocation4], %s7378_s13 }
 0x12c   : > { %p11262_p7 = scmp.ne.s32.totalorder %s11261_s28, 0 }
 0x12e   : > { %10029 = dma.done.wait (%p11262_p7), %s503_s4, 32800  }
 0x12f   : > { %10031 = vsyncadd (%p11262_p7), %s503_s4, 4294934496  ;;  %s10495_s23 = sshll.u32 %s504_s29, 1  ;;  %p11263_p5 = pmov %p11259_p2 }
 0x130   : > { %s515_s14 = scalar_lea.vmem [#allocation6], %s10495_s23 }
 0x131   : > { %10033 = dma.done.wait (%p11263_p5), [#allocation8], 1088   ;;  %p11264_p13 = pmov %p11259_p2 }
 0x132   : > { %p11265_p8 = pmov %p11259_p2 }
 0x133   : > { %10035 = vsyncadd (%p11264_p13), [#allocation8], 4294966208 }
 0x134   : > { %10037 = dma.done.wait (%p11265_p8), [#allocation11], 49344   ;;  %p11266_p10 = pmov %p11259_p2 }
 0x135   : > { %s8333_s15 = smul.u32 1536, %s504_s29  ;;  %s537_s30 = scalar_lea.sflag [#allocation14], %s502_s20 }
 0x136   : > { %10039 = vsyncadd (%p11266_p10), [#allocation11], 4294917952 }
 0x137   : > { %s10506_s12 = scalar_lea.vmem [#allocation13], %s8333_s15 }
 0x138   : > { %10041 = dma.done.wait (%p11262_p7), %s537_s30, 24608  }
 0x139   : > { %10043 = vsyncadd (%p11262_p7), %s537_s30, 4294942688  ;;  %s549_s6 = scalar_lea.vmem [#allocation15], %s10495_s23  ;;  %s555_s0 = scalar_lea.sflag [#allocation17], %s504_s29 }
 0x13a   : > { %s558_s8 = scalar_lea.vmem [#allocation16], %s10495_s23 }
 0x13b   : > { %10045 = dma.done.wait (%p11262_p7), %s555_s0, 32  }
 0x13c   : > { %10047 = vsyncadd (%p11262_p7), %s555_s0, 4294967264  ;;  %v8453_v0 = vld [vmem:[%s10489_s19 + $0x304] ss:$8 sps:$4 sm:$0xff]   ;;  %v8455_v1 = vld [vmem:[%s10489_s19 + $0x300] ss:$8 sps:$4 sm:$0xff]   ;;  %v640_v11 = vlaneseq  ;;  %s11267_s17 = sld [smem:[#allocation28_spill]] }
 0x13d   : > { %2407 = vmatprep.subr.bf16.mxu0 %v8453_v0  ;;  %v8456_v2 = vld [vmem:[%s10489_s19 + $0x314] ss:$8 sps:$4 sm:$0xff]   ;;  %v8458_v3 = vld [vmem:[%s10489_s19 + $0x310] ss:$8 sps:$4 sm:$0xff]   ;;  %v8459_v4 = vld [vmem:[%s10489_s19 + $0x324] ss:$8 sps:$4 sm:$0xff]  }
 0x13e   : > { %2408 = vmatpush1.bf16.msra.mxu0 %v8455_v1  ;;  %v8461_v5 = vld [vmem:[%s10489_s19 + $0x320] ss:$8 sps:$4 sm:$0xff]   ;;  %v8462_v6 = vld [vmem:[%s10489_s19 + $0x334] ss:$8 sps:$4 sm:$0xff]   ;;  %v8464_v7 = vld [vmem:[%s10489_s19 + $0x330] ss:$8 sps:$4 sm:$0xff]  }
 0x13f   : > { %2409 = vmatprep.subr.bf16.mxu0 %v8456_v2  ;;  %v8465_v8 = vld [vmem:[%s10489_s19 + $0x344] ss:$8 sps:$4 sm:$0xff]   ;;  %v10080_v9 = vmov 1983009808   ;;  %v8467_v12 = vld [vmem:[%s10489_s19 + $0x340] ss:$8 sps:$4 sm:$0xff]  }
 0x140   : > { %v638_v10 = vunpack.c.l.s4 %v10080_v9  ;;  %v8468_v13 = vld [vmem:[%s10489_s19 + $0x354] ss:$8 sps:$4 sm:$0xff]   ;;  %v10529_v15 = vshrl.u32 %v640_v11, 7  ;;  %v8470_v16 = vld [vmem:[%s10489_s19 + $0x350] ss:$8 sps:$4 sm:$0xff]   ;;  %vm2647_vm0 = vcmask 1042432  }
 0x141   : > { %v8471_v17 = vld [vmem:[%s10489_s19 + $0x364] ss:$8 sps:$4 sm:$0xff]   ;;  %v8503_v20 = vld [vmem:[%s10489_s19] ss:$8 sps:$4 sm:$0xff]   ;;  %v8474_v24 = vld [vmem:[%s10489_s19 + $0x374] ss:$8 sps:$4 sm:$0xff]  }
 0x142   : > { %2410 = vmatpush1.bf16.msra.mxu0 %v8458_v3  ;;  %v639_v14 = vunpack.c.0.s8 %v638_v10  ;;  %v8501_v19 = vld [vmem:[%s10489_s19 + $0x4] ss:$8 sps:$4 sm:$0xff]   ;;  %s11268_s26 = smov %s11267_s17  ;;  %v8473_v22 = vld [vmem:[%s10489_s19 + $0x360] ss:$8 sps:$4 sm:$0xff]   ;;  %v8508_v26 = vld [vmem:[%s10489_s19 + $0x14] ss:$8 sps:$4 sm:$0xff]  }
 0x143   : > { %2411 = vmatprep.subr.bf16.mxu0 %v8459_v4  ;;  %v10541_v21 = vld [vmem:[%s11267_s17 + $0x8] sm:$0xff]  ;;  %2284 = vmatprep.subr.bf16.mxu1 %v8501_v19  ;;  %v8510_v27 = vld [vmem:[%s10489_s19 + $0x10] ss:$8 sps:$4 sm:$0xff]   ;;  %v8520_v34 = vld [vmem:[%s10489_s19 + $0x34] ss:$8 sps:$4 sm:$0xff]   ;;  %vm10081_vm1 = vmmov 1  }
 0x144   : > { %v10534_v18 = vsub.s32 %v639_v14, %v10529_v15  ;;  %v653_v23 = vcombine.high %v10541_v21, %v10541_v21  ;;  %2285 = vmatpush1.bf16.msra.mxu1 %v8503_v20  ;;  %v8476_v28 = vld [vmem:[%s10489_s19 + $0x370] ss:$8 sps:$4 sm:$0xff]   ;;  %v8514_v30 = vld [vmem:[%s10489_s19 + $0x24] ss:$8 sps:$4 sm:$0xff]   ;;  %v8516_v33 = vld [vmem:[%s10489_s19 + $0x20] ss:$8 sps:$4 sm:$0xff]  }
 0x145   : > { %2286 = vmatprep.subr.bf16.mxu1 %v8508_v26  ;;  %v8477_v31 = vld [vmem:[%s10489_s19 + $0x384] ss:$8 sps:$4 sm:$0xff]   ;;  %v8479_v35 = vld [vmem:[%s10489_s19 + $0x380] ss:$8 sps:$4 sm:$0xff]   ;;  %v8480_v36 = vld [vmem:[%s10489_s19 + $0x394] ss:$8 sps:$4 sm:$0xff]  }
 0x146   : > { %2412 = vmatpush1.bf16.msra.mxu0 %v8461_v5  ;;  %v10548_v25 = vrot.slane %v653_v23, %v10534_v18  ;;  %v8522_v37 = vld [vmem:[%s10489_s19 + $0x30] ss:$8 sps:$4 sm:$0xff]   ;;  %v8526_v38 = vld [vmem:[%s10489_s19 + $0x44] ss:$8 sps:$4 sm:$0xff]   ;;  %v8528_v41 = vld [vmem:[%s10489_s19 + $0x40] ss:$8 sps:$4 sm:$0xff]  }
 0x147   : > { %2413 = vmatprep.subr.bf16.mxu0 %v8462_v6  ;;  %v8482_v39 = vld [vmem:[%s10489_s19 + $0x390] ss:$8 sps:$4 sm:$0xff]   ;;  %v8483_v40 = vld [vmem:[%s10489_s19 + $0x3a4] ss:$8 sps:$4 sm:$0xff]   ;;  %v8532_v42 = vld [vmem:[%s10489_s19 + $0x54] ss:$8 sps:$4 sm:$0xff]  }
 0x148   : > { %v669_v29 = vcombine.high %v10548_v25, %v10548_v25  ;;  %2287 = vmatpush1.bf16.msra.mxu1 %v8510_v27  ;;  %v8485_v43 = vld [vmem:[%s10489_s19 + $0x3a0] ss:$8 sps:$4 sm:$0xff]   ;;  %v8486_v44 = vld [vmem:[%s10489_s19 + $0x3b4] ss:$8 sps:$4 sm:$0xff]   ;;  %v8534_v45 = vld [vmem:[%s10489_s19 + $0x50] ss:$8 sps:$4 sm:$0xff]   ;;  %v726_v2 = vpack.c.bf16 %v10548_v25, %v10548_v25 }
 0x149   : > { %2288 = vmatprep.subr.bf16.mxu1 %v8514_v30  ;;  %v8538_v46 = vld [vmem:[%s10489_s19 + $0x64] ss:$8 sps:$4 sm:$0xff]   ;;  %v8488_v47 = vld [vmem:[%s10489_s19 + $0x3b0] ss:$8 sps:$4 sm:$0xff]   ;;  %v8540_v49 = vld [vmem:[%s10489_s19 + $0x60] ss:$8 sps:$4 sm:$0xff]  }
 0x14a   : > { %2414 = vmatpush1.bf16.msra.mxu0 %v8464_v7  ;;  %v727_v32 = vpack.c.bf16 %v669_v29, %v669_v29  ;;  %v8489_v48 = vld [vmem:[%s10489_s19 + $0x3c4] ss:$8 sps:$4 sm:$0xff]   ;;  %v8544_v50 = vld [vmem:[%s10489_s19 + $0x74] ss:$8 sps:$4 sm:$0xff]   ;;  %v8491_v51 = vld [vmem:[%s10489_s19 + $0x3c0] ss:$8 sps:$4 sm:$0xff]  }
 0x14b   : > { %2415 = vmatprep.subr.bf16.mxu0 %v8465_v8  ;;  %v8492_v52 = vld [vmem:[%s10489_s19 + $0x3d4] ss:$8 sps:$4 sm:$0xff]   ;;  %v8546_v53 = vld [vmem:[%s10489_s19 + $0x70] ss:$8 sps:$4 sm:$0xff]   ;;  %v8550_v54 = vld [vmem:[%s10489_s19 + $0x84] ss:$8 sps:$4 sm:$0xff]  }
 0x14c   : > { %2439 = vmatprep.mubr.bf16.mxu0 %v727_v32  ;;  %2289 = vmatpush1.bf16.msra.mxu1 %v8516_v33  ;;  %v8494_v55 = vld [vmem:[%s10489_s19 + $0x3d0] ss:$8 sps:$4 sm:$0xff]   ;;  %v8495_v56 = vld [vmem:[%s10489_s19 + $0x3e4] ss:$8 sps:$4 sm:$0xff]   ;;  %v8552_v57 = vld [vmem:[%s10489_s19 + $0x80] ss:$8 sps:$4 sm:$0xff]  }
 0x14d   : > { %2290 = vmatprep.subr.bf16.mxu1 %v8520_v34  ;;  %v8556_v58 = vld [vmem:[%s10489_s19 + $0x94] ss:$8 sps:$4 sm:$0xff]   ;;  %v8497_v59 = vld [vmem:[%s10489_s19 + $0x3e0] ss:$8 sps:$4 sm:$0xff]   ;;  %v8558_v61 = vld [vmem:[%s10489_s19 + $0x90] ss:$8 sps:$4 sm:$0xff]  }
 0x14e   : > { %2416 = vmatpush1.bf16.msra.mxu0 %v8467_v12  ;;  %v8498_v60 = vld [vmem:[%s10489_s19 + $0x3f4] ss:$8 sps:$4 sm:$0xff]   ;;  %v8562_v62 = vld [vmem:[%s10489_s19 + $0xa4] ss:$8 sps:$4 sm:$0xff]   ;;  %v8500_v63 = vld [vmem:[%s10489_s19 + $0x3f0] ss:$8 sps:$4 sm:$0xff]  }
 0x14f   : > { %2417 = vmatprep.subr.bf16.mxu0 %v8468_v13  ;;  %v8507_v0 = vld [vmem:[%s10489_s19 + $0x404] ss:$8 sps:$4 sm:$0xff]   ;;  %v8564_v1 = vld [vmem:[%s10489_s19 + $0xa0] ss:$8 sps:$4 sm:$0xff]   ;;  %v8568_v3 = vld [vmem:[%s10489_s19 + $0xb4] ss:$8 sps:$4 sm:$0xff]  }
 0x150   : > { %2291 = vmatpush1.bf16.msra.mxu1 %v8522_v37  ;;  %v8505_v4 = vld [vmem:[%s10489_s19 + $0x400] ss:$8 sps:$4 sm:$0xff]   ;;  %v8513_v5 = vld [vmem:[%s10489_s19 + $0x414] ss:$8 sps:$4 sm:$0xff]   ;;  %v8570_v7 = vld [vmem:[%s10489_s19 + $0xb0] ss:$8 sps:$4 sm:$0xff]  }
 0x151   : > { %2292 = vmatprep.subr.bf16.mxu1 %v8526_v38  ;;  %v628_v6 = vld [vmem:[%s11268_s26] sm:$0xff]  ;;  %v10604_v10 = vld [vmem:[%s11268_s26 + $0x10] sm:$0xff]  ;;  %vm10788_vm2 = vmpackc.low %vm2647_vm0, %vm10081_vm1  ;;  %vm2643_vm3 = vcmask 89088   ;;  %s7386_s20 = sshll.u32 %s10162_s21, 1  ;;  %s11271_s4 = sld [smem:[#allocation33_spill]] }
 0x152   : > { %2418 = vmatpush1.bf16.msra.mxu0 %v8470_v16  ;;  %v8574_v8 = vld [vmem:[%s10489_s19 + $0xc4] ss:$8 sps:$4 sm:$0xff]   ;;  %v643_v9 = vrot.slane %v628_v6, %v10534_v18  ;;  %v8511_v11 = vld [vmem:[%s10489_s19 + $0x410] ss:$8 sps:$4 sm:$0xff]   ;;  %v10609_v13 = vrot.slane %v10604_v10, %v10534_v18  ;;  %v8576_v16 = vld [vmem:[%s10489_s19 + $0xc0] ss:$8 sps:$4 sm:$0xff]   ;;  %v636_v26 = vcombine.high %v628_v6, %v628_v6 }
 0x153   : > { %2419 = vmatprep.subr.bf16.mxu0 %v8471_v17  ;;  %v8519_v14 = vld [vmem:[%s10489_s19 + $0x424] ss:$8 sps:$4 sm:$0xff]   ;;  %v8580_v20 = vld [vmem:[%s10489_s19 + $0xd4] ss:$8 sps:$4 sm:$0xff]   ;;  %v8582_v25 = vld [vmem:[%s10489_s19 + $0xd0] ss:$8 sps:$4 sm:$0xff]  }
 0x154   : > { %2293 = vmatpush1.bf16.msra.mxu1 %v8528_v41  ;;  %v651_v12 = vcombine.high %v643_v9, %v643_v9  ;;  %v685_v19 = vcombine.high %v10609_v13, %v10609_v13  ;;  %v8586_v27 = vld [vmem:[%s10489_s19 + $0xe4] ss:$8 sps:$4 sm:$0xff]   ;;  %v8588_v30 = vld [vmem:[%s10489_s19 + $0xe0] ss:$8 sps:$4 sm:$0xff]   ;;  %v8592_v32 = vld [vmem:[%s10489_s19 + $0xf4] ss:$8 sps:$4 sm:$0xff]  }
 0x155   : > { %2294 = vmatprep.subr.bf16.mxu1 %v8532_v42  ;;  %v8531_v29 = vld [vmem:[%s10489_s19 + $0x444] ss:$8 sps:$4 sm:$0xff]   ;;  %v8529_v33 = vld [vmem:[%s10489_s19 + $0x440] ss:$8 sps:$4 sm:$0xff]   ;;  %v8537_v34 = vld [vmem:[%s10489_s19 + $0x454] ss:$8 sps:$4 sm:$0xff]  }
 0x156   : > { %2420 = vmatpush1.bf16.msra.mxu0 %v8473_v22  ;;  %v721_v17 = vpack.c.bf16 %v651_v12, %v651_v12  ;;  %v8517_v22 = vld [vmem:[%s10489_s19 + $0x420] ss:$8 sps:$4 sm:$0xff]   ;;  %v729_v23 = vpack.c.bf16 %v685_v19, %v685_v19  ;;  %v8601_v37 = vld [vmem:[%s10489_s19 + $0x104] ss:$8 sps:$4 sm:$0xff]   ;;  %v8535_v38 = vld [vmem:[%s10489_s19 + $0x450] ss:$8 sps:$4 sm:$0xff]  }
 0x157   : > { %2421 = vmatprep.subr.bf16.mxu0 %v8474_v24  ;;  %v8525_v24 = vld [vmem:[%s10489_s19 + $0x434] ss:$8 sps:$4 sm:$0xff]   ;;  %v8599_v41 = vld [vmem:[%s10489_s19 + $0x100] ss:$8 sps:$4 sm:$0xff]   ;;  %v8641_v6 = vld [vmem:[%s10489_s19 + $0x170] ss:$8 sps:$4 sm:$0xff]  }
 0x158   : > { %2295 = vmatpush1.bf16.msra.mxu1 %v8534_v45  ;;  %2316 = vmatprep.mubr.bf16.mxu1 %v721_v17  ;;  %v8549_v45 = vld [vmem:[%s10489_s19 + $0x474] ss:$8 sps:$4 sm:$0xff]   ;;  %v8647_v12 = vld [vmem:[%s10489_s19 + $0x180] ss:$8 sps:$4 sm:$0xff]   ;;  %p623_p0 = scmp.lt.s32.totalorder %s7386_s20, 7 }
 0x159   : > { %2296 = vmatprep.subr.bf16.mxu1 %v8538_v46  ;;  %v8605_v46 = vld [vmem:[%s10489_s19 + $0x110] ss:$8 sps:$4 sm:$0xff]   ;;  %v8597_v19 = vld [vmem:[%s10489_s19 + $0x4f4] ss:$8 sps:$4 sm:$0xff]  }
 0x15a   : > { %2422 = vmatpush1.bf16.msra.mxu0 %v8476_v28  ;;  %v8523_v28 = vld [vmem:[%s10489_s19 + $0x430] ss:$8 sps:$4 sm:$0xff]   ;;  %s11278_s20 = smov (!%p623_p0, %s7386_s20), 7 }
 0x15b   : > { %2423 = vmatprep.subr.bf16.mxu0 %v8477_v31  ;;  %v10624_v31 = vrot.slane %v636_v26, %v10534_v18  ;;  %v728_v26 = vpack.c.bf16 %v10609_v13, %v10609_v13  ;;  %v8608_v13 = vld [vmem:[%s10489_s19 + $0x510] ss:$8 sps:$4 sm:$0xff]   ;;  %s7387_s29 = sshll.u32 %s11278_s20, 1 }
 0x15c   : > { %2297 = vmatpush1.bf16.msra.mxu1 %v8540_v49  ;;  %v8555_v49 = vld [vmem:[%s10489_s19 + $0x484] ss:$8 sps:$4 sm:$0xff]  }
 0x15d   : > { %2298 = vmatprep.subr.bf16.mxu1 %v8544_v50  ;;  %v8611_v50 = vld [vmem:[%s10489_s19 + $0x120] ss:$8 sps:$4 sm:$0xff]  }
 0x15e   : > { %2424 = vmatpush1.bf16.msra.mxu0 %v8479_v35  ;;  %v8594_v35 = vld [vmem:[%s10489_s19 + $0xf0] ss:$8 sps:$4 sm:$0xff]  }
 0x15f   : > { %2425 = vmatprep.subr.bf16.mxu0 %v8480_v36  ;;  %v652_v36 = vcombine.high %v10624_v31, %v10624_v31 }
 0x160   : > { %2299 = vmatpush1.bf16.msra.mxu1 %v8546_v53  ;;  %v8561_v53 = vld [vmem:[%s10489_s19 + $0x494] ss:$8 sps:$4 sm:$0xff]  }
 0x161   : > { %2300 = vmatprep.subr.bf16.mxu1 %v8550_v54  ;;  %v723_v42 = vpack.c.bf16 %v652_v36, %v652_v36  ;;  %v8617_v54 = vld [vmem:[%s10489_s19 + $0x130] ss:$8 sps:$4 sm:$0xff]   ;;  %v8679_v36 = vld [vmem:[%s10489_s19 + $0x1d4] ss:$8 sps:$4 sm:$0xff]  }
 0x162   : > { %2426 = vmatpush1.bf16.msra.mxu0 %v8482_v39  ;;  %v8543_v39 = vld [vmem:[%s10489_s19 + $0x464] ss:$8 sps:$4 sm:$0xff]  }
 0x163   : > { %2427 = vmatprep.subr.bf16.mxu0 %v8483_v40  ;;  %v720_v40 = vpack.c.bf16 %v643_v9, %v643_v9  ;;  %v670_v9 = vcombine.high %v10604_v10, %v10604_v10  ;;  %v8653_v10 = vld [vmem:[%s10489_s19 + $0x190] ss:$8 sps:$4 sm:$0xff]  }
 0x164   : > { %2301 = vmatpush1.bf16.msra.mxu1 %v8552_v57  ;;  %v8567_v57 = vld [vmem:[%s10489_s19 + $0x4a4] ss:$8 sps:$4 sm:$0xff]  }
 0x165   : > { %2302 = vmatprep.subr.bf16.mxu1 %v8556_v58  ;;  %v8623_v58 = vld [vmem:[%s10489_s19 + $0x140] ss:$8 sps:$4 sm:$0xff]   ;;  %v10673_v17 = vrot.slane %v670_v9, %v10534_v18  ;;  %v8726_v9 = vld [vmem:[%s10489_s19 + $0x250] ss:$8 sps:$4 sm:$0xff]  }
 0x166   : > { %2428 = vmatpush1.bf16.msra.mxu0 %v8485_v43  ;;  %v8607_v43 = vld [vmem:[%s10489_s19 + $0x114] ss:$8 sps:$4 sm:$0xff]  }
 0x167   : > { %2429 = vmatprep.subr.bf16.mxu0 %v8486_v44  ;;  %v8541_v44 = vld [vmem:[%s10489_s19 + $0x460] ss:$8 sps:$4 sm:$0xff]  }
 0x168   : > { %2303 = vmatpush1.bf16.msra.mxu1 %v8558_v61  ;;  %v8573_v61 = vld [vmem:[%s10489_s19 + $0x4b4] ss:$8 sps:$4 sm:$0xff]  }
 0x169   : > { %2304 = vmatprep.subr.bf16.mxu1 %v8562_v62  ;;  %v8629_v62 = vld [vmem:[%s10489_s19 + $0x150] ss:$8 sps:$4 sm:$0xff]  }
 0x16a   : > { %2430 = vmatpush1.bf16.msra.mxu0 %v8488_v47  ;;  %v8613_v47 = vld [vmem:[%s10489_s19 + $0x124] ss:$8 sps:$4 sm:$0xff]  }
 0x16b   : > { %2431 = vmatprep.subr.bf16.mxu0 %v8489_v48  ;;  %v8547_v48 = vld [vmem:[%s10489_s19 + $0x470] ss:$8 sps:$4 sm:$0xff]  }
 0x16c   : > { %2305 = vmatpush1.bf16.msra.mxu1 %v8564_v1  ;;  %v8579_v1 = vld [vmem:[%s10489_s19 + $0x4c4] ss:$8 sps:$4 sm:$0xff]  }
 0x16d   : > { %2306 = vmatprep.subr.bf16.mxu1 %v8568_v3  ;;  %v8643_v3 = vld [vmem:[%s10489_s19 + $0x174] ss:$8 sps:$4 sm:$0xff]  }
 0x16e   : > { %2432 = vmatpush1.bf16.msra.mxu0 %v8491_v51  ;;  %v8619_v51 = vld [vmem:[%s10489_s19 + $0x134] ss:$8 sps:$4 sm:$0xff]  }
 0x16f   : > { %2433 = vmatprep.subr.bf16.mxu0 %v8492_v52  ;;  %v8553_v52 = vld [vmem:[%s10489_s19 + $0x480] ss:$8 sps:$4 sm:$0xff]  }
 0x170   : > { %2307 = vmatpush1.bf16.msra.mxu1 %v8570_v7  ;;  %v8649_v7 = vld [vmem:[%s10489_s19 + $0x184] ss:$8 sps:$4 sm:$0xff]  }
 0x171   : > { %2308 = vmatprep.subr.bf16.mxu1 %v8574_v8  ;;  %v8583_v8 = vld [vmem:[%s10489_s19 + $0x4d0] ss:$8 sps:$4 sm:$0xff]  }
 0x172   : > { %2434 = vmatpush1.bf16.msra.mxu0 %v8494_v55  ;;  %v8625_v55 = vld [vmem:[%s10489_s19 + $0x144] ss:$8 sps:$4 sm:$0xff]  }
 0x173   : > { %2435 = vmatprep.subr.bf16.mxu0 %v8495_v56  ;;  %v8559_v56 = vld [vmem:[%s10489_s19 + $0x490] ss:$8 sps:$4 sm:$0xff]  }
 0x174   : > { %2309 = vmatpush1.bf16.msra.mxu1 %v8576_v16  ;;  %v8589_v16 = vld [vmem:[%s10489_s19 + $0x4e0] ss:$8 sps:$4 sm:$0xff]  }
 0x175   : > { %2310 = vmatprep.subr.bf16.mxu1 %v8580_v20  ;;  %v8661_v20 = vld [vmem:[%s10489_s19 + $0x1a4] ss:$8 sps:$4 sm:$0xff]  }
 0x176   : > { %2436 = vmatpush1.bf16.msra.mxu0 %v8497_v59  ;;  %v8631_v59 = vld [vmem:[%s10489_s19 + $0x154] ss:$8 sps:$4 sm:$0xff]  }
 0x177   : > { %2437 = vmatprep.subr.bf16.mxu0 %v8498_v60  ;;  %v8565_v60 = vld [vmem:[%s10489_s19 + $0x4a0] ss:$8 sps:$4 sm:$0xff]  }
 0x178   : > { %2311 = vmatpush1.bf16.msra.mxu1 %v8582_v25  ;;  %v8659_v25 = vld [vmem:[%s10489_s19 + $0x1a0] ss:$8 sps:$4 sm:$0xff]  }
 0x179   : > { %2312 = vmatprep.subr.bf16.mxu1 %v8586_v27  ;;  %v8667_v27 = vld [vmem:[%s10489_s19 + $0x1b4] ss:$8 sps:$4 sm:$0xff]  }
 0x17a   : > { %2438 = vmatpush1.bf16.msra.mxu0 %v8500_v63  ;;  %v8637_v63 = vld [vmem:[%s10489_s19 + $0x164] ss:$8 sps:$4 sm:$0xff]  }
 0x17b   : > { %2448 = vmatprep.subr.bf16.mxu0 %v8507_v0  ;;  %v8571_v0 = vld [vmem:[%s10489_s19 + $0x4b0] ss:$8 sps:$4 sm:$0xff]  }
 0x17c   : > { %2313 = vmatpush1.bf16.msra.mxu1 %v8588_v30  ;;  %v8610_v30 = vld [vmem:[%s10489_s19 + $0x514] ss:$8 sps:$4 sm:$0xff]  }
 0x17d   : > { %2440 = vmatmul.mubr.bf16.vlgmr.msra.gmra.mrb[0].mxu0 %v726_v2  ;;  %2314 = vmatprep.subr.bf16.mxu1 %v8592_v32  ;;  %v8635_v2 = vld [vmem:[%s10489_s19 + $0x160] ss:$8 sps:$4 sm:$0xff]   ;;  %v8665_v32 = vld [vmem:[%s10489_s19 + $0x1b0] ss:$8 sps:$4 sm:$0xff]  }
 0x17e   : > { %2449 = vmatpush1.bf16.msra.mxu0 %v8505_v4  ;;  %2480 = vmatprep.mubr.bf16.mxu0 %v729_v23  ;;  %v8577_v4 = vld [vmem:[%s10489_s19 + $0x4c0] ss:$8 sps:$4 sm:$0xff]   ;;  %v686_v23 = vcombine.high %v10673_v17, %v10673_v17 }
 0x17f   : > { %2450 = vmatprep.subr.bf16.mxu0 %v8513_v5  ;;  %v8585_v5 = vld [vmem:[%s10489_s19 + $0x4d4] ss:$8 sps:$4 sm:$0xff]  }
 0x180   : > { %2315 = vmatpush1.bf16.msra.mxu1 %v8594_v35  ;;  %v8671_v35 = vld [vmem:[%s10489_s19 + $0x1c0] ss:$8 sps:$4 sm:$0xff]  }
 0x181   : > { %2325 = vmatprep.subr.bf16.mxu1 %v8601_v37  ;;  %v8614_v37 = vld [vmem:[%s10489_s19 + $0x520] ss:$8 sps:$4 sm:$0xff]  }
 0x182   : > { %2451 = vmatpush1.bf16.msra.mxu0 %v8511_v11  ;;  %v8591_v11 = vld [vmem:[%s10489_s19 + $0x4e4] ss:$8 sps:$4 sm:$0xff]  }
 0x183   : > { %2452 = vmatprep.subr.bf16.mxu0 %v8519_v14  ;;  %2317 = vmatmul.mubr.bf16.vlgmr.msra.gmra.mrb[0].mxu1 %v720_v40  ;;  %v8655_v14 = vld [vmem:[%s10489_s19 + $0x194] ss:$8 sps:$4 sm:$0xff]   ;;  %v8685_v40 = vld [vmem:[%s10489_s19 + $0x1e4] ss:$8 sps:$4 sm:$0xff]  }
 0x184   : > { %2326 = vmatpush1.bf16.msra.mxu1 %v8599_v41  ;;  %2357 = vmatprep.mubr.bf16.mxu1 %v723_v42  ;;  %v8620_v41 = vld [vmem:[%s10489_s19 + $0x530] ss:$8 sps:$4 sm:$0xff]   ;;  %v8628_v42 = vld [vmem:[%s10489_s19 + $0x544] ss:$8 sps:$4 sm:$0xff]  }
 0x185   : > { %2327 = vmatprep.subr.bf16.mxu1 %v8607_v43  ;;  %v8683_v43 = vld [vmem:[%s10489_s19 + $0x1e0] ss:$8 sps:$4 sm:$0xff]  }
 0x186   : > { %2453 = vmatpush1.bf16.msra.mxu0 %v8517_v22  ;;  %v8595_v22 = vld [vmem:[%s10489_s19 + $0x4f0] ss:$8 sps:$4 sm:$0xff]  }
 0x187   : > { %2454 = vmatprep.subr.bf16.mxu0 %v8525_v24  ;;  %v8604_v24 = vld [vmem:[%s10489_s19 + $0x504] ss:$8 sps:$4 sm:$0xff]  }
 0x188   : > { %2328 = vmatpush1.bf16.msra.mxu1 %v8605_v46  ;;  %v8626_v46 = vld [vmem:[%s10489_s19 + $0x540] ss:$8 sps:$4 sm:$0xff]  }
 0x189   : > { %2329 = vmatprep.subr.bf16.mxu1 %v8613_v47  ;;  %v8634_v47 = vld [vmem:[%s10489_s19 + $0x554] ss:$8 sps:$4 sm:$0xff]  }
 0x18a   : > { %2455 = vmatpush1.bf16.msra.mxu0 %v8523_v28  ;;  %v8602_v28 = vld [vmem:[%s10489_s19 + $0x500] ss:$8 sps:$4 sm:$0xff]  }
 0x18b   : > { %2456 = vmatprep.subr.bf16.mxu0 %v8531_v29  ;;  %v731_v29 = vpack.c.bf16 %v686_v23, %v686_v23  ;;  %v8746_v23 = vld [vmem:[%s10489_s19 + $0x284] ss:$8 sps:$4 sm:$0xff]  }
 0x18c   : > { %2330 = vmatpush1.bf16.msra.mxu1 %v8611_v50  ;;  %v8697_v50 = vld [vmem:[%s10489_s19 + $0x204] ss:$8 sps:$4 sm:$0xff]  }
 0x18d   : > { %2331 = vmatprep.subr.bf16.mxu1 %v8619_v51  ;;  %v8640_v51 = vld [vmem:[%s10489_s19 + $0x564] ss:$8 sps:$4 sm:$0xff]  }
 0x18e   : > { %2457 = vmatpush1.bf16.msra.mxu0 %v8529_v33  ;;  %v8673_v33 = vld [vmem:[%s10489_s19 + $0x1c4] ss:$8 sps:$4 sm:$0xff]  }
 0x18f   : > { %2458 = vmatprep.subr.bf16.mxu0 %v8537_v34  ;;  %v8616_v34 = vld [vmem:[%s10489_s19 + $0x524] ss:$8 sps:$4 sm:$0xff]  }
 0x190   : > { %2332 = vmatpush1.bf16.msra.mxu1 %v8617_v54 }
 0x191   : > { %2333 = vmatprep.subr.bf16.mxu1 %v8625_v55  ;;  %v8704_v55 = vld [vmem:[%s10489_s19 + $0x214] ss:$8 sps:$4 sm:$0xff]  }
 0x192   : > { %2459 = vmatpush1.bf16.msra.mxu0 %v8535_v38  ;;  %v8622_v38 = vld [vmem:[%s10489_s19 + $0x534] ss:$8 sps:$4 sm:$0xff]  }
 0x193   : > { %2460 = vmatprep.subr.bf16.mxu0 %v8543_v39  ;;  %v8677_v39 = vld [vmem:[%s10489_s19 + $0x1d0] ss:$8 sps:$4 sm:$0xff]  }
 0x194   : > { %2334 = vmatpush1.bf16.msra.mxu1 %v8623_v58  ;;  %v8702_v58 = vld [vmem:[%s10489_s19 + $0x210] ss:$8 sps:$4 sm:$0xff]  }
 0x195   : > { %2335 = vmatprep.subr.bf16.mxu1 %v8631_v59  ;;  %v8644_v59 = vld [vmem:[%s10489_s19 + $0x570] ss:$8 sps:$4 sm:$0xff]  }
 0x196   : > { %2461 = vmatpush1.bf16.msra.mxu0 %v8541_v44  ;;  %v10703_v44 = vrot.slane %v10541_v21, %v10534_v18  ;;  %v8632_v21 = vld [vmem:[%s10489_s19 + $0x550] ss:$8 sps:$4 sm:$0xff]  }
 0x197   : > { %2462 = vmatprep.subr.bf16.mxu0 %v8549_v45  ;;  %v8691_v45 = vld [vmem:[%s10489_s19 + $0x1f4] ss:$8 sps:$4 sm:$0xff]  }
 0x198   : > { %2336 = vmatpush1.bf16.msra.mxu1 %v8629_v62  ;;  %v8716_v62 = vld [vmem:[%s10489_s19 + $0x234] ss:$8 sps:$4 sm:$0xff]  }
 0x199   : > { %2337 = vmatprep.subr.bf16.mxu1 %v8637_v63  ;;  %v8650_v63 = vld [vmem:[%s10489_s19 + $0x580] ss:$8 sps:$4 sm:$0xff]  }
 0x19a   : > { %2463 = vmatpush1.bf16.msra.mxu0 %v8547_v48  ;;  %v8689_v48 = vld [vmem:[%s10489_s19 + $0x1f0] ss:$8 sps:$4 sm:$0xff]  }
 0x19b   : > { %2464 = vmatprep.subr.bf16.mxu0 %v8555_v49  ;;  %v668_v49 = vcombine.high %v10703_v44, %v10703_v44 }
 0x19c   : > { %2338 = vmatpush1.bf16.msra.mxu1 %v8635_v2  ;;  %v8656_v2 = vld [vmem:[%s10489_s19 + $0x590] ss:$8 sps:$4 sm:$0xff]  }
 0x19d   : > { %2339 = vmatprep.subr.bf16.mxu1 %v8643_v3  ;;  %v725_v54 = vpack.c.bf16 %v668_v49, %v668_v49  ;;  %v8722_v3 = vld [vmem:[%s10489_s19 + $0x244] ss:$8 sps:$4 sm:$0xff]   ;;  %v8711_v49 = vld [vmem:[%s10489_s19 + $0x620] ss:$8 sps:$4 sm:$0xff]  }
 0x19e   : > { %2465 = vmatpush1.bf16.msra.mxu0 %v8553_v52  ;;  %v722_v52 = vpack.c.bf16 %v10624_v31, %v10624_v31  ;;  %v8710_v31 = vld [vmem:[%s10489_s19 + $0x224] ss:$8 sps:$4 sm:$0xff]  }
 0x19f   : > { %2466 = vmatprep.subr.bf16.mxu0 %v8561_v53  ;;  %v8695_v53 = vld [vmem:[%s10489_s19 + $0x200] ss:$8 sps:$4 sm:$0xff]  }
 0x1a0   : > { %2340 = vmatpush1.bf16.msra.mxu1 %v8641_v6  ;;  %v8728_v6 = vld [vmem:[%s10489_s19 + $0x254] ss:$8 sps:$4 sm:$0xff]  }
 0x1a1   : > { %2341 = vmatprep.subr.bf16.mxu1 %v8649_v7  ;;  %v8662_v7 = vld [vmem:[%s10489_s19 + $0x5a0] ss:$8 sps:$4 sm:$0xff]  }
 0x1a2   : > { %2467 = vmatpush1.bf16.msra.mxu0 %v8559_v56  ;;  %v8638_v56 = vld [vmem:[%s10489_s19 + $0x560] ss:$8 sps:$4 sm:$0xff]  }
 0x1a3   : > { %2468 = vmatprep.subr.bf16.mxu0 %v8567_v57  ;;  %v8646_v57 = vld [vmem:[%s10489_s19 + $0x574] ss:$8 sps:$4 sm:$0xff]  }
 0x1a4   : > { %2342 = vmatpush1.bf16.msra.mxu1 %v8647_v12  ;;  %v8668_v12 = vld [vmem:[%s10489_s19 + $0x5b0] ss:$8 sps:$4 sm:$0xff]  }
 0x1a5   : > { %2343 = vmatprep.subr.bf16.mxu1 %v8655_v14  ;;  %v8676_v14 = vld [vmem:[%s10489_s19 + $0x5c4] ss:$8 sps:$4 sm:$0xff]  }
 0x1a6   : > { %2469 = vmatpush1.bf16.msra.mxu0 %v8565_v60  ;;  %v8652_v60 = vld [vmem:[%s10489_s19 + $0x584] ss:$8 sps:$4 sm:$0xff]  }
 0x1a7   : > { %2470 = vmatprep.subr.bf16.mxu0 %v8573_v61  ;;  %v8708_v61 = vld [vmem:[%s10489_s19 + $0x220] ss:$8 sps:$4 sm:$0xff]  }
 0x1a8   : > { %2344 = vmatpush1.bf16.msra.mxu1 %v8653_v10  ;;  %v8674_v10 = vld [vmem:[%s10489_s19 + $0x5c0] ss:$8 sps:$4 sm:$0xff]  }
 0x1a9   : > { %2345 = vmatprep.subr.bf16.mxu1 %v8661_v20  ;;  %v8682_v20 = vld [vmem:[%s10489_s19 + $0x5d4] ss:$8 sps:$4 sm:$0xff]  }
 0x1aa   : > { %2471 = vmatpush1.bf16.msra.mxu0 %v8571_v0  ;;  %v8658_v0 = vld [vmem:[%s10489_s19 + $0x594] ss:$8 sps:$4 sm:$0xff]  }
 0x1ab   : > { %2472 = vmatprep.subr.bf16.mxu0 %v8579_v1  ;;  %v8714_v1 = vld [vmem:[%s10489_s19 + $0x230] ss:$8 sps:$4 sm:$0xff]  }
 0x1ac   : > { %2346 = vmatpush1.bf16.msra.mxu1 %v8659_v25  ;;  %v8688_v25 = vld [vmem:[%s10489_s19 + $0x5e4] ss:$8 sps:$4 sm:$0xff]  }
 0x1ad   : > { %2347 = vmatprep.subr.bf16.mxu1 %v8667_v27  ;;  %v10752_v27 = vld [vmem:[%s11268_s26 + $0x18] sm:$0xff] }
 0x1ae   : > { %2473 = vmatpush1.bf16.msra.mxu0 %v8577_v4  ;;  %v8664_v4 = vld [vmem:[%s10489_s19 + $0x5a4] ss:$8 sps:$4 sm:$0xff]  }
 0x1af   : > { %2474 = vmatprep.subr.bf16.mxu0 %v8585_v5  ;;  %v8720_v5 = vld [vmem:[%s10489_s19 + $0x240] ss:$8 sps:$4 sm:$0xff]  }
 0x1b0   : > { %2348 = vmatpush1.bf16.msra.mxu1 %v8665_v32  ;;  %v8750_v32 = vld [vmem:[%s10489_s19 + $0x290] ss:$8 sps:$4 sm:$0xff]  }
 0x1b1   : > { %2349 = vmatprep.subr.bf16.mxu1 %v8673_v33  ;;  %v10760_v33 = vrot.slane %v10752_v27, %v10534_v18 }
 0x1b2   : > { %2475 = vmatpush1.bf16.msra.mxu0 %v8583_v8  ;;  %v8670_v8 = vld [vmem:[%s10489_s19 + $0x5b4] ss:$8 sps:$4 sm:$0xff]  }
 0x1b3   : > { %2476 = vmatprep.subr.bf16.mxu0 %v8591_v11  ;;  %v8734_v11 = vld [vmem:[%s10489_s19 + $0x264] ss:$8 sps:$4 sm:$0xff]  }
 0x1b4   : > { %2350 = vmatpush1.bf16.msra.mxu1 %v8671_v35  ;;  %v8701_v35 = vld [vmem:[%s10489_s19 + $0x604] ss:$8 sps:$4 sm:$0xff]  }
 0x1b5   : > { %2351 = vmatprep.subr.bf16.mxu1 %v8679_v36  ;;  %v8756_v36 = vld [vmem:[%s10489_s19 + $0x2a0] ss:$8 sps:$4 sm:$0xff]  }
 0x1b6   : > { %2477 = vmatpush1.bf16.msra.mxu0 %v8589_v16  ;;  %v8732_v16 = vld [vmem:[%s10489_s19 + $0x260] ss:$8 sps:$4 sm:$0xff]  }
 0x1b7   : > { %2478 = vmatprep.subr.bf16.mxu0 %v8597_v19  ;;  %v8740_v19 = vld [vmem:[%s10489_s19 + $0x274] ss:$8 sps:$4 sm:$0xff]  }
 0x1b8   : > { %2352 = vmatpush1.bf16.msra.mxu1 %v8677_v39  ;;  %v8699_v39 = vld [vmem:[%s10489_s19 + $0x600] ss:$8 sps:$4 sm:$0xff]  }
 0x1b9   : > { %2353 = vmatprep.subr.bf16.mxu1 %v8685_v40  ;;  %v730_v40 = vpack.c.bf16 %v10673_v17, %v10673_v17  ;;  %v8768_v17 = vld [vmem:[%s10489_s19 + $0x2c0] ss:$8 sps:$4 sm:$0xff]  }
 0x1ba   : > { %2479 = vmatpush1.bf16.msra.mxu0 %v8595_v22  ;;  %v8738_v22 = vld [vmem:[%s10489_s19 + $0x270] ss:$8 sps:$4 sm:$0xff]  }
 0x1bb   : > { %2489 = vmatprep.subr.bf16.mxu0 %v8604_v24  ;;  %v8680_v24 = vld [vmem:[%s10489_s19 + $0x5d0] ss:$8 sps:$4 sm:$0xff]  }
 0x1bc   : > { %2354 = vmatpush1.bf16.msra.mxu1 %v8683_v43 }
 0x1bd   : > { %2481 = vmatmul.mubr.bf16.vlgmr.msra.gmra.mrb[0].mxu0 %v728_v26  ;;  %2355 = vmatprep.subr.bf16.mxu1 %v8691_v45  ;;  %v8744_v26 = vld [vmem:[%s10489_s19 + $0x280] ss:$8 sps:$4 sm:$0xff]   ;;  %v8770_v45 = vld [vmem:[%s10489_s19 + $0x2c4] ss:$8 sps:$4 sm:$0xff]  }
 0x1be   : > { %2490 = vmatpush1.bf16.msra.mxu0 %v8602_v28  ;;  %2521 = vmatprep.mubr.bf16.mxu0 %v731_v29  ;;  %v8752_v28 = vld [vmem:[%s10489_s19 + $0x294] ss:$8 sps:$4 sm:$0xff]   ;;  %v8686_v29 = vld [vmem:[%s10489_s19 + $0x5e0] ss:$8 sps:$4 sm:$0xff]  }
 0x1bf   : > { %2491 = vmatprep.subr.bf16.mxu0 %v8610_v30  ;;  %v8694_v30 = vld [vmem:[%s10489_s19 + $0x5f4] ss:$8 sps:$4 sm:$0xff]  }
 0x1c0   : > { %2356 = vmatpush1.bf16.msra.mxu1 %v8689_v48  ;;  %v8776_v48 = vld [vmem:[%s10489_s19 + $0x2d4] ss:$8 sps:$4 sm:$0xff]  }
 0x1c1   : > { %2366 = vmatprep.subr.bf16.mxu1 %v8697_v50  ;;  %v8719_v50 = vld [vmem:[%s10489_s19 + $0x634] ss:$8 sps:$4 sm:$0xff]  }
 0x1c2   : > { %2492 = vmatpush1.bf16.msra.mxu0 %v8608_v13  ;;  %v8758_v13 = vld [vmem:[%s10489_s19 + $0x2a4] ss:$8 sps:$4 sm:$0xff]  }
 0x1c3   : > { %2493 = vmatprep.subr.bf16.mxu0 %v8616_v34  ;;  %2358 = vmatmul.mubr.bf16.vlgmr.msra.gmra.mrb[0].mxu1 %v722_v52  ;;  %v8692_v34 = vld [vmem:[%s10489_s19 + $0x5f0] ss:$8 sps:$4 sm:$0xff]   ;;  %v8782_v52 = vld [vmem:[%s10489_s19 + $0x2e4] ss:$8 sps:$4 sm:$0xff]  }
 0x1c4   : > { %2367 = vmatpush1.bf16.msra.mxu1 %v8695_v53  ;;  %2398 = vmatprep.mubr.bf16.mxu1 %v725_v54  ;;  %v8725_v53 = vld [vmem:[%s10489_s19 + $0x644] ss:$8 sps:$4 sm:$0xff]   ;;  %v8780_v54 = vld [vmem:[%s10489_s19 + $0x2e0] ss:$8 sps:$4 sm:$0xff]  }
 0x1c5   : > { %2368 = vmatprep.subr.bf16.mxu1 %v8704_v55  ;;  %v8788_v55 = vld [vmem:[%s10489_s19 + $0x2f4] ss:$8 sps:$4 sm:$0xff]  }
 0x1c6   : > { %2494 = vmatpush1.bf16.msra.mxu0 %v8614_v37  ;;  %v702_v37 = vcombine.high %v10760_v33, %v10760_v33 }
 0x1c7   : > { %2495 = vmatprep.subr.bf16.mxu0 %v8622_v38  ;;  %v8764_v38 = vld [vmem:[%s10489_s19 + $0x2b4] ss:$8 sps:$4 sm:$0xff]  }
 0x1c8   : > { %2369 = vmatpush1.bf16.msra.mxu1 %v8702_v58  ;;  %v733_v43 = vpack.c.bf16 %v702_v37, %v702_v37  ;;  %v2616_v58 = vld [vmem:[#allocation7 + $0x18] sm:$0xff]  ;;  %v8795_v37 = vld [vmem:[%s10489_s19 + $0x710] ss:$8 sps:$4 sm:$0xff]  }
 0x1c9   : > { %2370 = vmatprep.subr.bf16.mxu1 %v8710_v31  ;;  %v2620_v31 = vld [vmem:[#allocation7 + $0x38] sm:$0x7] }
 0x1ca   : > { %2496 = vmatpush1.bf16.msra.mxu0 %v8620_v41  ;;  %v8707_v41 = vld [vmem:[%s10489_s19 + $0x614] ss:$8 sps:$4 sm:$0xff]  }
 0x1cb   : > { %2497 = vmatprep.subr.bf16.mxu0 %v8628_v42  ;;  %v8762_v42 = vld [vmem:[%s10489_s19 + $0x2b0] ss:$8 sps:$4 sm:$0xff]  }
 0x1cc   : > { %2371 = vmatpush1.bf16.msra.mxu1 %v8708_v61  ;;  %v2615_v61 = vld [vmem:[#allocation7 + $0x10] sm:$0xff] }
 0x1cd   : > { %2372 = vmatprep.subr.bf16.mxu1 %v8716_v62  ;;  %v2619_v62 = vld [vmem:[#allocation7 + $0x30] sm:$0x7] }
 0x1ce   : > { %2498 = vmatpush1.bf16.msra.mxu0 %v8626_v46  ;;  %v8705_v46 = vld [vmem:[%s10489_s19 + $0x610] ss:$8 sps:$4 sm:$0xff]  }
 0x1cf   : > { %2499 = vmatprep.subr.bf16.mxu0 %v8634_v47  ;;  %v8713_v47 = vld [vmem:[%s10489_s19 + $0x624] ss:$8 sps:$4 sm:$0xff]  }
 0x1d0   : > { %2373 = vmatpush1.bf16.msra.mxu1 %v8714_v1  ;;  %v8240_v1 = vpack.c.bf16 %v2620_v31, %v2616_v58  ;;  %v8841_v58 = vld [vmem:[#allocation10] ss:$48 sps:$4 sm:$0xff]   ;;  %v8843_v31 = vld [vmem:[#allocation10 + $0x4] ss:$48 sps:$4 sm:$0xff]  }
 0x1d1   : > { %2374 = vmatprep.subr.bf16.mxu1 %v8722_v3  ;;  %v8735_v3 = vld [vmem:[%s10489_s19 + $0x660] ss:$8 sps:$4 sm:$0xff]  }
 0x1d2   : > { %2500 = vmatpush1.bf16.msra.mxu0 %v8632_v21  ;;  %v8774_v21 = vld [vmem:[%s10489_s19 + $0x2d0] ss:$8 sps:$4 sm:$0xff]  }
 0x1d3   : > { %2501 = vmatprep.subr.bf16.mxu0 %v8640_v51  ;;  %v8717_v51 = vld [vmem:[%s10489_s19 + $0x630] ss:$8 sps:$4 sm:$0xff]  }
 0x1d4   : > { %2375 = vmatpush1.bf16.msra.mxu1 %v8720_v5  ;;  %v8743_v5 = vld [vmem:[%s10489_s19 + $0x674] ss:$8 sps:$4 sm:$0xff]  }
 0x1d5   : > { %2376 = vmatprep.subr.bf16.mxu1 %v8728_v6  ;;  %v8741_v6 = vld [vmem:[%s10489_s19 + $0x670] ss:$8 sps:$4 sm:$0xff]  }
 0x1d6   : > { %2502 = vmatpush1.bf16.msra.mxu0 %v8638_v56  ;;  %v8723_v56 = vld [vmem:[%s10489_s19 + $0x640] ss:$8 sps:$4 sm:$0xff]  }
 0x1d7   : > { %2503 = vmatprep.subr.bf16.mxu0 %v8646_v57  ;;  %v8889_v57 = vld [vmem:[#allocation10 + $0x300] ss:$48 sps:$4 sm:$0xff]  }
 0x1d8   : > { %2377 = vmatpush1.bf16.msra.mxu1 %v8726_v9  ;;  %v10808_v9 = vld [vmem:[#allocation2] sm:$0x3] }
 0x1d9   : > { %2378 = vmatprep.subr.bf16.mxu1 %v8734_v11  ;;  %v8755_v11 = vld [vmem:[%s10489_s19 + $0x694] ss:$8 sps:$4 sm:$0xff]  }
 0x1da   : > { %2504 = vmatpush1.bf16.msra.mxu0 %v8644_v59  ;;  %v8731_v59 = vld [vmem:[%s10489_s19 + $0x654] ss:$8 sps:$4 sm:$0xff]  }
 0x1db   : > { %2505 = vmatprep.subr.bf16.mxu0 %v8652_v60  ;;  %v8786_v60 = vld [vmem:[%s10489_s19 + $0x2f0] ss:$8 sps:$4 sm:$0xff]  }
 0x1dc   : > { %2379 = vmatpush1.bf16.msra.mxu1 %v8732_v16  ;;  %v8759_v16 = vld [vmem:[%s10489_s19 + $0x6a0] ss:$8 sps:$4 sm:$0xff]  }
 0x1dd   : > { %2380 = vmatprep.subr.bf16.mxu1 %v8740_v19  ;;  %v8767_v19 = vld [vmem:[%s10489_s19 + $0x6b4] ss:$8 sps:$4 sm:$0xff]  }
 0x1de   : > { %2506 = vmatpush1.bf16.msra.mxu0 %v8650_v63  ;;  %v8729_v63 = vld [vmem:[%s10489_s19 + $0x650] ss:$8 sps:$4 sm:$0xff]  }
 0x1df   : > { %2507 = vmatprep.subr.bf16.mxu0 %v8658_v0  ;;  %v8737_v0 = vld [vmem:[%s10489_s19 + $0x664] ss:$8 sps:$4 sm:$0xff]  }
 0x1e0   : > { %2381 = vmatpush1.bf16.msra.mxu1 %v8738_v22  ;;  %v8771_v22 = vld [vmem:[%s10489_s19 + $0x6c0] ss:$8 sps:$4 sm:$0xff]  }
 0x1e1   : > { %2382 = vmatprep.subr.bf16.mxu1 %v8746_v23  ;;  %v8779_v23 = vld [vmem:[%s10489_s19 + $0x6d4] ss:$8 sps:$4 sm:$0xff]  }
 0x1e2   : > { %2508 = vmatpush1.bf16.msra.mxu0 %v8656_v2  ;;  %v724_v2 = vpack.c.bf16 %v10703_v44, %v10703_v44  ;;  %v8749_v44 = vld [vmem:[%s10489_s19 + $0x684] ss:$8 sps:$4 sm:$0xff]  }
 0x1e3   : > { %2509 = vmatprep.subr.bf16.mxu0 %v8664_v4  ;;  %v8243_v4 = vpack.c.bf16 %v2619_v62, %v2615_v61  ;;  %v8833_v61 = vld [vmem:[%s10489_s19 + $0x7d4] ss:$8 sps:$4 sm:$0xff]   ;;  %v8847_v62 = vld [vmem:[#allocation10 + $0x60] ss:$48 sps:$4 sm:$0xff]  }
 0x1e4   : > { %2383 = vmatpush1.bf16.msra.mxu1 %v8744_v26  ;;  %v687_v26 = vcombine.high %v10752_v27, %v10752_v27  ;;  %v8792_v27 = vld [vmem:[%s10489_s19 + $0x700] ss:$8 sps:$4 sm:$0xff]  }
 0x1e5   : > { %2384 = vmatprep.subr.bf16.mxu1 %v8752_v28  ;;  %v8783_v28 = vld [vmem:[%s10489_s19 + $0x6e0] ss:$8 sps:$4 sm:$0xff]  }
 0x1e6   : > { %2510 = vmatpush1.bf16.msra.mxu0 %v8662_v7  ;;  %v10082_v7 = vmov 0.0  }
 0x1e7   : > { %2511 = vmatprep.subr.bf16.mxu0 %v8670_v8  ;;  %v8747_v8 = vld [vmem:[%s10489_s19 + $0x680] ss:$8 sps:$4 sm:$0xff]  }
 0x1e8   : > { %2385 = vmatpush1.bf16.msra.mxu1 %v8750_v32  ;;  %v8789_v32 = vld [vmem:[%s10489_s19 + $0x6f0] ss:$8 sps:$4 sm:$0xff]  }
 0x1e9   : > { %2386 = vmatprep.subr.bf16.mxu1 %v8758_v13  ;;  %v8794_v13 = vld [vmem:[%s10489_s19 + $0x704] ss:$8 sps:$4 sm:$0xff]  }
 0x1ea   : > { %2512 = vmatpush1.bf16.msra.mxu0 %v8668_v12  ;;  %v8753_v12 = vld [vmem:[%s10489_s19 + $0x690] ss:$8 sps:$4 sm:$0xff]  }
 0x1eb   : > { %2513 = vmatprep.subr.bf16.mxu0 %v8676_v14  ;;  %v8761_v14 = vld [vmem:[%s10489_s19 + $0x6a4] ss:$8 sps:$4 sm:$0xff]  }
 0x1ec   : > { %2387 = vmatpush1.bf16.msra.mxu1 %v8756_v36  ;;  %v8797_v36 = vld [vmem:[%s10489_s19 + $0x714] ss:$8 sps:$4 sm:$0xff]  }
 0x1ed   : > { %2388 = vmatprep.subr.bf16.mxu1 %v8764_v38  ;;  %v8800_v38 = vld [vmem:[%s10489_s19 + $0x724] ss:$8 sps:$4 sm:$0xff]  }
 0x1ee   : > { %2514 = vmatpush1.bf16.msra.mxu0 %v8674_v10  ;;  %v8765_v10 = vld [vmem:[%s10489_s19 + $0x6b0] ss:$8 sps:$4 sm:$0xff]  }
 0x1ef   : > { %2515 = vmatprep.subr.bf16.mxu0 %v8682_v20  ;;  %v8773_v20 = vld [vmem:[%s10489_s19 + $0x6c4] ss:$8 sps:$4 sm:$0xff]  }
 0x1f0   : > { %2389 = vmatpush1.bf16.msra.mxu1 %v8762_v42  ;;  %v8804_v42 = vld [vmem:[%s10489_s19 + $0x740] ss:$8 sps:$4 sm:$0xff]  }
 0x1f1   : > { %2390 = vmatprep.subr.bf16.mxu1 %v8770_v45  ;;  %v8807_v45 = vld [vmem:[%s10489_s19 + $0x750] ss:$8 sps:$4 sm:$0xff]  }
 0x1f2   : > { %2516 = vmatpush1.bf16.msra.mxu0 %v8680_v24  ;;  %v8777_v24 = vld [vmem:[%s10489_s19 + $0x6d0] ss:$8 sps:$4 sm:$0xff]  }
 0x1f3   : > { %2517 = vmatprep.subr.bf16.mxu0 %v8688_v25  ;;  %v8785_v25 = vld [vmem:[%s10489_s19 + $0x6e4] ss:$8 sps:$4 sm:$0xff]  }
 0x1f4   : > { %2391 = vmatpush1.bf16.msra.mxu1 %v8768_v17  ;;  %v8815_v17 = vld [vmem:[%s10489_s19 + $0x774] ss:$8 sps:$4 sm:$0xff]  }
 0x1f5   : > { %2392 = vmatprep.subr.bf16.mxu1 %v8776_v48  ;;  %v8813_v48 = vld [vmem:[%s10489_s19 + $0x770] ss:$8 sps:$4 sm:$0xff]  }
 0x1f6   : > { %2518 = vmatpush1.bf16.msra.mxu0 %v8686_v29  ;;  %v8791_v29 = vld [vmem:[%s10489_s19 + $0x6f4] ss:$8 sps:$4 sm:$0xff]  }
 0x1f7   : > { %2519 = vmatprep.subr.bf16.mxu0 %v8694_v30  ;;  %v10828_v30 = vrot.slane %v687_v26, %v10534_v18  ;;  %v8879_v26 = vld [vmem:[#allocation10 + $0x244] ss:$48 sps:$4 sm:$0xff]  }
 0x1f8   : > { %2393 = vmatpush1.bf16.msra.mxu1 %v8774_v21  ;;  %v8821_v21 = vld [vmem:[%s10489_s19 + $0x794] ss:$8 sps:$4 sm:$0xff]  }
 0x1f9   : > { %2394 = vmatprep.subr.bf16.mxu1 %v8782_v52  ;;  %v8824_v52 = vld [vmem:[%s10489_s19 + $0x7a4] ss:$8 sps:$4 sm:$0xff]  }
 0x1fa   : > { %2520 = vmatpush1.bf16.msra.mxu0 %v8692_v34  ;;  %v703_v34 = vcombine.high %v10828_v30, %v10828_v30 }
 0x1fb   : > { %2530 = vmatprep.subr.bf16.mxu0 %v8701_v35  ;;  %v732_v35 = vpack.c.bf16 %v10760_v33, %v10760_v33  ;;  %v8801_v33 = vld [vmem:[%s10489_s19 + $0x730] ss:$8 sps:$4 sm:$0xff]  }
 0x1fc   : > { %2395 = vmatpush1.bf16.msra.mxu1 %v8780_v54  ;;  %v735_v18 = vpack.c.bf16 %v703_v34, %v703_v34  ;;  %v8827_v54 = vld [vmem:[%s10489_s19 + $0x7b4] ss:$8 sps:$4 sm:$0xff]  }
 0x1fd   : > { %2522 = vmatmul.mubr.bf16.vlgmr.msra.gmra.mrb[0].mxu0 %v730_v40  ;;  %2396 = vmatprep.subr.bf16.mxu1 %v8788_v55  ;;  %v8803_v40 = vld [vmem:[%s10489_s19 + $0x734] ss:$8 sps:$4 sm:$0xff]   ;;  %v8825_v55 = vld [vmem:[%s10489_s19 + $0x7b0] ss:$8 sps:$4 sm:$0xff]  }
 0x1fe   : > { %2531 = vmatpush1.bf16.msra.mxu0 %v8699_v39  ;;  %2562 = vmatprep.mubr.bf16.mxu0 %v733_v43  ;;  %v8798_v39 = vld [vmem:[%s10489_s19 + $0x720] ss:$8 sps:$4 sm:$0xff]   ;;  %v8809_v43 = vld [vmem:[%s10489_s19 + $0x754] ss:$8 sps:$4 sm:$0xff]  }
 0x1ff   : > { %2532 = vmatprep.subr.bf16.mxu0 %v8707_v41  ;;  %v8806_v41 = vld [vmem:[%s10489_s19 + $0x744] ss:$8 sps:$4 sm:$0xff]  }
 0x200   : > { %2397 = vmatpush1.bf16.msra.mxu1 %v8786_v60  ;;  %v8849_v60 = vld [vmem:[#allocation10 + $0x64] ss:$48 sps:$4 sm:$0xff]  }
 0x201   : > { %8242 = vmatprep.subr.msk.bf16.mxu1 %vm10788_vm2, %v8240_v1  ;;  %v8836_v1 = vld [vmem:[%s10489_s19 + $0x7e4] ss:$8 sps:$4 sm:$0xff]  }
 0x202   : > { %2533 = vmatpush1.bf16.msra.mxu0 %v8705_v46  ;;  %v8812_v46 = vld [vmem:[%s10489_s19 + $0x764] ss:$8 sps:$4 sm:$0xff]  }
 0x203   : > { %2534 = vmatprep.subr.bf16.mxu0 %v8713_v47  ;;  %2399 = vmatmul.mubr.bf16.vlgmr.msra.gmra.mrb[0].mxu1 %v724_v2  ;;  %v8810_v47 = vld [vmem:[%s10489_s19 + $0x760] ss:$8 sps:$4 sm:$0xff]   ;;  %v8891_v34 = vld [vmem:[#allocation10 + $0x304] ss:$48 sps:$4 sm:$0xff]  }
 0x204   : > { %8245 = vmatpush1.bf16.msk.msra.mxu1 %vm10788_vm2, %v8243_v4  ;;  %2795 = vmatprep.mubr.f32.mxu1 %v10082_v7  ;;  %v8853_v2 = vld [vmem:[#allocation10 + $0xc0] ss:$48 sps:$4 sm:$0xff]  }
 0x205   : > { %5174 = vmatprep.subr.bf16.mxu1 %v8843_v31  ;;  %v8834_v4 = vld [vmem:[%s10489_s19 + $0x7e0] ss:$8 sps:$4 sm:$0xff]   ;;  %v8918_v31 = vld [vmem:[#allocation10 + $0x4a4] ss:$48 sps:$4 sm:$0xff]  }
 0x206   : > { %2535 = vmatpush1.bf16.msra.mxu0 %v8711_v49  ;;  %v8818_v49 = vld [vmem:[%s10489_s19 + $0x784] ss:$8 sps:$4 sm:$0xff]  }
 0x207   : > { %2536 = vmatprep.subr.bf16.mxu0 %v8719_v50  ;;  %v8816_v50 = vld [vmem:[%s10489_s19 + $0x780] ss:$8 sps:$4 sm:$0xff]  }
 0x20a   : > { %2537 = vmatpush1.bf16.msra.mxu0 %v8717_v51  ;;  %v8819_v51 = vld [vmem:[%s10489_s19 + $0x790] ss:$8 sps:$4 sm:$0xff]  }
 0x20b   : > { %2538 = vmatprep.subr.bf16.mxu0 %v8725_v53  ;;  %7649 = vmatmul.mubr.msk.f32.vlgmr.msra.gmra.mrb[4].mxu1 %vm2643_vm3, %v10808_v9  ;;  %v8822_v53 = vld [vmem:[%s10489_s19 + $0x7a0] ss:$8 sps:$4 sm:$0xff]  }
 0x20c   : > { %5175 = vmatpush1.bf16.msra.mxu1 %v8841_v58  ;;  %v8910_v58 = vld [vmem:[#allocation10 + $0x440] ss:$48 sps:$4 sm:$0xff]  }
 0x20d   : > { %5176 = vmatprep.subr.bf16.mxu1 %v8849_v60  ;;  %v8921_v60 = vld [vmem:[#allocation10 + $0x4e4] ss:$48 sps:$4 sm:$0xff]  }
 0x20e   : > { %2539 = vmatpush1.bf16.msra.mxu0 %v8723_v56  ;;  %v8830_v56 = vld [vmem:[%s10489_s19 + $0x7c4] ss:$8 sps:$4 sm:$0xff]  }
 0x20f   : > { %2540 = vmatprep.subr.bf16.mxu0 %v8731_v59  ;;  %v8828_v59 = vld [vmem:[%s10489_s19 + $0x7c0] ss:$8 sps:$4 sm:$0xff]  }
 0x210   : > { %5177 = vmatpush1.bf16.msra.mxu1 %v8847_v62  ;;  %v8919_v62 = vld [vmem:[#allocation10 + $0x4e0] ss:$48 sps:$4 sm:$0xff]  }
 0x212   : > { %2541 = vmatpush1.bf16.msra.mxu0 %v8729_v63  ;;  %v8855_v63 = vld [vmem:[#allocation10 + $0xc4] ss:$48 sps:$4 sm:$0xff]  }
 0x213   : > { %2542 = vmatprep.subr.bf16.mxu0 %v8737_v0  ;;  %v8831_v0 = vld [vmem:[%s10489_s19 + $0x7d0] ss:$8 sps:$4 sm:$0xff]   ;;  %5178 = vmatprep.subr.bf16.mxu1 %v8855_v63 }
 0x214   : > { %5179 = vmatpush1.bf16.msra.mxu1 %v8853_v2  ;;  %v8922_v63 = vld [vmem:[#allocation10 + $0x500] ss:$48 sps:$4 sm:$0xff]  }
 0x215   : > { %v8928_v2 = vld [vmem:[#allocation10 + $0x560] ss:$48 sps:$4 sm:$0xff]  }
 0x216   : > { %2543 = vmatpush1.bf16.msra.mxu0 %v8735_v3  ;;  %v8861_v3 = vld [vmem:[#allocation10 + $0x124] ss:$48 sps:$4 sm:$0xff]  }
 0x217   : > { %2544 = vmatprep.subr.bf16.mxu0 %v8743_v5  ;;  %v8839_v5 = vld [vmem:[%s10489_s19 + $0x7f4] ss:$8 sps:$4 sm:$0xff]   ;;  %5180 = vmatprep.subr.bf16.mxu1 %v8861_v3 }
 0x218   : > { %v8930_v3 = vld [vmem:[#allocation10 + $0x564] ss:$48 sps:$4 sm:$0xff]  }
 0x21a   : > { %2545 = vmatpush1.bf16.msra.mxu0 %v8741_v6  ;;  %v2614_v6 = vld [vmem:[#allocation7 + $0x8] sm:$0xff] }
 0x21b   : > { %2546 = vmatprep.subr.bf16.mxu0 %v8749_v44  ;;  %v2618_v44 = vld [vmem:[#allocation7 + $0x28] sm:$0x7] }
 0x21e   : > { %2547 = vmatpush1.bf16.msra.mxu0 %v8747_v8  ;;  %v8859_v8 = vld [vmem:[#allocation10 + $0x120] ss:$48 sps:$4 sm:$0xff]  }
 0x21f   : > { %2548 = vmatprep.subr.bf16.mxu0 %v8755_v11  ;;  %v8867_v11 = vld [vmem:[#allocation10 + $0x184] ss:$48 sps:$4 sm:$0xff]   ;;  %5181 = vmatpush1.bf16.msra.mxu1 %v8859_v8 }
 0x220   : > { %5182 = vmatprep.subr.bf16.mxu1 %v8867_v11  ;;  %v8939_v8 = vld [vmem:[#allocation10 + $0x604] ss:$48 sps:$4 sm:$0xff]  }
 0x221   : > { %v8942_v11 = vld [vmem:[#allocation10 + $0x624] ss:$48 sps:$4 sm:$0xff]  }
 0x222   : > { %2549 = vmatpush1.bf16.msra.mxu0 %v8753_v12  ;;  %v8837_v12 = vld [vmem:[%s10489_s19 + $0x7f0] ss:$8 sps:$4 sm:$0xff]   ;;  %s626_s19 = scalar_lea.vmem %s11271_s4, %s7387_s29 }
 0x223   : > { %2550 = vmatprep.subr.bf16.mxu0 %v8761_v14  ;;  %v8234_v14 = vpack.c.bf16 %v2618_v44, %v2614_v6  ;;  %v8931_v6 = vld [vmem:[#allocation10 + $0x5a0] ss:$48 sps:$4 sm:$0xff]  }
 0x224   : > { %v8934_v44 = vld [vmem:[#allocation10 + $0x5c0] ss:$48 sps:$4 sm:$0xff]  }
 0x226   : > { %2551 = vmatpush1.bf16.msra.mxu0 %v8759_v16  ;;  %v2613_v16 = vld [vmem:[#allocation7] sm:$0xff] }
 0x227   : > { %2552 = vmatprep.subr.bf16.mxu0 %v8767_v19  ;;  %v2617_v19 = vld [vmem:[#allocation7 + $0x20] sm:$0x7] }
 0x22a   : > { %2553 = vmatpush1.bf16.msra.mxu0 %v8765_v10  ;;  %v8865_v10 = vld [vmem:[#allocation10 + $0x180] ss:$48 sps:$4 sm:$0xff]  }
 0x22b   : > { %2554 = vmatprep.subr.bf16.mxu0 %v8773_v20  ;;  %v734_v20 = vpack.c.bf16 %v10828_v30, %v10828_v30  ;;  %5183 = vmatpush1.bf16.msra.mxu1 %v8865_v10  ;;  %v8844_v30 = vld [vmem:[#allocation10 + $0x20] ss:$48 sps:$4 sm:$0xff]  }
 0x22e   : > { %2555 = vmatpush1.bf16.msra.mxu0 %v8771_v22  ;;  %v8846_v22 = vld [vmem:[#allocation10 + $0x24] ss:$48 sps:$4 sm:$0xff]  }
 0x22f   : > { %2556 = vmatprep.subr.bf16.mxu0 %v8779_v23  ;;  %v8873_v23 = vld [vmem:[#allocation10 + $0x1e4] ss:$48 sps:$4 sm:$0xff]  }
 0x230   : > { %5184 = vmatprep.subr.bf16.mxu1 %v8873_v23  ;;  %v992_v23 = vld [vmem:[%s515_s14] sm:$0x3] }
 0x232   : > { %2557 = vmatpush1.bf16.msra.mxu0 %v8777_v24  ;;  %v8237_v24 = vpack.c.bf16 %v2617_v19, %v2613_v16 }
 0x233   : > { %2558 = vmatprep.subr.bf16.mxu0 %v8785_v25  ;;  %v8871_v25 = vld [vmem:[#allocation10 + $0x1e0] ss:$48 sps:$4 sm:$0xff]  }
 0x234   : > { %5185 = vmatpush1.bf16.msra.mxu1 %v8871_v25 }
 0x235   : > { %5186 = vmatprep.subr.bf16.mxu1 %v8879_v26 }
 0x236   : > { %2559 = vmatpush1.bf16.msra.mxu0 %v8783_v28  ;;  %v8877_v28 = vld [vmem:[#allocation10 + $0x240] ss:$48 sps:$4 sm:$0xff]  }
 0x237   : > { %2560 = vmatprep.subr.bf16.mxu0 %v8791_v29  ;;  %v8885_v29 = vld [vmem:[#allocation10 + $0x2a4] ss:$48 sps:$4 sm:$0xff]  }
 0x238   : > { %5187 = vmatpush1.bf16.msra.mxu1 %v8877_v28 }
 0x239   : > { %5188 = vmatprep.subr.bf16.mxu1 %v8885_v29 }
 0x23a   : > { %2561 = vmatpush1.bf16.msra.mxu0 %v8789_v32  ;;  %v8852_v32 = vld [vmem:[#allocation10 + $0x84] ss:$48 sps:$4 sm:$0xff]  }
 0x23b   : > { %2571 = vmatprep.subr.bf16.mxu0 %v8794_v13  ;;  %v8883_v13 = vld [vmem:[#allocation10 + $0x2a0] ss:$48 sps:$4 sm:$0xff]  }
 0x23c   : > { %5189 = vmatpush1.bf16.msra.mxu1 %v8883_v13 }
 0x23d   : > { %2563 = vmatmul.mubr.bf16.vlgmr.msra.gmra.mrb[0].mxu0 %v732_v35  ;;  %v8858_v35 = vld [vmem:[#allocation10 + $0xe4] ss:$48 sps:$4 sm:$0xff]   ;;  %5190 = vmatprep.subr.bf16.mxu1 %v8891_v34 }
 0x23e   : > { %2572 = vmatpush1.bf16.msra.mxu0 %v8792_v27  ;;  %2603 = vmatprep.mubr.bf16.mxu0 %v735_v18  ;;  %v8850_v27 = vld [vmem:[#allocation10 + $0x80] ss:$48 sps:$4 sm:$0xff]   ;;  %v8864_v18 = vld [vmem:[#allocation10 + $0x144] ss:$48 sps:$4 sm:$0xff]  }
 0x23f   : > { %2573 = vmatprep.subr.bf16.mxu0 %v8797_v36  ;;  %v8856_v36 = vld [vmem:[#allocation10 + $0xe0] ss:$48 sps:$4 sm:$0xff]  }
 0x240   : > { %5191 = vmatpush1.bf16.msra.mxu1 %v8889_v57  ;;  %v10895_v57 = vsub.s32 3, %v10529_v15 }
 0x242   : > { %2574 = vmatpush1.bf16.msra.mxu0 %v8795_v37  ;;  %v8895_v37 = vld [vmem:[#allocation10 + $0x360] ss:$48 sps:$4 sm:$0xff]  }
 0x243   : > { %2575 = vmatprep.subr.bf16.mxu0 %v8800_v38  ;;  %v8903_v38 = vld [vmem:[#allocation10 + $0x3c4] ss:$48 sps:$4 sm:$0xff]  }
 0x246   : > { %2576 = vmatpush1.bf16.msra.mxu0 %v8798_v39  ;;  %v8862_v39 = vld [vmem:[#allocation10 + $0x140] ss:$48 sps:$4 sm:$0xff]  }
 0x247   : > { %2577 = vmatprep.subr.bf16.mxu0 %v8803_v40  ;;  %v8870_v40 = vld [vmem:[#allocation10 + $0x1a4] ss:$48 sps:$4 sm:$0xff]  }
 0x24a   : > { %2578 = vmatpush1.bf16.msra.mxu0 %v8801_v33  ;;  %v8909_v33 = vld [vmem:[#allocation10 + $0x424] ss:$48 sps:$4 sm:$0xff]  }
 0x24b   : > { %2579 = vmatprep.subr.bf16.mxu0 %v8806_v41  ;;  %v8868_v41 = vld [vmem:[#allocation10 + $0x1a0] ss:$48 sps:$4 sm:$0xff]  }
 0x24e   : > { %2580 = vmatpush1.bf16.msra.mxu0 %v8804_v42  ;;  %v8876_v42 = vld [vmem:[#allocation10 + $0x204] ss:$48 sps:$4 sm:$0xff]  }
 0x24f   : > { %2581 = vmatprep.subr.bf16.mxu0 %v8809_v43  ;;  %v8907_v43 = vld [vmem:[#allocation10 + $0x420] ss:$48 sps:$4 sm:$0xff]  }
 0x252   : > { %2582 = vmatpush1.bf16.msra.mxu0 %v8807_v45  ;;  %v8915_v45 = vld [vmem:[#allocation10 + $0x484] ss:$48 sps:$4 sm:$0xff]  }
 0x253   : > { %2583 = vmatprep.subr.bf16.mxu0 %v8812_v46  ;;  %v8874_v46 = vld [vmem:[#allocation10 + $0x200] ss:$48 sps:$4 sm:$0xff]  }
 0x256   : > { %2584 = vmatpush1.bf16.msra.mxu0 %v8810_v47  ;;  %v8882_v47 = vld [vmem:[#allocation10 + $0x264] ss:$48 sps:$4 sm:$0xff]  }
 0x257   : > { %2585 = vmatprep.subr.bf16.mxu0 %v8815_v17  ;;  %v8913_v17 = vld [vmem:[#allocation10 + $0x480] ss:$48 sps:$4 sm:$0xff]  }
 0x25a   : > { %2586 = vmatpush1.bf16.msra.mxu0 %v8813_v48  ;;  %v8880_v48 = vld [vmem:[#allocation10 + $0x260] ss:$48 sps:$4 sm:$0xff]  }
 0x25b   : > { %2587 = vmatprep.subr.bf16.mxu0 %v8818_v49  ;;  %v8888_v49 = vld [vmem:[#allocation10 + $0x2c4] ss:$48 sps:$4 sm:$0xff]  }
 0x25e   : > { %2588 = vmatpush1.bf16.msra.mxu0 %v8816_v50  ;;  %v8886_v50 = vld [vmem:[#allocation10 + $0x2c0] ss:$48 sps:$4 sm:$0xff]  }
 0x25f   : > { %2589 = vmatprep.subr.bf16.mxu0 %v8821_v21  ;;  %v8894_v21 = vld [vmem:[#allocation10 + $0x324] ss:$48 sps:$4 sm:$0xff]  }
 0x262   : > { %2590 = vmatpush1.bf16.msra.mxu0 %v8819_v51  ;;  %v8892_v51 = vld [vmem:[#allocation10 + $0x320] ss:$48 sps:$4 sm:$0xff]  }
 0x263   : > { %2591 = vmatprep.subr.bf16.mxu0 %v8824_v52  ;;  %v8900_v52 = vld [vmem:[#allocation10 + $0x384] ss:$48 sps:$4 sm:$0xff]  }
 0x266   : > { %2592 = vmatpush1.bf16.msra.mxu0 %v8822_v53  ;;  %v8898_v53 = vld [vmem:[#allocation10 + $0x380] ss:$48 sps:$4 sm:$0xff]  }
 0x267   : > { %2593 = vmatprep.subr.bf16.mxu0 %v8827_v54  ;;  %v8906_v54 = vld [vmem:[#allocation10 + $0x3e4] ss:$48 sps:$4 sm:$0xff]  }
 0x26a   : > { %2594 = vmatpush1.bf16.msra.mxu0 %v8825_v55  ;;  %v8904_v55 = vld [vmem:[#allocation10 + $0x3e0] ss:$48 sps:$4 sm:$0xff]  }
 0x26b   : > { %2595 = vmatprep.subr.bf16.mxu0 %v8830_v56  ;;  %v8912_v56 = vld [vmem:[#allocation10 + $0x444] ss:$48 sps:$4 sm:$0xff]  }
 0x26e   : > { %2596 = vmatpush1.bf16.msra.mxu0 %v8828_v59  ;;  %v8916_v59 = vld [vmem:[#allocation10 + $0x4a0] ss:$48 sps:$4 sm:$0xff]  }
 0x26f   : > { %2597 = vmatprep.subr.bf16.mxu0 %v8833_v61  ;;  %v8924_v61 = vld [vmem:[#allocation10 + $0x504] ss:$48 sps:$4 sm:$0xff]  }
 0x272   : > { %2598 = vmatpush1.bf16.msra.mxu0 %v8831_v0  ;;  %v8925_v0 = vld [vmem:[#allocation10 + $0x540] ss:$48 sps:$4 sm:$0xff]  }
 0x273   : > { %2599 = vmatprep.subr.bf16.mxu0 %v8836_v1  ;;  %v8927_v1 = vld [vmem:[#allocation10 + $0x544] ss:$48 sps:$4 sm:$0xff]  }
 0x276   : > { %2600 = vmatpush1.bf16.msra.mxu0 %v8834_v4  ;;  %v8933_v4 = vld [vmem:[#allocation10 + $0x5a4] ss:$48 sps:$4 sm:$0xff]  }
 0x277   : > { %2601 = vmatprep.subr.bf16.mxu0 %v8839_v5  ;;  %v8936_v5 = vld [vmem:[#allocation10 + $0x5c4] ss:$48 sps:$4 sm:$0xff]  }
 0x27a   : > { %2602 = vmatpush1.bf16.msra.mxu0 %v8837_v12 }
 0x27b   : > { %8236 = vmatprep.subr.msk.bf16.mxu0 %vm10788_vm2, %v8234_v14 }
 0x27d   : > { %2604 = vmatmul.mubr.bf16.vlgmr.msra.gmra.mrb[0].mxu0 %v734_v20 }
 0x27e   : > { %8239 = vmatpush1.bf16.msk.msra.mxu0 %vm10788_vm2, %v8237_v24  ;;  %2724 = vmatprep.mubr.f32.mxu0 %v10082_v7  ;;  %v8897_v7 = vld [vmem:[#allocation10 + $0x364] ss:$48 sps:$4 sm:$0xff]   ;;  %v10884_v24 = vsub.s32 1, %v10529_v15 }
 0x27f   : > { %5502 = vmatprep.subr.bf16.mxu0 %v8846_v22  ;;  %5192 = vmatprep.subr.bf16.mxu1 %v8897_v7  ;;  %v10879_v22 = vsub.s32 0, %v10529_v15 }
 0x280   : > { %5193 = vmatpush1.bf16.msra.mxu1 %v8895_v37  ;;  %v1001_v26 = vrot.slane %v992_v23, %v10884_v24 }
 0x281   : > { %5194 = vmatprep.subr.bf16.mxu1 %v8903_v38  ;;  %v997_v25 = vrot.slane %v992_v23, %v10879_v22  ;;  %v8991_v23 = vld [vmem:[#allocation10 + $0x960] ss:$48 sps:$4 sm:$0xff]  }
 0x285   : > { %7646 = vmatmul.mubr.msk.f32.vlgmr.msra.gmra.mrb[4].mxu0 %vm2643_vm3, %v10808_v9  ;;  %v8901_v9 = vld [vmem:[#allocation10 + $0x3c0] ss:$48 sps:$4 sm:$0xff]  }
 0x286   : > { %5503 = vmatpush1.bf16.msra.mxu0 %v8844_v30  ;;  %5195 = vmatpush1.bf16.msra.mxu1 %v8901_v9 }
 0x287   : > { %5504 = vmatprep.subr.bf16.mxu0 %v8852_v32  ;;  %5196 = vmatprep.subr.bf16.mxu1 %v8909_v33 }
 0x28a   : > { %5505 = vmatpush1.bf16.msra.mxu0 %v8850_v27  ;;  %5197 = vmatpush1.bf16.msra.mxu1 %v8907_v43  ;;  %v8940_v43 = vld [vmem:[#allocation10 + $0x620] ss:$48 sps:$4 sm:$0xff]  }
 0x28b   : > { %5506 = vmatprep.subr.bf16.mxu0 %v8858_v35  ;;  %5198 = vmatprep.subr.bf16.mxu1 %v8915_v45  ;;  %v10892_v35 = vld [vmem:[#allocation9] sm:$0xf] }
 0x28c   : > { %v2638_v37 = vrot.slane %v10892_v35, %v10895_v57 }
 0x28e   : > { %5507 = vmatpush1.bf16.msra.mxu0 %v8856_v36  ;;  %5199 = vmatpush1.bf16.msra.mxu1 %v8913_v17  ;;  %v2626_v36 = vrot.slane %v10892_v35, %v10879_v22 }
 0x28f   : > { %5508 = vmatprep.subr.bf16.mxu0 %v8864_v18  ;;  %5200 = vmatprep.subr.bf16.mxu1 %v8921_v60  ;;  %v2630_v18 = vrot.slane %v10892_v35, %v10884_v24  ;;  %v8964_v60 = vld [vmem:[#allocation10 + $0x7a0] ss:$48 sps:$4 sm:$0xff]  }
 0x292   : > { %5509 = vmatpush1.bf16.msra.mxu0 %v8862_v39  ;;  %5201 = vmatpush1.bf16.msra.mxu1 %v8919_v62  ;;  %v8972_v62 = vld [vmem:[#allocation10 + $0x804] ss:$48 sps:$4 sm:$0xff]  }
 0x293   : > { %5510 = vmatprep.subr.bf16.mxu0 %v8870_v40  ;;  %5202 = vmatprep.subr.bf16.mxu1 %v8927_v1  ;;  %v8975_v1 = vld [vmem:[#allocation10 + $0x844] ss:$48 sps:$4 sm:$0xff]  }
 0x296   : > { %5511 = vmatpush1.bf16.msra.mxu0 %v8868_v41  ;;  %5203 = vmatpush1.bf16.msra.mxu1 %v8925_v0  ;;  %v8970_v0 = vld [vmem:[#allocation10 + $0x800] ss:$48 sps:$4 sm:$0xff]  }
 0x297   : > { %5512 = vmatprep.subr.bf16.mxu0 %v8876_v42  ;;  %5204 = vmatprep.subr.bf16.mxu1 %v8933_v4  ;;  %v8937_v42 = vld [vmem:[#allocation10 + $0x600] ss:$48 sps:$4 sm:$0xff]  }
 0x298   : > { %v8976_v4 = vld [vmem:[#allocation10 + $0x860] ss:$48 sps:$4 sm:$0xff]  }
 0x29a   : > { %5513 = vmatpush1.bf16.msra.mxu0 %v8874_v46  ;;  %5205 = vmatpush1.bf16.msra.mxu1 %v8931_v6  ;;  %v8945_v46 = vld [vmem:[#allocation10 + $0x664] ss:$48 sps:$4 sm:$0xff]  }
 0x29b   : > { %5514 = vmatprep.subr.bf16.mxu0 %v8882_v47  ;;  %5215 = vmatprep.subr.bf16.mxu1 %v8939_v8  ;;  %v8948_v47 = vld [vmem:[#allocation10 + $0x684] ss:$48 sps:$4 sm:$0xff]   ;;  %v8982_v8 = vld [vmem:[#allocation10 + $0x8c0] ss:$48 sps:$4 sm:$0xff]  }
 0x29c   : > { %v8984_v6 = vld [vmem:[#allocation10 + $0x8c4] ss:$48 sps:$4 sm:$0xff]  }
 0x29e   : > { %5515 = vmatpush1.bf16.msra.mxu0 %v8880_v48  ;;  %v8943_v48 = vld [vmem:[#allocation10 + $0x660] ss:$48 sps:$4 sm:$0xff]  }
 0x29f   : > { %5516 = vmatprep.subr.bf16.mxu0 %v8888_v49  ;;  %v8946_v49 = vld [vmem:[#allocation10 + $0x680] ss:$48 sps:$4 sm:$0xff]  }
 0x2a2   : > { %5517 = vmatpush1.bf16.msra.mxu0 %v8886_v50  ;;  %v8951_v50 = vld [vmem:[#allocation10 + $0x6c4] ss:$48 sps:$4 sm:$0xff]  }
 0x2a3   : > { %5518 = vmatprep.subr.bf16.mxu0 %v8894_v21  ;;  %v8954_v21 = vld [vmem:[#allocation10 + $0x6e4] ss:$48 sps:$4 sm:$0xff]  }
 0x2a6   : > { %5519 = vmatpush1.bf16.msra.mxu0 %v8892_v51  ;;  %v8949_v51 = vld [vmem:[#allocation10 + $0x6c0] ss:$48 sps:$4 sm:$0xff]  }
 0x2a7   : > { %5520 = vmatprep.subr.bf16.mxu0 %v8900_v52  ;;  %v8952_v52 = vld [vmem:[#allocation10 + $0x6e0] ss:$48 sps:$4 sm:$0xff]  }
 0x2aa   : > { %5521 = vmatpush1.bf16.msra.mxu0 %v8898_v53  ;;  %v8957_v53 = vld [vmem:[#allocation10 + $0x724] ss:$48 sps:$4 sm:$0xff]  }
 0x2ab   : > { %5522 = vmatprep.subr.bf16.mxu0 %v8906_v54  ;;  %v8960_v54 = vld [vmem:[#allocation10 + $0x744] ss:$48 sps:$4 sm:$0xff]  }
 0x2ae   : > { %5523 = vmatpush1.bf16.msra.mxu0 %v8904_v55  ;;  %v8955_v55 = vld [vmem:[#allocation10 + $0x720] ss:$48 sps:$4 sm:$0xff]  }
 0x2af   : > { %5524 = vmatprep.subr.bf16.mxu0 %v8912_v56  ;;  %v8958_v56 = vld [vmem:[#allocation10 + $0x740] ss:$48 sps:$4 sm:$0xff]  }
 0x2b2   : > { %5525 = vmatpush1.bf16.msra.mxu0 %v8910_v58  ;;  %v8963_v58 = vld [vmem:[#allocation10 + $0x784] ss:$48 sps:$4 sm:$0xff]  }
 0x2b3   : > { %5526 = vmatprep.subr.bf16.mxu0 %v8918_v31  ;;  %v8966_v31 = vld [vmem:[#allocation10 + $0x7a4] ss:$48 sps:$4 sm:$0xff]  }
 0x2b6   : > { %5527 = vmatpush1.bf16.msra.mxu0 %v8916_v59  ;;  %v8961_v59 = vld [vmem:[#allocation10 + $0x780] ss:$48 sps:$4 sm:$0xff]  }
 0x2b7   : > { %5528 = vmatprep.subr.bf16.mxu0 %v8924_v61  ;;  %v8969_v61 = vld [vmem:[#allocation10 + $0x7e4] ss:$48 sps:$4 sm:$0xff]  }
 0x2ba   : > { %5529 = vmatpush1.bf16.msra.mxu0 %v8922_v63  ;;  %v8967_v63 = vld [vmem:[#allocation10 + $0x7e0] ss:$48 sps:$4 sm:$0xff]  }
 0x2bb   : > { %5530 = vmatprep.subr.bf16.mxu0 %v8930_v3  ;;  %v8973_v3 = vld [vmem:[#allocation10 + $0x840] ss:$48 sps:$4 sm:$0xff]  }
 0x2be   : > { %5531 = vmatpush1.bf16.msra.mxu0 %v8928_v2  ;;  %v8978_v2 = vld [vmem:[#allocation10 + $0x864] ss:$48 sps:$4 sm:$0xff]  }
 0x2bf   : > { %5532 = vmatprep.subr.bf16.mxu0 %v8936_v5  ;;  %v8981_v5 = vld [vmem:[#allocation10 + $0x8a4] ss:$48 sps:$4 sm:$0xff]  }
 0x2c2   : > { %5533 = vmatpush1.bf16.msra.mxu0 %v8934_v44  ;;  %v8979_v44 = vld [vmem:[#allocation10 + $0x8a0] ss:$48 sps:$4 sm:$0xff]  }
 0x2c3   : > { %5543 = vmatprep.subr.bf16.mxu0 %v8942_v11  ;;  %v8987_v11 = vld [vmem:[#allocation10 + $0x904] ss:$48 sps:$4 sm:$0xff]  }
 0x2d6   : > { %v2400_v12 = vpop.f32.mrb[0].mxu1 }
 0x2d7   : > { %v2402_v14 = vpop.f32.mrb[1].mxu1  ;;  %v8246_v28 = vadd.f32 %v2400_v12, %v997_v25  ;;  %v8990_v12 = vld [vmem:[#allocation10 + $0x924] ss:$48 sps:$4 sm:$0xff]   ;;  %v8994_v25 = vld [vmem:[#allocation10 + $0x980] ss:$48 sps:$4 sm:$0xff]  }
 0x2d8   : > { %v2404_v16 = vpop.f32.mrb[2].mxu1  ;;  %v8248_v29 = vadd.f32 %v2402_v14, %v1001_v26  ;;  %v8985_v14 = vld [vmem:[#allocation10 + $0x900] ss:$48 sps:$4 sm:$0xff]   ;;  %v8999_v26 = vld [vmem:[#allocation10 + $0x9c4] ss:$48 sps:$4 sm:$0xff]  }
 0x2d9   : > { %v2405_v19 = vpop.f32.mrb[3].mxu1  ;;  %v8988_v16 = vld [vmem:[#allocation10 + $0x920] ss:$48 sps:$4 sm:$0xff]  }
 0x2da   : > { %v8993_v19 = vld [vmem:[#allocation10 + $0x964] ss:$48 sps:$4 sm:$0xff]  }
 0x2de   : > { %v10876_v10 = vpop.f32.mrb[4].mxu1 }
 0x2df   : > { %v2799_v20 = vpop.f32.mrb[5].mxu1 }
 0x2e0   : > { %v2800_v33 = vadd.f32 %v2799_v20, %v2638_v37  ;;  %v8996_v20 = vld [vmem:[#allocation10 + $0x984] ss:$48 sps:$4 sm:$0xff]  }
 0x2e1   : > { %v9014_v37 = vld [vmem:[#allocation10 + $0xaa4] ss:$48 sps:$4 sm:$0xff]  }
 0x2e2   : > { %v10909_v17 = vpack.c.bf16 %v2800_v33, %v2800_v33  ;;  %v10916_v33 = vsub.s32 2, %v10529_v15 }
 0x350   : > { %v2605_v30 = vpop.f32.mrb[0].mxu0 }
 0x351   : > { %v10888_v32 = vadd.f32 %v8246_v28, %v2605_v30  ;;  %v2607_v13 = vpop.f32.mrb[1].mxu0  ;;  %v9002_v28 = vld [vmem:[#allocation10 + $0x9e4] ss:$48 sps:$4 sm:$0xff]   ;;  %v9000_v30 = vld [vmem:[#allocation10 + $0x9e0] ss:$48 sps:$4 sm:$0xff]  }
 0x352   : > { %v10890_v34 = vadd.f32 %v8248_v29, %v2607_v13  ;;  %v2609_v27 = vpop.f32.mrb[2].mxu0  ;;  %v8997_v29 = vld [vmem:[#allocation10 + $0x9c0] ss:$48 sps:$4 sm:$0xff]   ;;  %v9005_v13 = vld [vmem:[#allocation10 + $0xa24] ss:$48 sps:$4 sm:$0xff]  }
 0x353   : > { %v2610_v7 = vpop.f32.mrb[3].mxu0  ;;  %v9008_v27 = vld [vmem:[#allocation10 + $0xa44] ss:$48 sps:$4 sm:$0xff]  }
 0x354   : > { %v9003_v7 = vld [vmem:[#allocation10 + $0xa20] ss:$48 sps:$4 sm:$0xff]  }
 0x358   : > { %v2726_v38 = vpop.f32.mrb[4].mxu0 }
 0x359   : > { %v2727_v39 = vadd.f32 %v2726_v38, %v2626_v36  ;;  %v2728_v40 = vpop.f32.mrb[5].mxu0  ;;  %v9006_v36 = vld [vmem:[#allocation10 + $0xa40] ss:$48 sps:$4 sm:$0xff]  }
 0x35a   : > { %v2729_v9 = vadd.f32 %v2728_v40, %v2630_v18  ;;  %v9011_v18 = vld [vmem:[#allocation10 + $0xa84] ss:$48 sps:$4 sm:$0xff]   ;;  %v9009_v38 = vld [vmem:[#allocation10 + $0xa80] ss:$48 sps:$4 sm:$0xff]  }
 0x35b   : > { %v10905_v45 = vpack.c.bf16 %v2727_v39, %v2727_v39  ;;  %v9012_v39 = vld [vmem:[#allocation10 + $0xaa0] ss:$48 sps:$4 sm:$0xff]   ;;  %v9017_v40 = vld [vmem:[#allocation10 + $0xae4] ss:$48 sps:$4 sm:$0xff]  }
 0x35c   : > { %v10903_v41 = vpack.c.bf16 %v2729_v9, %v2729_v9  ;;  %v9020_v9 = vld [vmem:[#allocation10 + $0xb04] ss:$48 sps:$4 sm:$0xff]  }
 0x35e   : > { %5206 = vmatprep.mubr.bf16.mxu1 %v10903_v41  ;;  %5534 = vmatprep.mubr.bf16.mxu0 %v10903_v41 }
 0x35f   : > { %5207 = vmatmul.mubr.bf16.vlgmr.msra.gmra.mrb[8].mxu1 %v10905_v45  ;;  %5535 = vmatmul.mubr.bf16.vlgmr.msra.gmra.mrb[8].mxu0 %v10905_v45 }
 0x360   : > { %5216 = vmatpush1.bf16.msra.mxu1 %v8937_v42  ;;  %5544 = vmatpush1.bf16.msra.mxu0 %v8940_v43  ;;  %v9015_v42 = vld [vmem:[#allocation10 + $0xae0] ss:$48 sps:$4 sm:$0xff]  }
 0x361   : > { %5217 = vmatprep.subr.bf16.mxu1 %v8945_v46  ;;  %5545 = vmatprep.subr.bf16.mxu0 %v8948_v47  ;;  %v9018_v43 = vld [vmem:[#allocation10 + $0xb00] ss:$48 sps:$4 sm:$0xff]   ;;  %v9023_v46 = vld [vmem:[#allocation10 + $0xb44] ss:$48 sps:$4 sm:$0xff]  }
 0x362   : > { %5247 = vmatprep.mubr.bf16.mxu1 %v10909_v17  ;;  %5575 = vmatprep.mubr.bf16.mxu0 %v10909_v17  ;;  %v9026_v47 = vld [vmem:[#allocation10 + $0xb64] ss:$48 sps:$4 sm:$0xff]  }
 0x364   : > { %5218 = vmatpush1.bf16.msra.mxu1 %v8943_v48  ;;  %5546 = vmatpush1.bf16.msra.mxu0 %v8946_v49  ;;  %v2634_v48 = vrot.slane %v10892_v35, %v10916_v33  ;;  %v9021_v49 = vld [vmem:[#allocation10 + $0xb40] ss:$48 sps:$4 sm:$0xff]   ;;  %v9033_v35 = vld [vmem:[#allocation10 + $0x8] ss:$48 sps:$4 sm:$0xff]  }
 0x365   : > { %5219 = vmatprep.subr.bf16.mxu1 %v8951_v50  ;;  %5547 = vmatprep.subr.bf16.mxu0 %v8954_v21  ;;  %v9024_v50 = vld [vmem:[#allocation10 + $0xb60] ss:$48 sps:$4 sm:$0xff]   ;;  %v9029_v21 = vld [vmem:[#allocation10 + $0xba4] ss:$48 sps:$4 sm:$0xff]  }
 0x368   : > { %5220 = vmatpush1.bf16.msra.mxu1 %v8949_v51  ;;  %5548 = vmatpush1.bf16.msra.mxu0 %v8952_v52  ;;  %v9032_v51 = vld [vmem:[#allocation10 + $0xbc4] ss:$48 sps:$4 sm:$0xff]   ;;  %v2798_v52 = vadd.f32 %v10876_v10, %v2634_v48  ;;  %v9036_v10 = vld [vmem:[#allocation10 + $0x68] ss:$48 sps:$4 sm:$0xff]  }
 0x369   : > { %5221 = vmatprep.subr.bf16.mxu1 %v8957_v53  ;;  %5549 = vmatprep.subr.bf16.mxu0 %v8960_v54  ;;  %v9027_v53 = vld [vmem:[#allocation10 + $0xba0] ss:$48 sps:$4 sm:$0xff]   ;;  %v9192_v48 = vld [vmem:[%s10506_s12 + $0x70] ss:$8 sps:$4 sm:$0xff]  }
 0x36a   : > { %v9030_v54 = vld [vmem:[#allocation10 + $0xbc0] ss:$48 sps:$4 sm:$0xff]  }
 0x36c   : > { %5222 = vmatpush1.bf16.msra.mxu1 %v8955_v55  ;;  %5550 = vmatpush1.bf16.msra.mxu0 %v8958_v56  ;;  %v9035_v55 = vld [vmem:[#allocation10 + $0xc] ss:$48 sps:$4 sm:$0xff]   ;;  %v10921_v56 = vpack.c.bf16 %v2798_v52, %v2798_v52 }
 0x36d   : > { %5223 = vmatprep.subr.bf16.mxu1 %v8963_v58  ;;  %5551 = vmatprep.subr.bf16.mxu0 %v8966_v31  ;;  %v9038_v58 = vld [vmem:[#allocation10 + $0x6c] ss:$48 sps:$4 sm:$0xff]  }
 0x36e   : > { %v9041_v31 = vld [vmem:[#allocation10 + $0xcc] ss:$48 sps:$4 sm:$0xff]  }
 0x36f   : > { %v9083_v52 = vld [vmem:[#allocation10 + $0x60c] ss:$48 sps:$4 sm:$0xff]  }
 0x370   : > { %5224 = vmatpush1.bf16.msra.mxu1 %v8961_v59  ;;  %5552 = vmatpush1.bf16.msra.mxu0 %v8964_v60  ;;  %v9039_v59 = vld [vmem:[#allocation10 + $0xc8] ss:$48 sps:$4 sm:$0xff]   ;;  %v9044_v60 = vld [vmem:[#allocation10 + $0x12c] ss:$48 sps:$4 sm:$0xff]  }
 0x371   : > { %5225 = vmatprep.subr.bf16.mxu1 %v8969_v61  ;;  %5553 = vmatprep.subr.bf16.mxu0 %v8972_v62  ;;  %v9042_v61 = vld [vmem:[#allocation10 + $0x128] ss:$48 sps:$4 sm:$0xff]   ;;  %v9047_v62 = vld [vmem:[#allocation10 + $0x18c] ss:$48 sps:$4 sm:$0xff]  }
 0x374   : > { %5226 = vmatpush1.bf16.msra.mxu1 %v8967_v63  ;;  %5554 = vmatpush1.bf16.msra.mxu0 %v8970_v0  ;;  %v9045_v63 = vld [vmem:[#allocation10 + $0x188] ss:$48 sps:$4 sm:$0xff]   ;;  %v9050_v0 = vld [vmem:[#allocation10 + $0x1ec] ss:$48 sps:$4 sm:$0xff]  }
 0x375   : > { %5227 = vmatprep.subr.bf16.mxu1 %v8975_v1  ;;  %5555 = vmatprep.subr.bf16.mxu0 %v8978_v2  ;;  %v9048_v1 = vld [vmem:[#allocation10 + $0x1e8] ss:$48 sps:$4 sm:$0xff]   ;;  %v9053_v2 = vld [vmem:[#allocation10 + $0x24c] ss:$48 sps:$4 sm:$0xff]  }
 0x378   : > { %5228 = vmatpush1.bf16.msra.mxu1 %v8973_v3  ;;  %5556 = vmatpush1.bf16.msra.mxu0 %v8976_v4  ;;  %v9051_v3 = vld [vmem:[#allocation10 + $0x248] ss:$48 sps:$4 sm:$0xff]   ;;  %v9056_v4 = vld [vmem:[#allocation10 + $0x2ac] ss:$48 sps:$4 sm:$0xff]  }
 0x379   : > { %5229 = vmatprep.subr.bf16.mxu1 %v8981_v5  ;;  %5557 = vmatprep.subr.bf16.mxu0 %v8984_v6  ;;  %v9152_v5 = vld [vmem:[%s10506_s12 + $0x4] ss:$8 sps:$4 sm:$0xff]  }
 0x37a   : > { %v9054_v6 = vld [vmem:[#allocation10 + $0x2a8] ss:$48 sps:$4 sm:$0xff]  }
 0x37c   : > { %5230 = vmatpush1.bf16.msra.mxu1 %v8979_v44  ;;  %5558 = vmatpush1.bf16.msra.mxu0 %v8982_v8  ;;  %v9150_v44 = vld [vmem:[%s10506_s12] ss:$8 sps:$4 sm:$0xff]  }
 0x37d   : > { %5231 = vmatprep.subr.bf16.mxu1 %v8987_v11  ;;  %5559 = vmatprep.subr.bf16.mxu0 %v8990_v12  ;;  %v9059_v8 = vld [vmem:[#allocation10 + $0x30c] ss:$48 sps:$4 sm:$0xff]   ;;  %v9158_v11 = vld [vmem:[%s10506_s12 + $0x14] ss:$8 sps:$4 sm:$0xff]  }
 0x37e   : > { %v9057_v12 = vld [vmem:[#allocation10 + $0x308] ss:$48 sps:$4 sm:$0xff]  }
 0x380   : > { %5232 = vmatpush1.bf16.msra.mxu1 %v8985_v14  ;;  %5560 = vmatpush1.bf16.msra.mxu0 %v8988_v16  ;;  %v9156_v14 = vld [vmem:[%s10506_s12 + $0x10] ss:$8 sps:$4 sm:$0xff]  }
 0x381   : > { %5233 = vmatprep.subr.bf16.mxu1 %v8993_v19  ;;  %5561 = vmatprep.subr.bf16.mxu0 %v8996_v20  ;;  %v9062_v16 = vld [vmem:[#allocation10 + $0x36c] ss:$48 sps:$4 sm:$0xff]   ;;  %v9164_v19 = vld [vmem:[%s10506_s12 + $0x24] ss:$8 sps:$4 sm:$0xff]  }
 0x382   : > { %v9060_v20 = vld [vmem:[#allocation10 + $0x368] ss:$48 sps:$4 sm:$0xff]  }
 0x384   : > { %5234 = vmatpush1.bf16.msra.mxu1 %v8991_v23  ;;  %5562 = vmatpush1.bf16.msra.mxu0 %v8994_v25  ;;  %v9162_v23 = vld [vmem:[%s10506_s12 + $0x20] ss:$8 sps:$4 sm:$0xff]  }
 0x385   : > { %5235 = vmatprep.subr.bf16.mxu1 %v8999_v26  ;;  %5563 = vmatprep.subr.bf16.mxu0 %v9002_v28  ;;  %v9065_v25 = vld [vmem:[#allocation10 + $0x3cc] ss:$48 sps:$4 sm:$0xff]   ;;  %v9170_v26 = vld [vmem:[%s10506_s12 + $0x34] ss:$8 sps:$4 sm:$0xff]  }
 0x386   : > { %v9063_v28 = vld [vmem:[#allocation10 + $0x3c8] ss:$48 sps:$4 sm:$0xff]  }
 0x388   : > { %5236 = vmatpush1.bf16.msra.mxu1 %v8997_v29  ;;  %5564 = vmatpush1.bf16.msra.mxu0 %v9000_v30  ;;  %v9168_v29 = vld [vmem:[%s10506_s12 + $0x30] ss:$8 sps:$4 sm:$0xff]  }
 0x389   : > { %5237 = vmatprep.subr.bf16.mxu1 %v9005_v13  ;;  %5565 = vmatprep.subr.bf16.mxu0 %v9008_v27  ;;  %v9068_v30 = vld [vmem:[#allocation10 + $0x42c] ss:$48 sps:$4 sm:$0xff]   ;;  %v9176_v13 = vld [vmem:[%s10506_s12 + $0x44] ss:$8 sps:$4 sm:$0xff]  }
 0x38a   : > { %v9066_v27 = vld [vmem:[#allocation10 + $0x428] ss:$48 sps:$4 sm:$0xff]  }
 0x38c   : > { %5238 = vmatpush1.bf16.msra.mxu1 %v9003_v7  ;;  %5566 = vmatpush1.bf16.msra.mxu0 %v9006_v36  ;;  %v9174_v7 = vld [vmem:[%s10506_s12 + $0x40] ss:$8 sps:$4 sm:$0xff]  }
 0x38d   : > { %5239 = vmatprep.subr.bf16.mxu1 %v9011_v18  ;;  %5567 = vmatprep.subr.bf16.mxu0 %v9014_v37  ;;  %v9071_v36 = vld [vmem:[#allocation10 + $0x48c] ss:$48 sps:$4 sm:$0xff]   ;;  %v9182_v18 = vld [vmem:[%s10506_s12 + $0x54] ss:$8 sps:$4 sm:$0xff]  }
 0x38e   : > { %v9069_v37 = vld [vmem:[#allocation10 + $0x488] ss:$48 sps:$4 sm:$0xff]  }
 0x390   : > { %5240 = vmatpush1.bf16.msra.mxu1 %v9009_v38  ;;  %5568 = vmatpush1.bf16.msra.mxu0 %v9012_v39  ;;  %v9180_v38 = vld [vmem:[%s10506_s12 + $0x50] ss:$8 sps:$4 sm:$0xff]  }
 0x391   : > { %5241 = vmatprep.subr.bf16.mxu1 %v9017_v40  ;;  %5569 = vmatprep.subr.bf16.mxu0 %v9020_v9  ;;  %v9074_v39 = vld [vmem:[#allocation10 + $0x4ec] ss:$48 sps:$4 sm:$0xff]   ;;  %v9188_v40 = vld [vmem:[%s10506_s12 + $0x64] ss:$8 sps:$4 sm:$0xff]  }
 0x392   : > { %v9072_v9 = vld [vmem:[#allocation10 + $0x4e8] ss:$48 sps:$4 sm:$0xff]  }
 0x394   : > { %5242 = vmatpush1.bf16.msra.mxu1 %v9015_v42  ;;  %5570 = vmatpush1.bf16.msra.mxu0 %v9018_v43  ;;  %v9186_v42 = vld [vmem:[%s10506_s12 + $0x60] ss:$8 sps:$4 sm:$0xff]  }
 0x395   : > { %5243 = vmatprep.subr.bf16.mxu1 %v9023_v46  ;;  %5571 = vmatprep.subr.bf16.mxu0 %v9026_v47  ;;  %v9077_v43 = vld [vmem:[#allocation10 + $0x54c] ss:$48 sps:$4 sm:$0xff]   ;;  %v9194_v46 = vld [vmem:[%s10506_s12 + $0x74] ss:$8 sps:$4 sm:$0xff]  }
 0x396   : > { %v9075_v47 = vld [vmem:[#allocation10 + $0x548] ss:$48 sps:$4 sm:$0xff]  }
 0x398   : > { %5244 = vmatpush1.bf16.msra.mxu1 %v9021_v49  ;;  %5572 = vmatpush1.bf16.msra.mxu0 %v9024_v50  ;;  %v9080_v49 = vld [vmem:[#allocation10 + $0x5ac] ss:$48 sps:$4 sm:$0xff]   ;;  %v9200_v50 = vld [vmem:[%s10506_s12 + $0x84] ss:$8 sps:$4 sm:$0xff]  }
 0x399   : > { %5245 = vmatprep.subr.bf16.mxu1 %v9029_v21  ;;  %5573 = vmatprep.subr.bf16.mxu0 %v9032_v51  ;;  %v9078_v21 = vld [vmem:[#allocation10 + $0x5a8] ss:$48 sps:$4 sm:$0xff]   ;;  %v9198_v51 = vld [vmem:[%s10506_s12 + $0x80] ss:$8 sps:$4 sm:$0xff]  }
 0x39c   : > { %5246 = vmatpush1.bf16.msra.mxu1 %v9027_v53  ;;  %5574 = vmatpush1.bf16.msra.mxu0 %v9030_v54  ;;  %v9206_v53 = vld [vmem:[%s10506_s12 + $0x94] ss:$8 sps:$4 sm:$0xff]  }
 0x39d   : > { %5256 = vmatprep.subr.bf16.mxu1 %v9035_v55  ;;  %6842 = vmatprep.subr.bf16.mxu0 %v9152_v5  ;;  %v9081_v54 = vld [vmem:[#allocation10 + $0x608] ss:$48 sps:$4 sm:$0xff]   ;;  %v9204_v55 = vld [vmem:[%s10506_s12 + $0x90] ss:$8 sps:$4 sm:$0xff]  }
 0x39e   : > { %v9093_v5 = vld [vmem:[#allocation10 + $0x788] ss:$48 sps:$4 sm:$0xff]  }
 0x39f   : > { %5248 = vmatmul.mubr.bf16.vlgmr.msra.gmra.mrb[8].mxu1 %v10921_v56  ;;  %5576 = vmatmul.mubr.bf16.vlgmr.msra.gmra.mrb[8].mxu0 %v10921_v56 }
 0x3a0   : > { %5257 = vmatpush1.bf16.msra.mxu1 %v9033_v35  ;;  %5288 = vmatprep.mubr.bf16.mxu1 %v10903_v41  ;;  %v9086_v35 = vld [vmem:[#allocation10 + $0x66c] ss:$48 sps:$4 sm:$0xff]  }
 0x3a1   : > { %5258 = vmatprep.subr.bf16.mxu1 %v9038_v58  ;;  %6843 = vmatpush1.bf16.msra.mxu0 %v9150_v44  ;;  %v9212_v58 = vld [vmem:[%s10506_s12 + $0xa4] ss:$8 sps:$4 sm:$0xff]   ;;  %v9098_v44 = vld [vmem:[#allocation10 + $0x7ec] ss:$48 sps:$4 sm:$0xff]  }
 0x3a2   : > { %6844 = vmatprep.subr.bf16.mxu0 %v9158_v11  ;;  %v9096_v11 = vld [vmem:[#allocation10 + $0x7e8] ss:$48 sps:$4 sm:$0xff]  }
 0x3a4   : > { %5259 = vmatpush1.bf16.msra.mxu1 %v9036_v10  ;;  %v9084_v10 = vld [vmem:[#allocation10 + $0x668] ss:$48 sps:$4 sm:$0xff]  }
 0x3a5   : > { %5260 = vmatprep.subr.bf16.mxu1 %v9041_v31  ;;  %6845 = vmatpush1.bf16.msra.mxu0 %v9156_v14  ;;  %v9210_v31 = vld [vmem:[%s10506_s12 + $0xa0] ss:$8 sps:$4 sm:$0xff]  }
 0x3a6   : > { %6846 = vmatprep.subr.bf16.mxu0 %v9164_v19  ;;  %v9101_v14 = vld [vmem:[#allocation10 + $0x84c] ss:$48 sps:$4 sm:$0xff]   ;;  %v9099_v19 = vld [vmem:[#allocation10 + $0x848] ss:$48 sps:$4 sm:$0xff]  }
 0x3a8   : > { %5261 = vmatpush1.bf16.msra.mxu1 %v9039_v59  ;;  %v9089_v59 = vld [vmem:[#allocation10 + $0x6cc] ss:$48 sps:$4 sm:$0xff]  }
 0x3a9   : > { %5262 = vmatprep.subr.bf16.mxu1 %v9044_v60  ;;  %6847 = vmatpush1.bf16.msra.mxu0 %v9162_v23  ;;  %v9218_v60 = vld [vmem:[%s10506_s12 + $0xb4] ss:$8 sps:$4 sm:$0xff]   ;;  %v9104_v23 = vld [vmem:[#allocation10 + $0x8ac] ss:$48 sps:$4 sm:$0xff]  }
 0x3aa   : > { %6848 = vmatprep.subr.bf16.mxu0 %v9170_v26  ;;  %v9107_v26 = vld [vmem:[#allocation10 + $0x90c] ss:$48 sps:$4 sm:$0xff]  }
 0x3ac   : > { %5263 = vmatpush1.bf16.msra.mxu1 %v9042_v61  ;;  %v9087_v61 = vld [vmem:[#allocation10 + $0x6c8] ss:$48 sps:$4 sm:$0xff]  }
 0x3ad   : > { %5264 = vmatprep.subr.bf16.mxu1 %v9047_v62  ;;  %6849 = vmatpush1.bf16.msra.mxu0 %v9168_v29  ;;  %v9216_v62 = vld [vmem:[%s10506_s12 + $0xb0] ss:$8 sps:$4 sm:$0xff]  }
 0x3ae   : > { %6850 = vmatprep.subr.bf16.mxu0 %v9176_v13  ;;  %v9110_v29 = vld [vmem:[#allocation10 + $0x96c] ss:$48 sps:$4 sm:$0xff]  }
 0x3af   : > { %v9113_v13 = vld [vmem:[#allocation10 + $0x9cc] ss:$48 sps:$4 sm:$0xff]  }
 0x3b0   : > { %5265 = vmatpush1.bf16.msra.mxu1 %v9045_v63  ;;  %v9092_v63 = vld [vmem:[#allocation10 + $0x72c] ss:$48 sps:$4 sm:$0xff]  }
 0x3b1   : > { %5266 = vmatprep.subr.bf16.mxu1 %v9050_v0  ;;  %6851 = vmatpush1.bf16.msra.mxu0 %v9174_v7  ;;  %v9224_v0 = vld [vmem:[%s10506_s12 + $0xc4] ss:$8 sps:$4 sm:$0xff]   ;;  %v9116_v7 = vld [vmem:[#allocation10 + $0xa2c] ss:$48 sps:$4 sm:$0xff]  }
 0x3b2   : > { %6852 = vmatprep.subr.bf16.mxu0 %v9182_v18  ;;  %v9119_v18 = vld [vmem:[#allocation10 + $0xa8c] ss:$48 sps:$4 sm:$0xff]  }
 0x3b4   : > { %5267 = vmatpush1.bf16.msra.mxu1 %v9048_v1  ;;  %v9090_v1 = vld [vmem:[#allocation10 + $0x728] ss:$48 sps:$4 sm:$0xff]  }
 0x3b5   : > { %5268 = vmatprep.subr.bf16.mxu1 %v9053_v2  ;;  %6853 = vmatpush1.bf16.msra.mxu0 %v9180_v38  ;;  %v9222_v2 = vld [vmem:[%s10506_s12 + $0xc0] ss:$8 sps:$4 sm:$0xff]  }
 0x3b6   : > { %6854 = vmatprep.subr.bf16.mxu0 %v9188_v40  ;;  %v9122_v38 = vld [vmem:[#allocation10 + $0xaec] ss:$48 sps:$4 sm:$0xff]  }
 0x3b7   : > { %v9125_v40 = vld [vmem:[#allocation10 + $0xb4c] ss:$48 sps:$4 sm:$0xff]  }
 0x3b8   : > { %5269 = vmatpush1.bf16.msra.mxu1 %v9051_v3  ;;  %v9095_v3 = vld [vmem:[#allocation10 + $0x78c] ss:$48 sps:$4 sm:$0xff]  }
 0x3b9   : > { %5270 = vmatprep.subr.bf16.mxu1 %v9056_v4  ;;  %6855 = vmatpush1.bf16.msra.mxu0 %v9186_v42  ;;  %v9230_v4 = vld [vmem:[%s10506_s12 + $0xd4] ss:$8 sps:$4 sm:$0xff]   ;;  %v9128_v42 = vld [vmem:[#allocation10 + $0xbac] ss:$48 sps:$4 sm:$0xff]  }
 0x3ba   : > { %6856 = vmatprep.subr.bf16.mxu0 %v9194_v46  ;;  %v9131_v46 = vld [vmem:[#allocation10 + $0x14] ss:$48 sps:$4 sm:$0xff]  }
 0x3bc   : > { %5271 = vmatpush1.bf16.msra.mxu1 %v9054_v6  ;;  %v9228_v6 = vld [vmem:[%s10506_s12 + $0xd0] ss:$8 sps:$4 sm:$0xff]  }
 0x3bd   : > { %5272 = vmatprep.subr.bf16.mxu1 %v9059_v8  ;;  %6857 = vmatpush1.bf16.msra.mxu0 %v9192_v48  ;;  %v9236_v8 = vld [vmem:[%s10506_s12 + $0xe4] ss:$8 sps:$4 sm:$0xff]   ;;  %v9134_v48 = vld [vmem:[#allocation10 + $0x74] ss:$48 sps:$4 sm:$0xff]  }
 0x3be   : > { %6858 = vmatprep.subr.bf16.mxu0 %v9200_v50  ;;  %v9137_v50 = vld [vmem:[#allocation10 + $0xd4] ss:$48 sps:$4 sm:$0xff]  }
 0x3c0   : > { %5273 = vmatpush1.bf16.msra.mxu1 %v9057_v12  ;;  %v9234_v12 = vld [vmem:[%s10506_s12 + $0xe0] ss:$8 sps:$4 sm:$0xff]  }
 0x3c1   : > { %5274 = vmatprep.subr.bf16.mxu1 %v9062_v16  ;;  %6859 = vmatpush1.bf16.msra.mxu0 %v9198_v51  ;;  %v9242_v16 = vld [vmem:[%s10506_s12 + $0xf4] ss:$8 sps:$4 sm:$0xff]   ;;  %v9140_v51 = vld [vmem:[#allocation10 + $0x134] ss:$48 sps:$4 sm:$0xff]  }
 0x3c2   : > { %6860 = vmatprep.subr.bf16.mxu0 %v9206_v53  ;;  %v9143_v53 = vld [vmem:[#allocation10 + $0x194] ss:$48 sps:$4 sm:$0xff]  }
 0x3c4   : > { %5275 = vmatpush1.bf16.msra.mxu1 %v9060_v20  ;;  %v9240_v20 = vld [vmem:[%s10506_s12 + $0xf0] ss:$8 sps:$4 sm:$0xff]  }
 0x3c5   : > { %5276 = vmatprep.subr.bf16.mxu1 %v9065_v25  ;;  %6861 = vmatpush1.bf16.msra.mxu0 %v9204_v55  ;;  %v9102_v25 = vld [vmem:[#allocation10 + $0x8a8] ss:$48 sps:$4 sm:$0xff]   ;;  %v9146_v55 = vld [vmem:[#allocation10 + $0x1f4] ss:$48 sps:$4 sm:$0xff]  }
 0x3c6   : > { %6862 = vmatprep.subr.bf16.mxu0 %v9212_v58  ;;  %v9149_v58 = vld [vmem:[#allocation10 + $0x254] ss:$48 sps:$4 sm:$0xff]  }
 0x3c8   : > { %5277 = vmatpush1.bf16.msra.mxu1 %v9063_v28  ;;  %v9105_v28 = vld [vmem:[#allocation10 + $0x908] ss:$48 sps:$4 sm:$0xff]  }
 0x3c9   : > { %5278 = vmatprep.subr.bf16.mxu1 %v9068_v30  ;;  %6863 = vmatpush1.bf16.msra.mxu0 %v9210_v31  ;;  %v9108_v30 = vld [vmem:[#allocation10 + $0x968] ss:$48 sps:$4 sm:$0xff]   ;;  %v9155_v31 = vld [vmem:[#allocation10 + $0x2b4] ss:$48 sps:$4 sm:$0xff]  }
 0x3ca   : > { %6864 = vmatprep.subr.bf16.mxu0 %v9218_v60  ;;  %v9153_v60 = vld [vmem:[#allocation10 + $0x2b0] ss:$48 sps:$4 sm:$0xff]  }
 0x3cc   : > { %5279 = vmatpush1.bf16.msra.mxu1 %v9066_v27  ;;  %v9111_v27 = vld [vmem:[#allocation10 + $0x9c8] ss:$48 sps:$4 sm:$0xff]  }
 0x3cd   : > { %5280 = vmatprep.subr.bf16.mxu1 %v9071_v36  ;;  %6865 = vmatpush1.bf16.msra.mxu0 %v9216_v62  ;;  %v9114_v36 = vld [vmem:[#allocation10 + $0xa28] ss:$48 sps:$4 sm:$0xff]   ;;  %v9159_v62 = vld [vmem:[#allocation10 + $0x310] ss:$48 sps:$4 sm:$0xff]  }
 0x3ce   : > { %6866 = vmatprep.subr.bf16.mxu0 %v9224_v0  ;;  %v9165_v0 = vld [vmem:[#allocation10 + $0x370] ss:$48 sps:$4 sm:$0xff]  }
 0x3d0   : > { %5281 = vmatpush1.bf16.msra.mxu1 %v9069_v37  ;;  %v9117_v37 = vld [vmem:[#allocation10 + $0xa88] ss:$48 sps:$4 sm:$0xff]  }
 0x3d1   : > { %5282 = vmatprep.subr.bf16.mxu1 %v9074_v39  ;;  %6867 = vmatpush1.bf16.msra.mxu0 %v9222_v2  ;;  %v9120_v39 = vld [vmem:[#allocation10 + $0xae8] ss:$48 sps:$4 sm:$0xff]   ;;  %v9171_v2 = vld [vmem:[#allocation10 + $0x3d0] ss:$48 sps:$4 sm:$0xff]  }
 0x3d2   : > { %6868 = vmatprep.subr.bf16.mxu0 %v9230_v4  ;;  %v9177_v4 = vld [vmem:[#allocation10 + $0x430] ss:$48 sps:$4 sm:$0xff]  }
 0x3d4   : > { %5283 = vmatpush1.bf16.msra.mxu1 %v9072_v9  ;;  %v9123_v9 = vld [vmem:[#allocation10 + $0xb48] ss:$48 sps:$4 sm:$0xff]  }
 0x3d5   : > { %5284 = vmatprep.subr.bf16.mxu1 %v9077_v43  ;;  %6869 = vmatpush1.bf16.msra.mxu0 %v9228_v6  ;;  %v9126_v43 = vld [vmem:[#allocation10 + $0xba8] ss:$48 sps:$4 sm:$0xff]   ;;  %v9183_v6 = vld [vmem:[#allocation10 + $0x490] ss:$48 sps:$4 sm:$0xff]  }
 0x3d6   : > { %6870 = vmatprep.subr.bf16.mxu0 %v9236_v8  ;;  %v9189_v8 = vld [vmem:[#allocation10 + $0x4f0] ss:$48 sps:$4 sm:$0xff]  }
 0x3d8   : > { %5285 = vmatpush1.bf16.msra.mxu1 %v9075_v47  ;;  %v9129_v47 = vld [vmem:[#allocation10 + $0x10] ss:$48 sps:$4 sm:$0xff]  }
 0x3d9   : > { %5286 = vmatprep.subr.bf16.mxu1 %v9080_v49  ;;  %6871 = vmatpush1.bf16.msra.mxu0 %v9234_v12  ;;  %v9132_v49 = vld [vmem:[#allocation10 + $0x70] ss:$48 sps:$4 sm:$0xff]  }
 0x3da   : > { %6872 = vmatprep.subr.bf16.mxu0 %v9242_v16  ;;  %v9195_v12 = vld [vmem:[#allocation10 + $0x550] ss:$48 sps:$4 sm:$0xff]  }
 0x3db   : > { %v9201_v16 = vld [vmem:[#allocation10 + $0x5b0] ss:$48 sps:$4 sm:$0xff]  }
 0x3dc   : > { %5287 = vmatpush1.bf16.msra.mxu1 %v9078_v21  ;;  %v9135_v21 = vld [vmem:[#allocation10 + $0xd0] ss:$48 sps:$4 sm:$0xff]  }
 0x3dd   : > { %5297 = vmatprep.subr.bf16.mxu1 %v9083_v52  ;;  %6873 = vmatpush1.bf16.msra.mxu0 %v9240_v20  ;;  %v9138_v52 = vld [vmem:[#allocation10 + $0x130] ss:$48 sps:$4 sm:$0xff]  }
 0x3de   : > { %v9207_v20 = vld [vmem:[#allocation10 + $0x610] ss:$48 sps:$4 sm:$0xff]  }
 0x3df   : > { %5289 = vmatmul.mubr.bf16.vlgmr.msra.gmra.mrb[12].mxu1 %v10905_v45 }
 0x3e0   : > { %5298 = vmatpush1.bf16.msra.mxu1 %v9081_v54  ;;  %5329 = vmatprep.mubr.bf16.mxu1 %v10909_v17  ;;  %v9141_v54 = vld [vmem:[#allocation10 + $0x190] ss:$48 sps:$4 sm:$0xff]  }
 0x3e1   : > { %5299 = vmatprep.subr.bf16.mxu1 %v9086_v35  ;;  %v9144_v35 = vld [vmem:[#allocation10 + $0x1f0] ss:$48 sps:$4 sm:$0xff]  }
 0x3e4   : > { %5300 = vmatpush1.bf16.msra.mxu1 %v9084_v10  ;;  %v9147_v10 = vld [vmem:[#allocation10 + $0x250] ss:$48 sps:$4 sm:$0xff]  }
 0x3e5   : > { %5301 = vmatprep.subr.bf16.mxu1 %v9089_v59  ;;  %v9296_v59 = vld [vmem:[%s10506_s12 + $0x104] ss:$8 sps:$4 sm:$0xff]  }
 0x3e6   : > { %6883 = vmatprep.subr.bf16.mxu0 %v9296_v59  ;;  %v9308_v59 = vld [vmem:[%s10506_s12 + $0x124] ss:$8 sps:$4 sm:$0xff]  }
 0x3e8   : > { %5302 = vmatpush1.bf16.msra.mxu1 %v9087_v61  ;;  %v9161_v61 = vld [vmem:[#allocation10 + $0x314] ss:$48 sps:$4 sm:$0xff]  }
 0x3e9   : > { %5303 = vmatprep.subr.bf16.mxu1 %v9092_v63  ;;  %v9167_v63 = vld [vmem:[#allocation10 + $0x374] ss:$48 sps:$4 sm:$0xff]  }
 0x3ec   : > { %5304 = vmatpush1.bf16.msra.mxu1 %v9090_v1  ;;  %v9173_v1 = vld [vmem:[#allocation10 + $0x3d4] ss:$48 sps:$4 sm:$0xff]  }
 0x3ed   : > { %5305 = vmatprep.subr.bf16.mxu1 %v9095_v3  ;;  %v9179_v3 = vld [vmem:[#allocation10 + $0x434] ss:$48 sps:$4 sm:$0xff]  }
 0x3f0   : > { %5306 = vmatpush1.bf16.msra.mxu1 %v9093_v5  ;;  %v9185_v5 = vld [vmem:[#allocation10 + $0x494] ss:$48 sps:$4 sm:$0xff]  }
 0x3f1   : > { %5307 = vmatprep.subr.bf16.mxu1 %v9098_v44  ;;  %v9191_v44 = vld [vmem:[#allocation10 + $0x4f4] ss:$48 sps:$4 sm:$0xff]  }
 0x3f4   : > { %5308 = vmatpush1.bf16.msra.mxu1 %v9096_v11  ;;  %v9197_v11 = vld [vmem:[#allocation10 + $0x554] ss:$48 sps:$4 sm:$0xff]  }
 0x3f5   : > { %5309 = vmatprep.subr.bf16.mxu1 %v9101_v14  ;;  %v9203_v14 = vld [vmem:[#allocation10 + $0x5b4] ss:$48 sps:$4 sm:$0xff]  }
 0x3f8   : > { %5310 = vmatpush1.bf16.msra.mxu1 %v9099_v19  ;;  %v9209_v19 = vld [vmem:[#allocation10 + $0x614] ss:$48 sps:$4 sm:$0xff]  }
 0x3f9   : > { %5311 = vmatprep.subr.bf16.mxu1 %v9104_v23  ;;  %v9215_v23 = vld [vmem:[#allocation10 + $0x674] ss:$48 sps:$4 sm:$0xff]  }
 0x3fc   : > { %5312 = vmatpush1.bf16.msra.mxu1 %v9102_v25  ;;  %v9213_v25 = vld [vmem:[#allocation10 + $0x670] ss:$48 sps:$4 sm:$0xff]  }
 0x3fd   : > { %5313 = vmatprep.subr.bf16.mxu1 %v9107_v26  ;;  %v9221_v26 = vld [vmem:[#allocation10 + $0x6d4] ss:$48 sps:$4 sm:$0xff]  }
 0x400   : > { %5314 = vmatpush1.bf16.msra.mxu1 %v9105_v28  ;;  %v9219_v28 = vld [vmem:[#allocation10 + $0x6d0] ss:$48 sps:$4 sm:$0xff]  }
 0x401   : > { %5315 = vmatprep.subr.bf16.mxu1 %v9110_v29  ;;  %v9227_v29 = vld [vmem:[#allocation10 + $0x734] ss:$48 sps:$4 sm:$0xff]  }
 0x404   : > { %5316 = vmatpush1.bf16.msra.mxu1 %v9108_v30  ;;  %v9225_v30 = vld [vmem:[#allocation10 + $0x730] ss:$48 sps:$4 sm:$0xff]  }
 0x405   : > { %5317 = vmatprep.subr.bf16.mxu1 %v9113_v13  ;;  %v9233_v13 = vld [vmem:[#allocation10 + $0x794] ss:$48 sps:$4 sm:$0xff]  }
 0x408   : > { %5318 = vmatpush1.bf16.msra.mxu1 %v9111_v27  ;;  %v9231_v27 = vld [vmem:[#allocation10 + $0x790] ss:$48 sps:$4 sm:$0xff]  }
 0x409   : > { %5319 = vmatprep.subr.bf16.mxu1 %v9116_v7  ;;  %v10965_v7 = vld [vmem:[#allocation12] sm:$0xff] }
 0x40c   : > { %5320 = vmatpush1.bf16.msra.mxu1 %v9114_v36  ;;  %v9239_v36 = vld [vmem:[#allocation10 + $0x7f4] ss:$48 sps:$4 sm:$0xff]  }
 0x40d   : > { %5321 = vmatprep.subr.bf16.mxu1 %v9119_v18  ;;  %v3197_v18 = vrot.slane %v10965_v7, %v10879_v22 }
 0x410   : > { %5322 = vmatpush1.bf16.msra.mxu1 %v9117_v37  ;;  %v3201_v37 = vrot.slane %v10965_v7, %v10884_v24 }
 0x411   : > { %5323 = vmatprep.subr.bf16.mxu1 %v9122_v38  ;;  %v9237_v38 = vld [vmem:[#allocation10 + $0x7f0] ss:$48 sps:$4 sm:$0xff]  }
 0x414   : > { %5324 = vmatpush1.bf16.msra.mxu1 %v9120_v39  ;;  %v9245_v39 = vld [vmem:[#allocation10 + $0x854] ss:$48 sps:$4 sm:$0xff]  }
 0x415   : > { %5325 = vmatprep.subr.bf16.mxu1 %v9125_v40 }
 0x418   : > { %5326 = vmatpush1.bf16.msra.mxu1 %v9123_v9 }
 0x419   : > { %5327 = vmatprep.subr.bf16.mxu1 %v9128_v42 }
 0x41c   : > { %5328 = vmatpush1.bf16.msra.mxu1 %v9126_v43 }
 0x41d   : > { %5338 = vmatprep.subr.bf16.mxu1 %v9131_v46 }
 0x41f   : > { %5330 = vmatmul.mubr.bf16.vlgmr.msra.gmra.mrb[12].mxu1 %v10921_v56 }
 0x420   : > { %5339 = vmatpush1.bf16.msra.mxu1 %v9129_v47  ;;  %5370 = vmatprep.mubr.bf16.mxu1 %v10903_v41 }
 0x421   : > { %5340 = vmatprep.subr.bf16.mxu1 %v9134_v48 }
 0x424   : > { %5341 = vmatpush1.bf16.msra.mxu1 %v9132_v49 }
 0x425   : > { %5342 = vmatprep.subr.bf16.mxu1 %v9137_v50  ;;  %v9243_v50 = vld [vmem:[#allocation10 + $0x850] ss:$48 sps:$4 sm:$0xff]  }
 0x428   : > { %5343 = vmatpush1.bf16.msra.mxu1 %v9135_v21 }
 0x429   : > { %5344 = vmatprep.subr.bf16.mxu1 %v9140_v51 }
 0x42c   : > { %5345 = vmatpush1.bf16.msra.mxu1 %v9138_v52  ;;  %v9248_v52 = vld [vmem:[#allocation10 + $0x8b4] ss:$48 sps:$4 sm:$0xff]  }
 0x42d   : > { %5346 = vmatprep.subr.bf16.mxu1 %v9143_v53 }
 0x430   : > { %5347 = vmatpush1.bf16.msra.mxu1 %v9141_v54  ;;  %v9294_v54 = vld [vmem:[%s10506_s12 + $0x100] ss:$8 sps:$4 sm:$0xff]  }
 0x431   : > { %5348 = vmatprep.subr.bf16.mxu1 %v9146_v55 }
 0x434   : > { %5349 = vmatpush1.bf16.msra.mxu1 %v9144_v35  ;;  %v9302_v35 = vld [vmem:[%s10506_s12 + $0x114] ss:$8 sps:$4 sm:$0xff]  }
 0x435   : > { %5350 = vmatprep.subr.bf16.mxu1 %v9149_v58  ;;  %v9246_v58 = vld [vmem:[#allocation10 + $0x8b0] ss:$48 sps:$4 sm:$0xff]  }
 0x438   : > { %5351 = vmatpush1.bf16.msra.mxu1 %v9147_v10  ;;  %v9251_v10 = vld [vmem:[#allocation10 + $0x914] ss:$48 sps:$4 sm:$0xff]  }
 0x439   : > { %5352 = vmatprep.subr.bf16.mxu1 %v9155_v31  ;;  %v9300_v31 = vld [vmem:[%s10506_s12 + $0x110] ss:$8 sps:$4 sm:$0xff]  }
 0x43c   : > { %5353 = vmatpush1.bf16.msra.mxu1 %v9153_v60  ;;  %v9249_v60 = vld [vmem:[#allocation10 + $0x910] ss:$48 sps:$4 sm:$0xff]  }
 0x43d   : > { %5354 = vmatprep.subr.bf16.mxu1 %v9161_v61  ;;  %v9254_v61 = vld [vmem:[#allocation10 + $0x974] ss:$48 sps:$4 sm:$0xff]  }
 0x440   : > { %5355 = vmatpush1.bf16.msra.mxu1 %v9159_v62  ;;  %v9306_v62 = vld [vmem:[%s10506_s12 + $0x120] ss:$8 sps:$4 sm:$0xff]  }
 0x441   : > { %5356 = vmatprep.subr.bf16.mxu1 %v9167_v63  ;;  %v9314_v63 = vld [vmem:[%s10506_s12 + $0x134] ss:$8 sps:$4 sm:$0xff]  }
 0x444   : > { %5357 = vmatpush1.bf16.msra.mxu1 %v9165_v0  ;;  %v9252_v0 = vld [vmem:[#allocation10 + $0x970] ss:$48 sps:$4 sm:$0xff]  }
 0x445   : > { %5358 = vmatprep.subr.bf16.mxu1 %v9173_v1  ;;  %v9257_v1 = vld [vmem:[#allocation10 + $0x9d4] ss:$48 sps:$4 sm:$0xff]  }
 0x448   : > { %5359 = vmatpush1.bf16.msra.mxu1 %v9171_v2  ;;  %v9312_v2 = vld [vmem:[%s10506_s12 + $0x130] ss:$8 sps:$4 sm:$0xff]  }
 0x449   : > { %5360 = vmatprep.subr.bf16.mxu1 %v9179_v3  ;;  %v9320_v3 = vld [vmem:[%s10506_s12 + $0x144] ss:$8 sps:$4 sm:$0xff]  }
 0x44c   : > { %5361 = vmatpush1.bf16.msra.mxu1 %v9177_v4  ;;  %v9255_v4 = vld [vmem:[#allocation10 + $0x9d0] ss:$48 sps:$4 sm:$0xff]  }
 0x44d   : > { %5362 = vmatprep.subr.bf16.mxu1 %v9185_v5  ;;  %v9260_v5 = vld [vmem:[#allocation10 + $0xa34] ss:$48 sps:$4 sm:$0xff]  }
 0x450   : > { %5363 = vmatpush1.bf16.msra.mxu1 %v9183_v6  ;;  %v9318_v6 = vld [vmem:[%s10506_s12 + $0x140] ss:$8 sps:$4 sm:$0xff]  }
 0x451   : > { %5364 = vmatprep.subr.bf16.mxu1 %v9191_v44  ;;  %v9326_v44 = vld [vmem:[%s10506_s12 + $0x154] ss:$8 sps:$4 sm:$0xff]  }
 0x454   : > { %5365 = vmatpush1.bf16.msra.mxu1 %v9189_v8  ;;  %v9258_v8 = vld [vmem:[#allocation10 + $0xa30] ss:$48 sps:$4 sm:$0xff]  }
 0x455   : > { %5366 = vmatprep.subr.bf16.mxu1 %v9197_v11  ;;  %v9263_v11 = vld [vmem:[#allocation10 + $0xa94] ss:$48 sps:$4 sm:$0xff]  }
 0x458   : > { %5367 = vmatpush1.bf16.msra.mxu1 %v9195_v12  ;;  %v9324_v12 = vld [vmem:[%s10506_s12 + $0x150] ss:$8 sps:$4 sm:$0xff]  }
 0x459   : > { %5368 = vmatprep.subr.bf16.mxu1 %v9203_v14  ;;  %v9332_v14 = vld [vmem:[%s10506_s12 + $0x164] ss:$8 sps:$4 sm:$0xff]  }
 0x45c   : > { %5369 = vmatpush1.bf16.msra.mxu1 %v9201_v16  ;;  %v9261_v16 = vld [vmem:[#allocation10 + $0xa90] ss:$48 sps:$4 sm:$0xff]  }
 0x45d   : > { %5379 = vmatprep.subr.bf16.mxu1 %v9209_v19  ;;  %v9266_v19 = vld [vmem:[#allocation10 + $0xaf4] ss:$48 sps:$4 sm:$0xff]  }
 0x45f   : > { %5371 = vmatmul.mubr.bf16.vlgmr.msra.gmra.mrb[16].mxu1 %v10905_v45 }
 0x460   : > { %5380 = vmatpush1.bf16.msra.mxu1 %v9207_v20  ;;  %5411 = vmatprep.mubr.bf16.mxu1 %v10909_v17  ;;  %v9330_v20 = vld [vmem:[%s10506_s12 + $0x160] ss:$8 sps:$4 sm:$0xff]  }
 0x461   : > { %5381 = vmatprep.subr.bf16.mxu1 %v9215_v23  ;;  %v9338_v23 = vld [vmem:[%s10506_s12 + $0x174] ss:$8 sps:$4 sm:$0xff]  }
 0x464   : > { %5382 = vmatpush1.bf16.msra.mxu1 %v9213_v25  ;;  %v9264_v25 = vld [vmem:[#allocation10 + $0xaf0] ss:$48 sps:$4 sm:$0xff]  }
 0x465   : > { %5383 = vmatprep.subr.bf16.mxu1 %v9221_v26  ;;  %v9269_v26 = vld [vmem:[#allocation10 + $0xb54] ss:$48 sps:$4 sm:$0xff]  }
 0x468   : > { %5384 = vmatpush1.bf16.msra.mxu1 %v9219_v28  ;;  %v9336_v28 = vld [vmem:[%s10506_s12 + $0x170] ss:$8 sps:$4 sm:$0xff]  }
 0x469   : > { %5385 = vmatprep.subr.bf16.mxu1 %v9227_v29  ;;  %v9344_v29 = vld [vmem:[%s10506_s12 + $0x184] ss:$8 sps:$4 sm:$0xff]  }
 0x46c   : > { %5386 = vmatpush1.bf16.msra.mxu1 %v9225_v30  ;;  %v9267_v30 = vld [vmem:[#allocation10 + $0xb50] ss:$48 sps:$4 sm:$0xff]  }
 0x46d   : > { %5387 = vmatprep.subr.bf16.mxu1 %v9233_v13  ;;  %v9272_v13 = vld [vmem:[#allocation10 + $0xbb4] ss:$48 sps:$4 sm:$0xff]  }
 0x470   : > { %5388 = vmatpush1.bf16.msra.mxu1 %v9231_v27  ;;  %v9342_v27 = vld [vmem:[%s10506_s12 + $0x180] ss:$8 sps:$4 sm:$0xff]  }
 0x471   : > { %5389 = vmatprep.subr.bf16.mxu1 %v9239_v36  ;;  %v9350_v36 = vld [vmem:[%s10506_s12 + $0x194] ss:$8 sps:$4 sm:$0xff]  }
 0x472   : > { %v5249_v40 = vpop.f32.mrb[8].mxu1  ;;  %v10971_v9 = vpop.f32.mrb[8].mxu0 }
 0x473   : > { %v8250_v42 = vadd.f32 %v5249_v40, %v3197_v18  ;;  %v5251_v43 = vpop.f32.mrb[9].mxu1  ;;  %v10973_v46 = vpop.f32.mrb[9].mxu0  ;;  %v9270_v18 = vld [vmem:[#allocation10 + $0xbb0] ss:$48 sps:$4 sm:$0xff]   ;;  %v9273_v40 = vld [vmem:[#allocation10 + $0x18] ss:$48 sps:$4 sm:$0xff]  }
 0x474   : > { %v8251_v47 = vadd.f32 %v5251_v43, %v3201_v37  ;;  %v5253_v48 = vpop.f32.mrb[10].mxu1  ;;  %5390 = vmatpush1.bf16.msra.mxu1 %v9237_v38  ;;  %v5581_v49 = vpop.f32.mrb[10].mxu0  ;;  %v9275_v37 = vld [vmem:[#allocation10 + $0x1c] ss:$48 sps:$4 sm:$0xff]  }
 0x475   : > { %v5254_v21 = vpop.f32.mrb[11].mxu1  ;;  %v5582_v51 = vpop.f32.mrb[11].mxu0  ;;  %5391 = vmatprep.subr.bf16.mxu1 %v9245_v39  ;;  %v5666_v55 = vpack.c.bf16 %v8250_v42, %v8250_v42  ;;  %v9348_v38 = vld [vmem:[%s10506_s12 + $0x190] ss:$8 sps:$4 sm:$0xff]   ;;  %v9356_v39 = vld [vmem:[%s10506_s12 + $0x1a4] ss:$8 sps:$4 sm:$0xff]  }
 0x476   : > { %v5667_v53 = vpack.c.bf16 %v8251_v47, %v8251_v47  ;;  %v9278_v42 = vld [vmem:[#allocation10 + $0x7c] ss:$48 sps:$4 sm:$0xff]   ;;  %v9362_v47 = vld [vmem:[%s10506_s12 + $0x1b4] ss:$8 sps:$4 sm:$0xff]   ;;  %v9368_v21 = vld [vmem:[%s10506_s12 + $0x1c4] ss:$8 sps:$4 sm:$0xff]  }
 0x477   : > { %v9354_v43 = vld [vmem:[%s10506_s12 + $0x1a0] ss:$8 sps:$4 sm:$0xff]   ;;  %v9276_v48 = vld [vmem:[#allocation10 + $0x78] ss:$48 sps:$4 sm:$0xff]  }
 0x478   : > { %5392 = vmatpush1.bf16.msra.mxu1 %v9243_v50  ;;  %6874 = vmatprep.mubr.bf16.mxu0 %v5667_v53  ;;  %v9281_v49 = vld [vmem:[#allocation10 + $0xdc] ss:$48 sps:$4 sm:$0xff]   ;;  %v9279_v51 = vld [vmem:[#allocation10 + $0xd8] ss:$48 sps:$4 sm:$0xff]  }
 0x479   : > { %6875 = vmatmul.mubr.bf16.vlgmr.msra.gmra.mrb[12].mxu0 %v5666_v55  ;;  %5393 = vmatprep.subr.bf16.mxu1 %v9248_v52  ;;  %v9360_v50 = vld [vmem:[%s10506_s12 + $0x1b0] ss:$8 sps:$4 sm:$0xff]   ;;  %v9366_v53 = vld [vmem:[%s10506_s12 + $0x1c0] ss:$8 sps:$4 sm:$0xff]   ;;  %v9282_v55 = vld [vmem:[#allocation10 + $0x138] ss:$48 sps:$4 sm:$0xff]  }
 0x47a   : > { %6884 = vmatpush1.bf16.msra.mxu0 %v9294_v54  ;;  %v9284_v52 = vld [vmem:[#allocation10 + $0x13c] ss:$48 sps:$4 sm:$0xff]   ;;  %v9374_v54 = vld [vmem:[%s10506_s12 + $0x1d4] ss:$8 sps:$4 sm:$0xff]  }
 0x47b   : > { %6885 = vmatprep.subr.bf16.mxu0 %v9302_v35  ;;  %v9287_v35 = vld [vmem:[#allocation10 + $0x19c] ss:$48 sps:$4 sm:$0xff]  }
 0x47c   : > { %5394 = vmatpush1.bf16.msra.mxu1 %v9246_v58  ;;  %v9372_v58 = vld [vmem:[%s10506_s12 + $0x1d0] ss:$8 sps:$4 sm:$0xff]  }
 0x47d   : > { %5395 = vmatprep.subr.bf16.mxu1 %v9251_v10  ;;  %v9380_v10 = vld [vmem:[%s10506_s12 + $0x1e4] ss:$8 sps:$4 sm:$0xff]  }
 0x47e   : > { %6886 = vmatpush1.bf16.msra.mxu0 %v9300_v31  ;;  %v9285_v31 = vld [vmem:[#allocation10 + $0x198] ss:$48 sps:$4 sm:$0xff]  }
 0x47f   : > { %6887 = vmatprep.subr.bf16.mxu0 %v9308_v59  ;;  %v9290_v59 = vld [vmem:[#allocation10 + $0x1fc] ss:$48 sps:$4 sm:$0xff]  }
 0x480   : > { %5396 = vmatpush1.bf16.msra.mxu1 %v9249_v60  ;;  %v9378_v60 = vld [vmem:[%s10506_s12 + $0x1e0] ss:$8 sps:$4 sm:$0xff]  }
 0x481   : > { %5397 = vmatprep.subr.bf16.mxu1 %v9254_v61  ;;  %v9386_v61 = vld [vmem:[%s10506_s12 + $0x1f4] ss:$8 sps:$4 sm:$0xff]  }
 0x482   : > { %6888 = vmatpush1.bf16.msra.mxu0 %v9306_v62  ;;  %v9288_v62 = vld [vmem:[#allocation10 + $0x1f8] ss:$48 sps:$4 sm:$0xff]  }
 0x483   : > { %6889 = vmatprep.subr.bf16.mxu0 %v9314_v63  ;;  %v9293_v63 = vld [vmem:[#allocation10 + $0x25c] ss:$48 sps:$4 sm:$0xff]  }
 0x484   : > { %5398 = vmatpush1.bf16.msra.mxu1 %v9252_v0  ;;  %v9384_v0 = vld [vmem:[%s10506_s12 + $0x1f0] ss:$8 sps:$4 sm:$0xff]  }
 0x485   : > { %5399 = vmatprep.subr.bf16.mxu1 %v9257_v1  ;;  %v9291_v1 = vld [vmem:[#allocation10 + $0x258] ss:$48 sps:$4 sm:$0xff]  }
 0x486   : > { %6890 = vmatpush1.bf16.msra.mxu0 %v9312_v2  ;;  %v9299_v2 = vld [vmem:[#allocation10 + $0x2bc] ss:$48 sps:$4 sm:$0xff]  }
 0x487   : > { %6891 = vmatprep.subr.bf16.mxu0 %v9320_v3  ;;  %v9440_v3 = vld [vmem:[%s10506_s12 + $0x204] ss:$8 sps:$4 sm:$0xff]  }
 0x488   : > { %5400 = vmatpush1.bf16.msra.mxu1 %v9255_v4  ;;  %v9297_v4 = vld [vmem:[#allocation10 + $0x2b8] ss:$48 sps:$4 sm:$0xff]  }
 0x489   : > { %5401 = vmatprep.subr.bf16.mxu1 %v9260_v5  ;;  %v9305_v5 = vld [vmem:[#allocation10 + $0x31c] ss:$48 sps:$4 sm:$0xff]  }
 0x48a   : > { %6892 = vmatpush1.bf16.msra.mxu0 %v9318_v6  ;;  %v9303_v6 = vld [vmem:[#allocation10 + $0x318] ss:$48 sps:$4 sm:$0xff]  }
 0x48b   : > { %6893 = vmatprep.subr.bf16.mxu0 %v9326_v44  ;;  %v9311_v44 = vld [vmem:[#allocation10 + $0x37c] ss:$48 sps:$4 sm:$0xff]  }
 0x48c   : > { %5402 = vmatpush1.bf16.msra.mxu1 %v9258_v8  ;;  %v9309_v8 = vld [vmem:[#allocation10 + $0x378] ss:$48 sps:$4 sm:$0xff]  }
 0x48d   : > { %5403 = vmatprep.subr.bf16.mxu1 %v9263_v11  ;;  %v9317_v11 = vld [vmem:[#allocation10 + $0x3dc] ss:$48 sps:$4 sm:$0xff]  }
 0x48e   : > { %6894 = vmatpush1.bf16.msra.mxu0 %v9324_v12  ;;  %v9315_v12 = vld [vmem:[#allocation10 + $0x3d8] ss:$48 sps:$4 sm:$0xff]  }
 0x48f   : > { %6895 = vmatprep.subr.bf16.mxu0 %v9332_v14  ;;  %v9323_v14 = vld [vmem:[#allocation10 + $0x43c] ss:$48 sps:$4 sm:$0xff]  }
 0x490   : > { %5404 = vmatpush1.bf16.msra.mxu1 %v9261_v16  ;;  %v9321_v16 = vld [vmem:[#allocation10 + $0x438] ss:$48 sps:$4 sm:$0xff]  }
 0x491   : > { %5405 = vmatprep.subr.bf16.mxu1 %v9266_v19  ;;  %v9329_v19 = vld [vmem:[#allocation10 + $0x49c] ss:$48 sps:$4 sm:$0xff]  }
 0x492   : > { %6896 = vmatpush1.bf16.msra.mxu0 %v9330_v20  ;;  %v9327_v20 = vld [vmem:[#allocation10 + $0x498] ss:$48 sps:$4 sm:$0xff]  }
 0x493   : > { %6897 = vmatprep.subr.bf16.mxu0 %v9338_v23  ;;  %v9335_v23 = vld [vmem:[#allocation10 + $0x4fc] ss:$48 sps:$4 sm:$0xff]  }
 0x494   : > { %5406 = vmatpush1.bf16.msra.mxu1 %v9264_v25  ;;  %v9333_v25 = vld [vmem:[#allocation10 + $0x4f8] ss:$48 sps:$4 sm:$0xff]  }
 0x495   : > { %5407 = vmatprep.subr.bf16.mxu1 %v9269_v26  ;;  %v9341_v26 = vld [vmem:[#allocation10 + $0x55c] ss:$48 sps:$4 sm:$0xff]  }
 0x496   : > { %6898 = vmatpush1.bf16.msra.mxu0 %v9336_v28  ;;  %v9339_v28 = vld [vmem:[#allocation10 + $0x558] ss:$48 sps:$4 sm:$0xff]  }
 0x497   : > { %6899 = vmatprep.subr.bf16.mxu0 %v9344_v29  ;;  %v9347_v29 = vld [vmem:[#allocation10 + $0x5bc] ss:$48 sps:$4 sm:$0xff]  }
 0x498   : > { %5408 = vmatpush1.bf16.msra.mxu1 %v9267_v30  ;;  %v9345_v30 = vld [vmem:[#allocation10 + $0x5b8] ss:$48 sps:$4 sm:$0xff]  }
 0x499   : > { %5409 = vmatprep.subr.bf16.mxu1 %v9272_v13  ;;  %v9353_v13 = vld [vmem:[#allocation10 + $0x61c] ss:$48 sps:$4 sm:$0xff]  }
 0x49a   : > { %6900 = vmatpush1.bf16.msra.mxu0 %v9342_v27  ;;  %v9351_v27 = vld [vmem:[#allocation10 + $0x618] ss:$48 sps:$4 sm:$0xff]  }
 0x49b   : > { %6901 = vmatprep.subr.bf16.mxu0 %v9350_v36  ;;  %v9359_v36 = vld [vmem:[#allocation10 + $0x67c] ss:$48 sps:$4 sm:$0xff]  }
 0x49c   : > { %5410 = vmatpush1.bf16.msra.mxu1 %v9270_v18  ;;  %v9357_v18 = vld [vmem:[#allocation10 + $0x678] ss:$48 sps:$4 sm:$0xff]  }
 0x49d   : > { %5420 = vmatprep.subr.bf16.mxu1 %v9275_v37  ;;  %v9365_v37 = vld [vmem:[#allocation10 + $0x6dc] ss:$48 sps:$4 sm:$0xff]  }
 0x49e   : > { %6902 = vmatpush1.bf16.msra.mxu0 %v9348_v38  ;;  %v9363_v38 = vld [vmem:[#allocation10 + $0x6d8] ss:$48 sps:$4 sm:$0xff]  }
 0x49f   : > { %5412 = vmatmul.mubr.bf16.vlgmr.msra.gmra.mrb[16].mxu1 %v10921_v56  ;;  %6903 = vmatprep.subr.bf16.mxu0 %v9356_v39  ;;  %v9371_v39 = vld [vmem:[#allocation10 + $0x73c] ss:$48 sps:$4 sm:$0xff]  }
 0x4a0   : > { %5421 = vmatpush1.bf16.msra.mxu1 %v9273_v40  ;;  %5452 = vmatprep.mubr.bf16.mxu1 %v10903_v41  ;;  %v9369_v40 = vld [vmem:[#allocation10 + $0x738] ss:$48 sps:$4 sm:$0xff]  }
 0x4a1   : > { %5422 = vmatprep.subr.bf16.mxu1 %v9278_v42  ;;  %v9377_v42 = vld [vmem:[#allocation10 + $0x79c] ss:$48 sps:$4 sm:$0xff]  }
 0x4a2   : > { %6904 = vmatpush1.bf16.msra.mxu0 %v9354_v43  ;;  %v9375_v43 = vld [vmem:[#allocation10 + $0x798] ss:$48 sps:$4 sm:$0xff]  }
 0x4a3   : > { %6905 = vmatprep.subr.bf16.mxu0 %v9362_v47  ;;  %v9383_v47 = vld [vmem:[#allocation10 + $0x7fc] ss:$48 sps:$4 sm:$0xff]  }
 0x4a4   : > { %5423 = vmatpush1.bf16.msra.mxu1 %v9276_v48  ;;  %v3205_v48 = vrot.slane %v10965_v7, %v10916_v33 }
 0x4a5   : > { %5424 = vmatprep.subr.bf16.mxu1 %v9281_v49  ;;  %v3209_v49 = vrot.slane %v10965_v7, %v10895_v57 }
 0x4a6   : > { %6906 = vmatpush1.bf16.msra.mxu0 %v9360_v50  ;;  %v9381_v50 = vld [vmem:[#allocation10 + $0x7f8] ss:$48 sps:$4 sm:$0xff]  }
 0x4a7   : > { %6907 = vmatprep.subr.bf16.mxu0 %v9368_v21  ;;  %v9389_v21 = vld [vmem:[#allocation10 + $0x85c] ss:$48 sps:$4 sm:$0xff]  }
 0x4a8   : > { %5425 = vmatpush1.bf16.msra.mxu1 %v9279_v51 }
 0x4a9   : > { %5426 = vmatprep.subr.bf16.mxu1 %v9284_v52 }
 0x4aa   : > { %6908 = vmatpush1.bf16.msra.mxu0 %v9366_v53 }
 0x4ab   : > { %6909 = vmatprep.subr.bf16.mxu0 %v9374_v54 }
 0x4ac   : > { %5427 = vmatpush1.bf16.msra.mxu1 %v9282_v55 }
 0x4ad   : > { %5428 = vmatprep.subr.bf16.mxu1 %v9287_v35  ;;  %v9387_v35 = vld [vmem:[#allocation10 + $0x858] ss:$48 sps:$4 sm:$0xff]  }
 0x4ae   : > { %6910 = vmatpush1.bf16.msra.mxu0 %v9372_v58 }
 0x4af   : > { %6911 = vmatprep.subr.bf16.mxu0 %v9380_v10  ;;  %v9392_v10 = vld [vmem:[#allocation10 + $0x8bc] ss:$48 sps:$4 sm:$0xff]  }
 0x4b0   : > { %5429 = vmatpush1.bf16.msra.mxu1 %v9285_v31 }
 0x4b1   : > { %5430 = vmatprep.subr.bf16.mxu1 %v9290_v59  ;;  %v9438_v59 = vld [vmem:[%s10506_s12 + $0x200] ss:$8 sps:$4 sm:$0xff]  }
 0x4b2   : > { %6912 = vmatpush1.bf16.msra.mxu0 %v9378_v60 }
 0x4b3   : > { %6913 = vmatprep.subr.bf16.mxu0 %v9386_v61  ;;  %v9446_v61 = vld [vmem:[%s10506_s12 + $0x214] ss:$8 sps:$4 sm:$0xff]  }
 0x4b4   : > { %5431 = vmatpush1.bf16.msra.mxu1 %v9288_v62  ;;  %v9390_v62 = vld [vmem:[#allocation10 + $0x8b8] ss:$48 sps:$4 sm:$0xff]  }
 0x4b5   : > { %5432 = vmatprep.subr.bf16.mxu1 %v9293_v63  ;;  %v9395_v63 = vld [vmem:[#allocation10 + $0x91c] ss:$48 sps:$4 sm:$0xff]  }
 0x4b6   : > { %6914 = vmatpush1.bf16.msra.mxu0 %v9384_v0  ;;  %v9444_v0 = vld [vmem:[%s10506_s12 + $0x210] ss:$8 sps:$4 sm:$0xff]  }
 0x4b7   : > { %6924 = vmatprep.subr.bf16.mxu0 %v9440_v3  ;;  %v9398_v3 = vld [vmem:[#allocation10 + $0x97c] ss:$48 sps:$4 sm:$0xff]  }
 0x4b8   : > { %5433 = vmatpush1.bf16.msra.mxu1 %v9291_v1  ;;  %v9452_v1 = vld [vmem:[%s10506_s12 + $0x224] ss:$8 sps:$4 sm:$0xff]  }
 0x4b9   : > { %5434 = vmatprep.subr.bf16.mxu1 %v9299_v2  ;;  %v9393_v2 = vld [vmem:[#allocation10 + $0x918] ss:$48 sps:$4 sm:$0xff]  }
 0x4bc   : > { %5435 = vmatpush1.bf16.msra.mxu1 %v9297_v4  ;;  %v9450_v4 = vld [vmem:[%s10506_s12 + $0x220] ss:$8 sps:$4 sm:$0xff]  }
 0x4bd   : > { %5436 = vmatprep.subr.bf16.mxu1 %v9305_v5  ;;  %v9458_v5 = vld [vmem:[%s10506_s12 + $0x234] ss:$8 sps:$4 sm:$0xff]  }
 0x4c0   : > { %5437 = vmatpush1.bf16.msra.mxu1 %v9303_v6  ;;  %v9396_v6 = vld [vmem:[#allocation10 + $0x978] ss:$48 sps:$4 sm:$0xff]  }
 0x4c1   : > { %5438 = vmatprep.subr.bf16.mxu1 %v9311_v44  ;;  %v9401_v44 = vld [vmem:[#allocation10 + $0x9dc] ss:$48 sps:$4 sm:$0xff]  }
 0x4c4   : > { %5439 = vmatpush1.bf16.msra.mxu1 %v9309_v8  ;;  %v9456_v8 = vld [vmem:[%s10506_s12 + $0x230] ss:$8 sps:$4 sm:$0xff]  }
 0x4c5   : > { %5440 = vmatprep.subr.bf16.mxu1 %v9317_v11  ;;  %v9464_v11 = vld [vmem:[%s10506_s12 + $0x244] ss:$8 sps:$4 sm:$0xff]  }
 0x4c8   : > { %5441 = vmatpush1.bf16.msra.mxu1 %v9315_v12  ;;  %v9399_v12 = vld [vmem:[#allocation10 + $0x9d8] ss:$48 sps:$4 sm:$0xff]  }
 0x4c9   : > { %5442 = vmatprep.subr.bf16.mxu1 %v9323_v14  ;;  %v9404_v14 = vld [vmem:[#allocation10 + $0xa3c] ss:$48 sps:$4 sm:$0xff]  }
 0x4cc   : > { %5443 = vmatpush1.bf16.msra.mxu1 %v9321_v16  ;;  %v9462_v16 = vld [vmem:[%s10506_s12 + $0x240] ss:$8 sps:$4 sm:$0xff]  }
 0x4cd   : > { %5444 = vmatprep.subr.bf16.mxu1 %v9329_v19  ;;  %v9470_v19 = vld [vmem:[%s10506_s12 + $0x254] ss:$8 sps:$4 sm:$0xff]  }
 0x4d0   : > { %5445 = vmatpush1.bf16.msra.mxu1 %v9327_v20  ;;  %v9402_v20 = vld [vmem:[#allocation10 + $0xa38] ss:$48 sps:$4 sm:$0xff]  }
 0x4d1   : > { %5446 = vmatprep.subr.bf16.mxu1 %v9335_v23  ;;  %v9407_v23 = vld [vmem:[#allocation10 + $0xa9c] ss:$48 sps:$4 sm:$0xff]  }
 0x4d4   : > { %5447 = vmatpush1.bf16.msra.mxu1 %v9333_v25  ;;  %v9468_v25 = vld [vmem:[%s10506_s12 + $0x250] ss:$8 sps:$4 sm:$0xff]  }
 0x4d5   : > { %5448 = vmatprep.subr.bf16.mxu1 %v9341_v26  ;;  %v9476_v26 = vld [vmem:[%s10506_s12 + $0x264] ss:$8 sps:$4 sm:$0xff]  }
 0x4d8   : > { %5449 = vmatpush1.bf16.msra.mxu1 %v9339_v28  ;;  %v9405_v28 = vld [vmem:[#allocation10 + $0xa98] ss:$48 sps:$4 sm:$0xff]  }
 0x4d9   : > { %5450 = vmatprep.subr.bf16.mxu1 %v9347_v29  ;;  %v9410_v29 = vld [vmem:[#allocation10 + $0xafc] ss:$48 sps:$4 sm:$0xff]  }
 0x4dc   : > { %5451 = vmatpush1.bf16.msra.mxu1 %v9345_v30  ;;  %v9474_v30 = vld [vmem:[%s10506_s12 + $0x260] ss:$8 sps:$4 sm:$0xff]  }
 0x4dd   : > { %5461 = vmatprep.subr.bf16.mxu1 %v9353_v13  ;;  %v9482_v13 = vld [vmem:[%s10506_s12 + $0x274] ss:$8 sps:$4 sm:$0xff]  }
 0x4df   : > { %5453 = vmatmul.mubr.bf16.vlgmr.msra.gmra.mrb[20].mxu1 %v10905_v45 }
 0x4e0   : > { %5462 = vmatpush1.bf16.msra.mxu1 %v9351_v27  ;;  %5493 = vmatprep.mubr.bf16.mxu1 %v10909_v17  ;;  %v9408_v27 = vld [vmem:[#allocation10 + $0xaf8] ss:$48 sps:$4 sm:$0xff]  }
 0x4e1   : > { %5463 = vmatprep.subr.bf16.mxu1 %v9359_v36  ;;  %v9413_v36 = vld [vmem:[#allocation10 + $0xb5c] ss:$48 sps:$4 sm:$0xff]  }
 0x4e4   : > { %5464 = vmatpush1.bf16.msra.mxu1 %v9357_v18  ;;  %v9480_v18 = vld [vmem:[%s10506_s12 + $0x270] ss:$8 sps:$4 sm:$0xff]  }
 0x4e5   : > { %5465 = vmatprep.subr.bf16.mxu1 %v9365_v37  ;;  %v9488_v37 = vld [vmem:[%s10506_s12 + $0x284] ss:$8 sps:$4 sm:$0xff]  }
 0x4e8   : > { %5466 = vmatpush1.bf16.msra.mxu1 %v9363_v38  ;;  %v9411_v38 = vld [vmem:[#allocation10 + $0xb58] ss:$48 sps:$4 sm:$0xff]  }
 0x4e9   : > { %5467 = vmatprep.subr.bf16.mxu1 %v9371_v39  ;;  %v9416_v39 = vld [vmem:[#allocation10 + $0xbbc] ss:$48 sps:$4 sm:$0xff]  }
 0x4ec   : > { %5468 = vmatpush1.bf16.msra.mxu1 %v9369_v40  ;;  %v9486_v40 = vld [vmem:[%s10506_s12 + $0x280] ss:$8 sps:$4 sm:$0xff]  }
 0x4ed   : > { %5469 = vmatprep.subr.bf16.mxu1 %v9377_v42  ;;  %v9494_v42 = vld [vmem:[%s10506_s12 + $0x294] ss:$8 sps:$4 sm:$0xff]  }
 0x4f0   : > { %5470 = vmatpush1.bf16.msra.mxu1 %v9375_v43  ;;  %v9414_v43 = vld [vmem:[#allocation10 + $0xbb8] ss:$48 sps:$4 sm:$0xff]  }
 0x4f1   : > { %5471 = vmatprep.subr.bf16.mxu1 %v9383_v47  ;;  %v9419_v47 = vld [vmem:[#allocation10 + $0x2c] ss:$48 sps:$4 sm:$0xff]  }
 0x4f2   : > { %v5331_v51 = vpop.f32.mrb[12].mxu1 }
 0x4f3   : > { %v8252_v52 = vadd.f32 %v5331_v51, %v3205_v48  ;;  %v5333_v53 = vpop.f32.mrb[13].mxu1  ;;  %v9492_v48 = vld [vmem:[%s10506_s12 + $0x290] ss:$8 sps:$4 sm:$0xff]   ;;  %v9498_v51 = vld [vmem:[%s10506_s12 + $0x2a0] ss:$8 sps:$4 sm:$0xff]  }
 0x4f4   : > { %v8253_v54 = vadd.f32 %v5333_v53, %v3209_v49  ;;  %v5335_v55 = vpop.f32.mrb[14].mxu1  ;;  %5472 = vmatpush1.bf16.msra.mxu1 %v9381_v50  ;;  %v9500_v49 = vld [vmem:[%s10506_s12 + $0x2a4] ss:$8 sps:$4 sm:$0xff]  }
 0x4f5   : > { %v5336_v58 = vpop.f32.mrb[15].mxu1  ;;  %5473 = vmatprep.subr.bf16.mxu1 %v9389_v21  ;;  %v5668_v60 = vpack.c.bf16 %v8252_v52, %v8252_v52  ;;  %v9417_v50 = vld [vmem:[#allocation10 + $0x28] ss:$48 sps:$4 sm:$0xff]   ;;  %v9422_v21 = vld [vmem:[#allocation10 + $0x8c] ss:$48 sps:$4 sm:$0xff]  }
 0x4f6   : > { %v5669_v31 = vpack.c.bf16 %v8253_v54, %v8253_v54  ;;  %v9506_v52 = vld [vmem:[%s10506_s12 + $0x2b4] ss:$8 sps:$4 sm:$0xff]   ;;  %v9425_v54 = vld [vmem:[#allocation10 + $0xec] ss:$48 sps:$4 sm:$0xff]  }
 0x4f7   : > { %v9420_v53 = vld [vmem:[#allocation10 + $0x88] ss:$48 sps:$4 sm:$0xff]   ;;  %v9504_v55 = vld [vmem:[%s10506_s12 + $0x2b0] ss:$8 sps:$4 sm:$0xff]  }
 0x4f8   : > { %5474 = vmatpush1.bf16.msra.mxu1 %v9387_v35  ;;  %6915 = vmatprep.mubr.bf16.mxu0 %v5669_v31  ;;  %v9512_v35 = vld [vmem:[%s10506_s12 + $0x2c4] ss:$8 sps:$4 sm:$0xff]   ;;  %v9510_v31 = vld [vmem:[%s10506_s12 + $0x2c0] ss:$8 sps:$4 sm:$0xff]  }
 0x4f9   : > { %6916 = vmatmul.mubr.bf16.vlgmr.msra.gmra.mrb[12].mxu0 %v5668_v60  ;;  %5475 = vmatprep.subr.bf16.mxu1 %v9392_v10  ;;  %v9423_v58 = vld [vmem:[#allocation10 + $0xe8] ss:$48 sps:$4 sm:$0xff]   ;;  %v9428_v10 = vld [vmem:[#allocation10 + $0x14c] ss:$48 sps:$4 sm:$0xff]  }
 0x4fa   : > { %6925 = vmatpush1.bf16.msra.mxu0 %v9438_v59  ;;  %v9518_v59 = vld [vmem:[%s10506_s12 + $0x2d4] ss:$8 sps:$4 sm:$0xff]   ;;  %v9431_v60 = vld [vmem:[#allocation10 + $0x1ac] ss:$48 sps:$4 sm:$0xff]  }
 0x4fb   : > { %6926 = vmatprep.subr.bf16.mxu0 %v9446_v61  ;;  %v9516_v61 = vld [vmem:[%s10506_s12 + $0x2d0] ss:$8 sps:$4 sm:$0xff]  }
 0x4fc   : > { %5476 = vmatpush1.bf16.msra.mxu1 %v9390_v62  ;;  %v9524_v62 = vld [vmem:[%s10506_s12 + $0x2e4] ss:$8 sps:$4 sm:$0xff]  }
 0x4fd   : > { %5477 = vmatprep.subr.bf16.mxu1 %v9395_v63  ;;  %v9429_v63 = vld [vmem:[#allocation10 + $0x1a8] ss:$48 sps:$4 sm:$0xff]  }
 0x4fe   : > { %6927 = vmatpush1.bf16.msra.mxu0 %v9444_v0  ;;  %v9434_v0 = vld [vmem:[#allocation10 + $0x20c] ss:$48 sps:$4 sm:$0xff]  }
 0x4ff   : > { %6928 = vmatprep.subr.bf16.mxu0 %v9452_v1  ;;  %v9522_v1 = vld [vmem:[%s10506_s12 + $0x2e0] ss:$8 sps:$4 sm:$0xff]  }
 0x500   : > { %5478 = vmatpush1.bf16.msra.mxu1 %v9393_v2  ;;  %v9530_v2 = vld [vmem:[%s10506_s12 + $0x2f4] ss:$8 sps:$4 sm:$0xff]  }
 0x501   : > { %5479 = vmatprep.subr.bf16.mxu1 %v9398_v3  ;;  %v9432_v3 = vld [vmem:[#allocation10 + $0x208] ss:$48 sps:$4 sm:$0xff]  }
 0x502   : > { %6929 = vmatpush1.bf16.msra.mxu0 %v9450_v4  ;;  %v9437_v4 = vld [vmem:[#allocation10 + $0x26c] ss:$48 sps:$4 sm:$0xff]  }
 0x503   : > { %6930 = vmatprep.subr.bf16.mxu0 %v9458_v5  ;;  %v9528_v5 = vld [vmem:[%s10506_s12 + $0x2f0] ss:$8 sps:$4 sm:$0xff]  }
 0x504   : > { %5480 = vmatpush1.bf16.msra.mxu1 %v9396_v6  ;;  %v9563_v6 = vld [vmem:[%s10506_s12 + $0x304] ss:$8 sps:$4 sm:$0xff]  }
 0x505   : > { %5481 = vmatprep.subr.bf16.mxu1 %v9401_v44  ;;  %v9435_v44 = vld [vmem:[#allocation10 + $0x268] ss:$48 sps:$4 sm:$0xff]  }
 0x506   : > { %6931 = vmatpush1.bf16.msra.mxu0 %v9456_v8  ;;  %v9443_v8 = vld [vmem:[#allocation10 + $0x2cc] ss:$48 sps:$4 sm:$0xff]  }
 0x507   : > { %6932 = vmatprep.subr.bf16.mxu0 %v9464_v11  ;;  %v9441_v11 = vld [vmem:[#allocation10 + $0x2c8] ss:$48 sps:$4 sm:$0xff]  }
 0x508   : > { %5482 = vmatpush1.bf16.msra.mxu1 %v9399_v12  ;;  %v9449_v12 = vld [vmem:[#allocation10 + $0x32c] ss:$48 sps:$4 sm:$0xff]  }
 0x509   : > { %5483 = vmatprep.subr.bf16.mxu1 %v9404_v14  ;;  %v9447_v14 = vld [vmem:[#allocation10 + $0x328] ss:$48 sps:$4 sm:$0xff]  }
 0x50a   : > { %6933 = vmatpush1.bf16.msra.mxu0 %v9462_v16  ;;  %v9455_v16 = vld [vmem:[#allocation10 + $0x38c] ss:$48 sps:$4 sm:$0xff]  }
 0x50b   : > { %6934 = vmatprep.subr.bf16.mxu0 %v9470_v19  ;;  %v9453_v19 = vld [vmem:[#allocation10 + $0x388] ss:$48 sps:$4 sm:$0xff]  }
 0x50c   : > { %5484 = vmatpush1.bf16.msra.mxu1 %v9402_v20  ;;  %v9461_v20 = vld [vmem:[#allocation10 + $0x3ec] ss:$48 sps:$4 sm:$0xff]  }
 0x50d   : > { %5485 = vmatprep.subr.bf16.mxu1 %v9407_v23  ;;  %v9459_v23 = vld [vmem:[#allocation10 + $0x3e8] ss:$48 sps:$4 sm:$0xff]  }
 0x50e   : > { %6935 = vmatpush1.bf16.msra.mxu0 %v9468_v25  ;;  %v9467_v25 = vld [vmem:[#allocation10 + $0x44c] ss:$48 sps:$4 sm:$0xff]  }
 0x50f   : > { %6936 = vmatprep.subr.bf16.mxu0 %v9476_v26  ;;  %v9465_v26 = vld [vmem:[#allocation10 + $0x448] ss:$48 sps:$4 sm:$0xff]  }
 0x510   : > { %5486 = vmatpush1.bf16.msra.mxu1 %v9405_v28  ;;  %v9473_v28 = vld [vmem:[#allocation10 + $0x4ac] ss:$48 sps:$4 sm:$0xff]  }
 0x511   : > { %5487 = vmatprep.subr.bf16.mxu1 %v9410_v29  ;;  %v9471_v29 = vld [vmem:[#allocation10 + $0x4a8] ss:$48 sps:$4 sm:$0xff]  }
 0x512   : > { %6937 = vmatpush1.bf16.msra.mxu0 %v9474_v30  ;;  %v9479_v30 = vld [vmem:[#allocation10 + $0x50c] ss:$48 sps:$4 sm:$0xff]  }
 0x513   : > { %6938 = vmatprep.subr.bf16.mxu0 %v9482_v13  ;;  %v9477_v13 = vld [vmem:[#allocation10 + $0x508] ss:$48 sps:$4 sm:$0xff]  }
 0x514   : > { %5488 = vmatpush1.bf16.msra.mxu1 %v9408_v27  ;;  %v9485_v27 = vld [vmem:[#allocation10 + $0x56c] ss:$48 sps:$4 sm:$0xff]  }
 0x515   : > { %5489 = vmatprep.subr.bf16.mxu1 %v9413_v36  ;;  %v9483_v36 = vld [vmem:[#allocation10 + $0x568] ss:$48 sps:$4 sm:$0xff]  }
 0x516   : > { %6939 = vmatpush1.bf16.msra.mxu0 %v9480_v18  ;;  %v9491_v18 = vld [vmem:[#allocation10 + $0x5cc] ss:$48 sps:$4 sm:$0xff]  }
 0x517   : > { %6940 = vmatprep.subr.bf16.mxu0 %v9488_v37  ;;  %v9489_v37 = vld [vmem:[#allocation10 + $0x5c8] ss:$48 sps:$4 sm:$0xff]  }
 0x518   : > { %5490 = vmatpush1.bf16.msra.mxu1 %v9411_v38  ;;  %v9497_v38 = vld [vmem:[#allocation10 + $0x62c] ss:$48 sps:$4 sm:$0xff]  }
 0x519   : > { %5491 = vmatprep.subr.bf16.mxu1 %v9416_v39  ;;  %v9495_v39 = vld [vmem:[#allocation10 + $0x628] ss:$48 sps:$4 sm:$0xff]  }
 0x51a   : > { %6941 = vmatpush1.bf16.msra.mxu0 %v9486_v40  ;;  %v9503_v40 = vld [vmem:[#allocation10 + $0x68c] ss:$48 sps:$4 sm:$0xff]  }
 0x51b   : > { %6942 = vmatprep.subr.bf16.mxu0 %v9494_v42  ;;  %v9501_v42 = vld [vmem:[#allocation10 + $0x688] ss:$48 sps:$4 sm:$0xff]  }
 0x51c   : > { %5492 = vmatpush1.bf16.msra.mxu1 %v9414_v43  ;;  %v9509_v43 = vld [vmem:[#allocation10 + $0x6ec] ss:$48 sps:$4 sm:$0xff]  }
 0x51d   : > { %5584 = vmatprep.subr.bf16.mxu1 %v9419_v47  ;;  %v9507_v47 = vld [vmem:[#allocation10 + $0x6e8] ss:$48 sps:$4 sm:$0xff]  }
 0x51e   : > { %6943 = vmatpush1.bf16.msra.mxu0 %v9492_v48  ;;  %v9515_v48 = vld [vmem:[#allocation10 + $0x74c] ss:$48 sps:$4 sm:$0xff]  }
 0x51f   : > { %5494 = vmatmul.mubr.bf16.vlgmr.msra.gmra.mrb[20].mxu1 %v10921_v56  ;;  %6944 = vmatprep.subr.bf16.mxu0 %v9500_v49  ;;  %v9513_v49 = vld [vmem:[#allocation10 + $0x748] ss:$48 sps:$4 sm:$0xff]  }
 0x520   : > { %5585 = vmatpush1.bf16.msra.mxu1 %v9417_v50  ;;  %5616 = vmatprep.mubr.bf16.mxu1 %v10903_v41  ;;  %v9426_v41 = vld [vmem:[#allocation10 + $0x148] ss:$48 sps:$4 sm:$0xff]   ;;  %v9521_v50 = vld [vmem:[#allocation10 + $0x7ac] ss:$48 sps:$4 sm:$0xff]  }
 0x521   : > { %5586 = vmatprep.subr.bf16.mxu1 %v9422_v21  ;;  %v3212_v21 = vsub.s32 4, %v10529_v15 }
 0x522   : > { %6945 = vmatpush1.bf16.msra.mxu0 %v9498_v51  ;;  %v9519_v51 = vld [vmem:[#allocation10 + $0x7a8] ss:$48 sps:$4 sm:$0xff]  }
 0x523   : > { %6946 = vmatprep.subr.bf16.mxu0 %v9506_v52  ;;  %v9527_v52 = vld [vmem:[#allocation10 + $0x80c] ss:$48 sps:$4 sm:$0xff]  }
 0x524   : > { %5587 = vmatpush1.bf16.msra.mxu1 %v9420_v53 }
 0x525   : > { %5588 = vmatprep.subr.bf16.mxu1 %v9425_v54  ;;  %v9525_v54 = vld [vmem:[#allocation10 + $0x808] ss:$48 sps:$4 sm:$0xff]  }
 0x526   : > { %6947 = vmatpush1.bf16.msra.mxu0 %v9504_v55  ;;  %v9533_v55 = vld [vmem:[#allocation10 + $0x86c] ss:$48 sps:$4 sm:$0xff]  }
 0x527   : > { %6948 = vmatprep.subr.bf16.mxu0 %v9512_v35 }
 0x528   : > { %5589 = vmatpush1.bf16.msra.mxu1 %v9423_v58 }
 0x529   : > { %5590 = vmatprep.subr.bf16.mxu1 %v9428_v10 }
 0x52a   : > { %6949 = vmatpush1.bf16.msra.mxu0 %v9510_v31 }
 0x52b   : > { %6950 = vmatprep.subr.bf16.mxu0 %v9518_v59 }
 0x52c   : > { %5591 = vmatpush1.bf16.msra.mxu1 %v9426_v41  ;;  %v9531_v41 = vld [vmem:[#allocation10 + $0x868] ss:$48 sps:$4 sm:$0xff]  }
 0x52d   : > { %5592 = vmatprep.subr.bf16.mxu1 %v9431_v60 }
 0x52e   : > { %6951 = vmatpush1.bf16.msra.mxu0 %v9516_v61  ;;  %v9536_v61 = vld [vmem:[#allocation10 + $0x8cc] ss:$48 sps:$4 sm:$0xff]  }
 0x52f   : > { %6952 = vmatprep.subr.bf16.mxu0 %v9524_v62 }
 0x530   : > { %5593 = vmatpush1.bf16.msra.mxu1 %v9429_v63  ;;  %v9561_v63 = vld [vmem:[%s10506_s12 + $0x300] ss:$8 sps:$4 sm:$0xff]  }
 0x531   : > { %5594 = vmatprep.subr.bf16.mxu1 %v9434_v0 }
 0x532   : > { %6953 = vmatpush1.bf16.msra.mxu0 %v9522_v1  ;;  %v9534_v1 = vld [vmem:[#allocation10 + $0x8c8] ss:$48 sps:$4 sm:$0xff]  }
 0x533   : > { %6954 = vmatprep.subr.bf16.mxu0 %v9530_v2  ;;  %v9539_v2 = vld [vmem:[#allocation10 + $0x92c] ss:$48 sps:$4 sm:$0xff]  }
 0x534   : > { %5595 = vmatpush1.bf16.msra.mxu1 %v9432_v3  ;;  %v9564_v3 = vld [vmem:[%s10506_s12 + $0x310] ss:$8 sps:$4 sm:$0xff]  }
 0x535   : > { %5596 = vmatprep.subr.bf16.mxu1 %v9437_v4  ;;  %v9569_v4 = vld [vmem:[%s10506_s12 + $0x324] ss:$8 sps:$4 sm:$0xff]  }
 0x536   : > { %6955 = vmatpush1.bf16.msra.mxu0 %v9528_v5  ;;  %v9537_v5 = vld [vmem:[#allocation10 + $0x928] ss:$48 sps:$4 sm:$0xff]  }
 0x537   : > { %6965 = vmatprep.subr.bf16.mxu0 %v9563_v6  ;;  %v9542_v6 = vld [vmem:[#allocation10 + $0x98c] ss:$48 sps:$4 sm:$0xff]  }
 0x538   : > { %5597 = vmatpush1.bf16.msra.mxu1 %v9435_v44  ;;  %v9567_v44 = vld [vmem:[%s10506_s12 + $0x320] ss:$8 sps:$4 sm:$0xff]  }
 0x539   : > { %5598 = vmatprep.subr.bf16.mxu1 %v9443_v8  ;;  %v9572_v8 = vld [vmem:[%s10506_s12 + $0x334] ss:$8 sps:$4 sm:$0xff]  }
 0x53c   : > { %5599 = vmatpush1.bf16.msra.mxu1 %v9441_v11  ;;  %v9540_v11 = vld [vmem:[#allocation10 + $0x988] ss:$48 sps:$4 sm:$0xff]  }
 0x53d   : > { %5600 = vmatprep.subr.bf16.mxu1 %v9449_v12  ;;  %v9545_v12 = vld [vmem:[#allocation10 + $0x9ec] ss:$48 sps:$4 sm:$0xff]  }
 0x540   : > { %5601 = vmatpush1.bf16.msra.mxu1 %v9447_v14  ;;  %v9570_v14 = vld [vmem:[%s10506_s12 + $0x330] ss:$8 sps:$4 sm:$0xff]  }
 0x541   : > { %5602 = vmatprep.subr.bf16.mxu1 %v9455_v16  ;;  %v9575_v16 = vld [vmem:[%s10506_s12 + $0x344] ss:$8 sps:$4 sm:$0xff]  }
 0x544   : > { %5603 = vmatpush1.bf16.msra.mxu1 %v9453_v19  ;;  %v9543_v19 = vld [vmem:[#allocation10 + $0x9e8] ss:$48 sps:$4 sm:$0xff]  }
 0x545   : > { %5604 = vmatprep.subr.bf16.mxu1 %v9461_v20  ;;  %v9548_v20 = vld [vmem:[#allocation10 + $0xa4c] ss:$48 sps:$4 sm:$0xff]  }
 0x548   : > { %5605 = vmatpush1.bf16.msra.mxu1 %v9459_v23  ;;  %v9573_v23 = vld [vmem:[%s10506_s12 + $0x340] ss:$8 sps:$4 sm:$0xff]  }
 0x549   : > { %5606 = vmatprep.subr.bf16.mxu1 %v9467_v25  ;;  %v9578_v25 = vld [vmem:[%s10506_s12 + $0x354] ss:$8 sps:$4 sm:$0xff]  }
 0x54c   : > { %5607 = vmatpush1.bf16.msra.mxu1 %v9465_v26  ;;  %v9546_v26 = vld [vmem:[#allocation10 + $0xa48] ss:$48 sps:$4 sm:$0xff]  }
 0x54d   : > { %5608 = vmatprep.subr.bf16.mxu1 %v9473_v28  ;;  %v9551_v28 = vld [vmem:[#allocation10 + $0xaac] ss:$48 sps:$4 sm:$0xff]  }
 0x550   : > { %5609 = vmatpush1.bf16.msra.mxu1 %v9471_v29  ;;  %v9576_v29 = vld [vmem:[%s10506_s12 + $0x350] ss:$8 sps:$4 sm:$0xff]  }
 0x551   : > { %5610 = vmatprep.subr.bf16.mxu1 %v9479_v30  ;;  %v9581_v30 = vld [vmem:[%s10506_s12 + $0x364] ss:$8 sps:$4 sm:$0xff]  }
 0x554   : > { %5611 = vmatpush1.bf16.msra.mxu1 %v9477_v13  ;;  %v9549_v13 = vld [vmem:[#allocation10 + $0xaa8] ss:$48 sps:$4 sm:$0xff]  }
 0x555   : > { %5612 = vmatprep.subr.bf16.mxu1 %v9485_v27  ;;  %v9554_v27 = vld [vmem:[#allocation10 + $0xb0c] ss:$48 sps:$4 sm:$0xff]  }
 0x558   : > { %5613 = vmatpush1.bf16.msra.mxu1 %v9483_v36  ;;  %v9579_v36 = vld [vmem:[%s10506_s12 + $0x360] ss:$8 sps:$4 sm:$0xff]  }
 0x559   : > { %5614 = vmatprep.subr.bf16.mxu1 %v9491_v18  ;;  %v9584_v18 = vld [vmem:[%s10506_s12 + $0x374] ss:$8 sps:$4 sm:$0xff]  }
 0x55c   : > { %5615 = vmatpush1.bf16.msra.mxu1 %v9489_v37  ;;  %v9552_v37 = vld [vmem:[#allocation10 + $0xb08] ss:$48 sps:$4 sm:$0xff]  }
 0x55d   : > { %5625 = vmatprep.subr.bf16.mxu1 %v9497_v38  ;;  %v9557_v38 = vld [vmem:[#allocation10 + $0xb6c] ss:$48 sps:$4 sm:$0xff]  }
 0x55f   : > { %5617 = vmatmul.mubr.bf16.vlgmr.msra.gmra.mrb[24].mxu1 %v10905_v45  ;;  %v3216_v45 = vsub.s32 5, %v10529_v15 }
 0x560   : > { %5626 = vmatpush1.bf16.msra.mxu1 %v9495_v39  ;;  %5657 = vmatprep.mubr.bf16.mxu1 %v10909_v17  ;;  %v3213_v17 = vrot.slane %v10965_v7, %v3212_v21  ;;  %v9582_v39 = vld [vmem:[%s10506_s12 + $0x370] ss:$8 sps:$4 sm:$0xff]   ;;  %v9593_v21 = vld [vmem:[%s10506_s12 + $0x3a4] ss:$8 sps:$4 sm:$0xff]  }
 0x561   : > { %5627 = vmatprep.subr.bf16.mxu1 %v9503_v40  ;;  %v3217_v53 = vrot.slane %v10965_v7, %v3216_v45  ;;  %v9566_v7 = vld [vmem:[%s10506_s12 + $0x314] ss:$8 sps:$4 sm:$0xff]   ;;  %v9587_v40 = vld [vmem:[%s10506_s12 + $0x384] ss:$8 sps:$4 sm:$0xff]  }
 0x562   : > { %v9596_v45 = vld [vmem:[%s10506_s12 + $0x3b4] ss:$8 sps:$4 sm:$0xff]  }
 0x564   : > { %5628 = vmatpush1.bf16.msra.mxu1 %v9501_v42  ;;  %v9555_v42 = vld [vmem:[#allocation10 + $0xb68] ss:$48 sps:$4 sm:$0xff]  }
 0x565   : > { %5629 = vmatprep.subr.bf16.mxu1 %v9509_v43  ;;  %v9560_v43 = vld [vmem:[#allocation10 + $0xbcc] ss:$48 sps:$4 sm:$0xff]  }
 0x568   : > { %5630 = vmatpush1.bf16.msra.mxu1 %v9507_v47  ;;  %v9585_v47 = vld [vmem:[%s10506_s12 + $0x380] ss:$8 sps:$4 sm:$0xff]  }
 0x569   : > { %5631 = vmatprep.subr.bf16.mxu1 %v9515_v48  ;;  %v9590_v48 = vld [vmem:[%s10506_s12 + $0x394] ss:$8 sps:$4 sm:$0xff]  }
 0x56c   : > { %5632 = vmatpush1.bf16.msra.mxu1 %v9513_v49  ;;  %v9558_v49 = vld [vmem:[#allocation10 + $0xbc8] ss:$48 sps:$4 sm:$0xff]  }
 0x56d   : > { %5633 = vmatprep.subr.bf16.mxu1 %v9521_v50  ;;  %v9588_v50 = vld [vmem:[%s10506_s12 + $0x390] ss:$8 sps:$4 sm:$0xff]  }
 0x570   : > { %5634 = vmatpush1.bf16.msra.mxu1 %v9519_v51  ;;  %v9591_v51 = vld [vmem:[%s10506_s12 + $0x3a0] ss:$8 sps:$4 sm:$0xff]  }
 0x571   : > { %5635 = vmatprep.subr.bf16.mxu1 %v9527_v52  ;;  %v9594_v52 = vld [vmem:[%s10506_s12 + $0x3b0] ss:$8 sps:$4 sm:$0xff]  }
 0x572   : > { %v5413_v35 = vpop.f32.mrb[16].mxu1 }
 0x573   : > { %v8254_v58 = vadd.f32 %v5413_v35, %v3213_v17  ;;  %v5415_v10 = vpop.f32.mrb[17].mxu1  ;;  %v9599_v17 = vld [vmem:[%s10506_s12 + $0x3c4] ss:$8 sps:$4 sm:$0xff]  }
 0x574   : > { %v8255_v31 = vadd.f32 %v5415_v10, %v3217_v53  ;;  %v5417_v59 = vpop.f32.mrb[18].mxu1  ;;  %5636 = vmatpush1.bf16.msra.mxu1 %v9525_v54  ;;  %v9597_v53 = vld [vmem:[%s10506_s12 + $0x3c0] ss:$8 sps:$4 sm:$0xff]   ;;  %v9602_v54 = vld [vmem:[%s10506_s12 + $0x3d4] ss:$8 sps:$4 sm:$0xff]  }
 0x575   : > { %v5418_v60 = vpop.f32.mrb[19].mxu1  ;;  %5637 = vmatprep.subr.bf16.mxu1 %v9533_v55  ;;  %v5670_v0 = vpack.c.bf16 %v8254_v58, %v8254_v58  ;;  %v9600_v55 = vld [vmem:[%s10506_s12 + $0x3d0] ss:$8 sps:$4 sm:$0xff]   ;;  %v9605_v35 = vld [vmem:[%s10506_s12 + $0x3e4] ss:$8 sps:$4 sm:$0xff]   ;;  %v3220_v59 = vsub.s32 6, %v10529_v15 }
 0x576   : > { %v5671_v62 = vpack.c.bf16 %v8255_v31, %v8255_v31  ;;  %v9608_v58 = vld [vmem:[%s10506_s12 + $0x3f4] ss:$8 sps:$4 sm:$0xff]   ;;  %v9606_v10 = vld [vmem:[%s10506_s12 + $0x3f0] ss:$8 sps:$4 sm:$0xff]   ;;  %v9611_v31 = vld [vmem:[%s10506_s12 + $0x404] ss:$8 sps:$4 sm:$0xff]  }
 0x577   : > { %v11090_v60 = vld [vmem:[#allocation12 + $0x8] sm:$0xf] }
 0x578   : > { %5638 = vmatpush1.bf16.msra.mxu1 %v9531_v41  ;;  %6956 = vmatprep.mubr.bf16.mxu0 %v5671_v62  ;;  %v3224_v41 = vsub.s32 7, %v10529_v15 }
 0x579   : > { %6957 = vmatmul.mubr.bf16.vlgmr.msra.gmra.mrb[12].mxu0 %v5670_v0  ;;  %5639 = vmatprep.subr.bf16.mxu1 %v9536_v61  ;;  %v9717_v61 = vld [vmem:[#allocation12] sm:$0xff] }
 0x57a   : > { %6966 = vmatpush1.bf16.msra.mxu0 %v9561_v63  ;;  %v3221_v62 = vrot.slane %v9717_v61, %v3220_v59  ;;  %v3233_v63 = vrot.slane %v11090_v60, %v10884_v24  ;;  %v3225_v0 = vrot.slane %v9717_v61, %v3224_v41  ;;  %v9666_v59 = vld [vmem:[%s10506_s12 + $0x530] ss:$8 sps:$4 sm:$0xff]   ;;  %v9671_v41 = vld [vmem:[%s10506_s12 + $0x544] ss:$8 sps:$4 sm:$0xff]   ;;  %v9669_v61 = vld [vmem:[%s10506_s12 + $0x540] ss:$8 sps:$4 sm:$0xff]  }
 0x57b   : > { %6967 = vmatprep.subr.bf16.mxu0 %v9566_v7 }
 0x57c   : > { %5640 = vmatpush1.bf16.msra.mxu1 %v9534_v1 }
 0x57d   : > { %5641 = vmatprep.subr.bf16.mxu1 %v9539_v2 }
 0x57e   : > { %6968 = vmatpush1.bf16.msra.mxu0 %v9564_v3  ;;  %v8259_v3 = vadd.f32 %v10973_v46, %v3233_v63  ;;  %v9617_v46 = vld [vmem:[%s10506_s12 + $0x424] ss:$8 sps:$4 sm:$0xff]   ;;  %v9672_v63 = vld [vmem:[%s10506_s12 + $0x550] ss:$8 sps:$4 sm:$0xff]  }
 0x57f   : > { %6969 = vmatprep.subr.bf16.mxu0 %v9569_v4 }
 0x580   : > { %5642 = vmatpush1.bf16.msra.mxu1 %v9537_v5 }
 0x581   : > { %5643 = vmatprep.subr.bf16.mxu1 %v9542_v6 }
 0x582   : > { %6970 = vmatpush1.bf16.msra.mxu0 %v9567_v44  ;;  %v9609_v44 = vld [vmem:[%s10506_s12 + $0x400] ss:$8 sps:$4 sm:$0xff]  }
 0x583   : > { %6971 = vmatprep.subr.bf16.mxu0 %v9572_v8 }
 0x584   : > { %5644 = vmatpush1.bf16.msra.mxu1 %v9540_v11  ;;  %v9614_v11 = vld [vmem:[%s10506_s12 + $0x414] ss:$8 sps:$4 sm:$0xff]  }
 0x585   : > { %5645 = vmatprep.subr.bf16.mxu1 %v9545_v12  ;;  %v5675_v12 = vpack.c.bf16 %v8259_v3, %v8259_v3  ;;  %v9683_v3 = vld [vmem:[%s10506_s12 + $0x584] ss:$8 sps:$4 sm:$0xff]  }
 0x586   : > { %6972 = vmatpush1.bf16.msra.mxu0 %v9570_v14  ;;  %v9612_v14 = vld [vmem:[%s10506_s12 + $0x410] ss:$8 sps:$4 sm:$0xff]  }
 0x587   : > { %6973 = vmatprep.subr.bf16.mxu0 %v9575_v16  ;;  %v9615_v16 = vld [vmem:[%s10506_s12 + $0x420] ss:$8 sps:$4 sm:$0xff]  }
 0x588   : > { %5646 = vmatpush1.bf16.msra.mxu1 %v9543_v19  ;;  %v9620_v19 = vld [vmem:[%s10506_s12 + $0x434] ss:$8 sps:$4 sm:$0xff]  }
 0x589   : > { %5647 = vmatprep.subr.bf16.mxu1 %v9548_v20  ;;  %v9618_v20 = vld [vmem:[%s10506_s12 + $0x430] ss:$8 sps:$4 sm:$0xff]  }
 0x58a   : > { %6974 = vmatpush1.bf16.msra.mxu0 %v9573_v23  ;;  %v9623_v23 = vld [vmem:[%s10506_s12 + $0x444] ss:$8 sps:$4 sm:$0xff]  }
 0x58b   : > { %6975 = vmatprep.subr.bf16.mxu0 %v9578_v25  ;;  %v9621_v25 = vld [vmem:[%s10506_s12 + $0x440] ss:$8 sps:$4 sm:$0xff]  }
 0x58c   : > { %5648 = vmatpush1.bf16.msra.mxu1 %v9546_v26  ;;  %v9626_v26 = vld [vmem:[%s10506_s12 + $0x454] ss:$8 sps:$4 sm:$0xff]  }
 0x58d   : > { %5649 = vmatprep.subr.bf16.mxu1 %v9551_v28  ;;  %v9624_v28 = vld [vmem:[%s10506_s12 + $0x450] ss:$8 sps:$4 sm:$0xff]  }
 0x58e   : > { %6976 = vmatpush1.bf16.msra.mxu0 %v9576_v29  ;;  %v9629_v29 = vld [vmem:[%s10506_s12 + $0x464] ss:$8 sps:$4 sm:$0xff]  }
 0x58f   : > { %6977 = vmatprep.subr.bf16.mxu0 %v9581_v30  ;;  %v9627_v30 = vld [vmem:[%s10506_s12 + $0x460] ss:$8 sps:$4 sm:$0xff]  }
 0x590   : > { %5650 = vmatpush1.bf16.msra.mxu1 %v9549_v13  ;;  %v9632_v13 = vld [vmem:[%s10506_s12 + $0x474] ss:$8 sps:$4 sm:$0xff]  }
 0x591   : > { %5651 = vmatprep.subr.bf16.mxu1 %v9554_v27  ;;  %v9630_v27 = vld [vmem:[%s10506_s12 + $0x470] ss:$8 sps:$4 sm:$0xff]  }
 0x592   : > { %6978 = vmatpush1.bf16.msra.mxu0 %v9579_v36  ;;  %v9635_v36 = vld [vmem:[%s10506_s12 + $0x484] ss:$8 sps:$4 sm:$0xff]  }
 0x593   : > { %6979 = vmatprep.subr.bf16.mxu0 %v9584_v18  ;;  %v9633_v18 = vld [vmem:[%s10506_s12 + $0x480] ss:$8 sps:$4 sm:$0xff]  }
 0x594   : > { %5652 = vmatpush1.bf16.msra.mxu1 %v9552_v37  ;;  %v9638_v37 = vld [vmem:[%s10506_s12 + $0x494] ss:$8 sps:$4 sm:$0xff]  }
 0x595   : > { %5653 = vmatprep.subr.bf16.mxu1 %v9557_v38  ;;  %v9636_v38 = vld [vmem:[%s10506_s12 + $0x490] ss:$8 sps:$4 sm:$0xff]  }
 0x596   : > { %6980 = vmatpush1.bf16.msra.mxu0 %v9582_v39  ;;  %v9641_v39 = vld [vmem:[%s10506_s12 + $0x4a4] ss:$8 sps:$4 sm:$0xff]  }
 0x597   : > { %6981 = vmatprep.subr.bf16.mxu0 %v9587_v40  ;;  %v9639_v40 = vld [vmem:[%s10506_s12 + $0x4a0] ss:$8 sps:$4 sm:$0xff]  }
 0x598   : > { %5654 = vmatpush1.bf16.msra.mxu1 %v9555_v42  ;;  %v9644_v42 = vld [vmem:[%s10506_s12 + $0x4b4] ss:$8 sps:$4 sm:$0xff]  }
 0x599   : > { %5655 = vmatprep.subr.bf16.mxu1 %v9560_v43  ;;  %v9642_v43 = vld [vmem:[%s10506_s12 + $0x4b0] ss:$8 sps:$4 sm:$0xff]  }
 0x59a   : > { %6982 = vmatpush1.bf16.msra.mxu0 %v9585_v47  ;;  %v9647_v47 = vld [vmem:[%s10506_s12 + $0x4c4] ss:$8 sps:$4 sm:$0xff]  }
 0x59b   : > { %6983 = vmatprep.subr.bf16.mxu0 %v9590_v48  ;;  %v9645_v48 = vld [vmem:[%s10506_s12 + $0x4c0] ss:$8 sps:$4 sm:$0xff]  }
 0x59c   : > { %5656 = vmatpush1.bf16.msra.mxu1 %v9558_v49  ;;  %v9650_v49 = vld [vmem:[%s10506_s12 + $0x4d4] ss:$8 sps:$4 sm:$0xff]  }
 0x59e   : > { %6984 = vmatpush1.bf16.msra.mxu0 %v9588_v50  ;;  %v9648_v50 = vld [vmem:[%s10506_s12 + $0x4d0] ss:$8 sps:$4 sm:$0xff]  }
 0x59f   : > { %5658 = vmatmul.mubr.bf16.vlgmr.msra.gmra.mrb[24].mxu1 %v10921_v56  ;;  %6985 = vmatprep.subr.bf16.mxu0 %v9593_v21  ;;  %v9603_v56 = vld [vmem:[%s10506_s12 + $0x3e0] ss:$8 sps:$4 sm:$0xff]   ;;  %v9653_v21 = vld [vmem:[%s10506_s12 + $0x4e4] ss:$8 sps:$4 sm:$0xff]  }
 0x5a2   : > { %6986 = vmatpush1.bf16.msra.mxu0 %v9591_v51  ;;  %v9651_v51 = vld [vmem:[%s10506_s12 + $0x4e0] ss:$8 sps:$4 sm:$0xff]  }
 0x5a3   : > { %6987 = vmatprep.subr.bf16.mxu0 %v9596_v45  ;;  %v3229_v45 = vrot.slane %v11090_v60, %v10879_v22 }
 0x5a6   : > { %6988 = vmatpush1.bf16.msra.mxu0 %v9594_v52  ;;  %v9656_v52 = vld [vmem:[%s10506_s12 + $0x4f4] ss:$8 sps:$4 sm:$0xff]  }
 0x5a7   : > { %6989 = vmatprep.subr.bf16.mxu0 %v9599_v17  ;;  %v9654_v17 = vld [vmem:[%s10506_s12 + $0x4f0] ss:$8 sps:$4 sm:$0xff]  }
 0x5aa   : > { %6990 = vmatpush1.bf16.msra.mxu0 %v9597_v53  ;;  %v8258_v53 = vadd.f32 %v10971_v9, %v3229_v45  ;;  %v9663_v9 = vld [vmem:[%s10506_s12 + $0x520] ss:$8 sps:$4 sm:$0xff]  }
 0x5ab   : > { %6991 = vmatprep.subr.bf16.mxu0 %v9602_v54  ;;  %v9659_v54 = vld [vmem:[%s10506_s12 + $0x504] ss:$8 sps:$4 sm:$0xff]  }
 0x5ae   : > { %6992 = vmatpush1.bf16.msra.mxu0 %v9600_v55  ;;  %v9657_v55 = vld [vmem:[%s10506_s12 + $0x500] ss:$8 sps:$4 sm:$0xff]  }
 0x5af   : > { %6993 = vmatprep.subr.bf16.mxu0 %v9605_v35  ;;  %v5674_v35 = vpack.c.bf16 %v8258_v53, %v8258_v53 }
 0x5b2   : > { %6994 = vmatpush1.bf16.msra.mxu0 %v9603_v56  ;;  %v9662_v56 = vld [vmem:[%s10506_s12 + $0x514] ss:$8 sps:$4 sm:$0xff]  }
 0x5b3   : > { %6995 = vmatprep.subr.bf16.mxu0 %v9608_v58  ;;  %v9660_v58 = vld [vmem:[%s10506_s12 + $0x510] ss:$8 sps:$4 sm:$0xff]  }
 0x5b6   : > { %6996 = vmatpush1.bf16.msra.mxu0 %v9606_v10  ;;  %v9665_v10 = vld [vmem:[%s10506_s12 + $0x524] ss:$8 sps:$4 sm:$0xff]  }
 0x5b7   : > { %7006 = vmatprep.subr.bf16.mxu0 %v9611_v31  ;;  %v9668_v31 = vld [vmem:[%s10506_s12 + $0x534] ss:$8 sps:$4 sm:$0xff]  }
 0x5f2   : > { %v5495_v7 = vpop.f32.mrb[20].mxu1 }
 0x5f3   : > { %v8256_v1 = vadd.f32 %v5495_v7, %v3221_v62  ;;  %v5497_v2 = vpop.f32.mrb[21].mxu1  ;;  %v9674_v62 = vld [vmem:[%s10506_s12 + $0x554] ss:$8 sps:$4 sm:$0xff]   ;;  %v9675_v7 = vld [vmem:[%s10506_s12 + $0x560] ss:$8 sps:$4 sm:$0xff]  }
 0x5f4   : > { %v8257_v4 = vadd.f32 %v5497_v2, %v3225_v0  ;;  %v5499_v5 = vpop.f32.mrb[22].mxu1  ;;  %v9677_v0 = vld [vmem:[%s10506_s12 + $0x564] ss:$8 sps:$4 sm:$0xff]   ;;  %v9678_v2 = vld [vmem:[%s10506_s12 + $0x570] ss:$8 sps:$4 sm:$0xff]  }
 0x5f5   : > { %v5500_v15 = vpop.f32.mrb[23].mxu1  ;;  %v5672_v8 = vpack.c.bf16 %v8256_v1, %v8256_v1  ;;  %v9680_v1 = vld [vmem:[%s10506_s12 + $0x574] ss:$8 sps:$4 sm:$0xff]  }
 0x5f6   : > { %v5673_v6 = vpack.c.bf16 %v8257_v4, %v8257_v4  ;;  %v9681_v4 = vld [vmem:[%s10506_s12 + $0x580] ss:$8 sps:$4 sm:$0xff]   ;;  %v9686_v5 = vld [vmem:[%s10506_s12 + $0x594] ss:$8 sps:$4 sm:$0xff]   ;;  %v9684_v15 = vld [vmem:[%s10506_s12 + $0x590] ss:$8 sps:$4 sm:$0xff]  }
 0x5f8   : > { %6997 = vmatprep.mubr.bf16.mxu0 %v5673_v6  ;;  %v9689_v6 = vld [vmem:[%s10506_s12 + $0x5a4] ss:$8 sps:$4 sm:$0xff]  }
 0x5f9   : > { %6998 = vmatmul.mubr.bf16.vlgmr.msra.gmra.mrb[12].mxu0 %v5672_v8  ;;  %v9692_v8 = vld [vmem:[%s10506_s12 + $0x5b4] ss:$8 sps:$4 sm:$0xff]  }
 0x5fa   : > { %7007 = vmatpush1.bf16.msra.mxu0 %v9609_v44  ;;  %7038 = vmatprep.mubr.bf16.mxu0 %v5675_v12  ;;  %v9687_v44 = vld [vmem:[%s10506_s12 + $0x5a0] ss:$8 sps:$4 sm:$0xff]   ;;  %v9695_v12 = vld [vmem:[%s10506_s12 + $0x5c4] ss:$8 sps:$4 sm:$0xff]  }
 0x5fb   : > { %7008 = vmatprep.subr.bf16.mxu0 %v9614_v11  ;;  %v9690_v11 = vld [vmem:[%s10506_s12 + $0x5b0] ss:$8 sps:$4 sm:$0xff]  }
 0x5fe   : > { %7009 = vmatpush1.bf16.msra.mxu0 %v9612_v14  ;;  %v9693_v14 = vld [vmem:[%s10506_s12 + $0x5c0] ss:$8 sps:$4 sm:$0xff]  }
 0x5ff   : > { %7010 = vmatprep.subr.bf16.mxu0 %v9617_v46  ;;  %v9698_v46 = vld [vmem:[%s10506_s12 + $0x5d4] ss:$8 sps:$4 sm:$0xff]  }
 0x602   : > { %7011 = vmatpush1.bf16.msra.mxu0 %v9615_v16  ;;  %v9696_v16 = vld [vmem:[%s10506_s12 + $0x5d0] ss:$8 sps:$4 sm:$0xff]  }
 0x603   : > { %7012 = vmatprep.subr.bf16.mxu0 %v9620_v19  ;;  %v9701_v19 = vld [vmem:[%s10506_s12 + $0x5e4] ss:$8 sps:$4 sm:$0xff]  }
 0x606   : > { %7013 = vmatpush1.bf16.msra.mxu0 %v9618_v20  ;;  %v9699_v20 = vld [vmem:[%s10506_s12 + $0x5e0] ss:$8 sps:$4 sm:$0xff]  }
 0x607   : > { %7014 = vmatprep.subr.bf16.mxu0 %v9623_v23  ;;  %v3237_v23 = vrot.slane %v11090_v60, %v10916_v33  ;;  %v5870_v33 = vld [vmem:[%s549_s6] sm:$0x3] }
 0x60a   : > { %7015 = vmatpush1.bf16.msra.mxu0 %v9621_v25  ;;  %v9704_v25 = vld [vmem:[%s10506_s12 + $0x5f4] ss:$8 sps:$4 sm:$0xff]  }
 0x60b   : > { %7016 = vmatprep.subr.bf16.mxu0 %v9626_v26  ;;  %v3241_v26 = vrot.slane %v11090_v60, %v10895_v57  ;;  %v5879_v57 = vrot.slane %v5870_v33, %v10884_v24 }
 0x60e   : > { %7017 = vmatpush1.bf16.msra.mxu0 %v9624_v28 }
 0x60f   : > { %7018 = vmatprep.subr.bf16.mxu0 %v9629_v29  ;;  %v9702_v29 = vld [vmem:[%s10506_s12 + $0x5f0] ss:$8 sps:$4 sm:$0xff]  }
 0x612   : > { %7019 = vmatpush1.bf16.msra.mxu0 %v9627_v30 }
 0x613   : > { %7020 = vmatprep.subr.bf16.mxu0 %v9632_v13 }
 0x616   : > { %7021 = vmatpush1.bf16.msra.mxu0 %v9630_v27 }
 0x617   : > { %7022 = vmatprep.subr.bf16.mxu0 %v9635_v36 }
 0x61a   : > { %7023 = vmatpush1.bf16.msra.mxu0 %v9633_v18 }
 0x61b   : > { %7024 = vmatprep.subr.bf16.mxu0 %v9638_v37 }
 0x61e   : > { %7025 = vmatpush1.bf16.msra.mxu0 %v9636_v38 }
 0x61f   : > { %7026 = vmatprep.subr.bf16.mxu0 %v9641_v39  ;;  %v5875_v39 = vrot.slane %v5870_v33, %v10879_v22 }
 0x622   : > { %7027 = vmatpush1.bf16.msra.mxu0 %v9639_v40 }
 0x623   : > { %7028 = vmatprep.subr.bf16.mxu0 %v9644_v42 }
 0x626   : > { %7029 = vmatpush1.bf16.msra.mxu0 %v9642_v43 }
 0x627   : > { %7030 = vmatprep.subr.bf16.mxu0 %v9647_v47 }
 0x62a   : > { %7031 = vmatpush1.bf16.msra.mxu0 %v9645_v48 }
 0x62b   : > { %7032 = vmatprep.subr.bf16.mxu0 %v9650_v49 }
 0x62e   : > { %7033 = vmatpush1.bf16.msra.mxu0 %v9648_v50 }
 0x62f   : > { %7034 = vmatprep.subr.bf16.mxu0 %v9653_v21 }
 0x632   : > { %7035 = vmatpush1.bf16.msra.mxu0 %v9651_v51 }
 0x633   : > { %7036 = vmatprep.subr.bf16.mxu0 %v9656_v52 }
 0x636   : > { %7037 = vmatpush1.bf16.msra.mxu0 %v9654_v17 }
 0x637   : > { %7047 = vmatprep.subr.bf16.mxu0 %v9659_v54 }
 0x639   : > { %7039 = vmatmul.mubr.bf16.vlgmr.msra.gmra.mrb[12].mxu0 %v5674_v35 }
 0x63a   : > { %7048 = vmatpush1.bf16.msra.mxu0 %v9657_v55 }
 0x63b   : > { %7049 = vmatprep.subr.bf16.mxu0 %v9662_v56 }
 0x63e   : > { %7050 = vmatpush1.bf16.msra.mxu0 %v9660_v58 }
 0x63f   : > { %7051 = vmatprep.subr.bf16.mxu0 %v9665_v10 }
 0x642   : > { %7052 = vmatpush1.bf16.msra.mxu0 %v9663_v9 }
 0x643   : > { %7053 = vmatprep.subr.bf16.mxu0 %v9668_v31 }
 0x646   : > { %7054 = vmatpush1.bf16.msra.mxu0 %v9666_v59 }
 0x647   : > { %7055 = vmatprep.subr.bf16.mxu0 %v9671_v41 }
 0x64a   : > { %7056 = vmatpush1.bf16.msra.mxu0 %v9669_v61 }
 0x64b   : > { %7057 = vmatprep.subr.bf16.mxu0 %v9674_v62 }
 0x64e   : > { %7058 = vmatpush1.bf16.msra.mxu0 %v9672_v63 }
 0x64f   : > { %7059 = vmatprep.subr.bf16.mxu0 %v9677_v0 }
 0x652   : > { %7060 = vmatpush1.bf16.msra.mxu0 %v9675_v7 }
 0x653   : > { %7061 = vmatprep.subr.bf16.mxu0 %v9680_v1 }
 0x656   : > { %7062 = vmatpush1.bf16.msra.mxu0 %v9678_v2 }
 0x657   : > { %7063 = vmatprep.subr.bf16.mxu0 %v9683_v3 }
 0x65a   : > { %7064 = vmatpush1.bf16.msra.mxu0 %v9681_v4 }
 0x65b   : > { %7065 = vmatprep.subr.bf16.mxu0 %v9686_v5 }
 0x65e   : > { %7066 = vmatpush1.bf16.msra.mxu0 %v9684_v15  ;;  %v7124_v15 = vld [vmem:[%s558_s8] sm:$0x3] }
 0x65f   : > { %7067 = vmatprep.subr.bf16.mxu0 %v9689_v6 }
 0x662   : > { %7068 = vmatpush1.bf16.msra.mxu0 %v9687_v44 }
 0x663   : > { %7069 = vmatprep.subr.bf16.mxu0 %v9692_v8 }
 0x666   : > { %7070 = vmatpush1.bf16.msra.mxu0 %v9690_v11  ;;  %v7129_v11 = vrot.slane %v7124_v15, %v10879_v22 }
 0x667   : > { %7071 = vmatprep.subr.bf16.mxu0 %v9695_v12 }
 0x66a   : > { %7072 = vmatpush1.bf16.msra.mxu0 %v9693_v14  ;;  %v7133_v14 = vrot.slane %v7124_v15, %v10884_v24 }
 0x66b   : > { %7073 = vmatprep.subr.bf16.mxu0 %v9698_v46 }
 0x66e   : > { %7074 = vmatpush1.bf16.msra.mxu0 %v9696_v16 }
 0x66f   : > { %7075 = vmatprep.subr.bf16.mxu0 %v9701_v19 }
 0x672   : > { %v5659_v28 = vpop.f32.mrb[24].mxu1  ;;  %7076 = vmatpush1.bf16.msra.mxu0 %v9699_v20 }
 0x673   : > { %v8260_v30 = vadd.f32 %v5659_v28, %v3237_v23  ;;  %v5661_v13 = vpop.f32.mrb[25].mxu1  ;;  %7077 = vmatprep.subr.bf16.mxu0 %v9704_v25 }
 0x674   : > { %v8261_v27 = vadd.f32 %v5661_v13, %v3241_v26  ;;  %v5663_v36 = vpop.f32.mrb[26].mxu1 }
 0x675   : > { %v5664_v18 = vpop.f32.mrb[27].mxu1  ;;  %v5676_v38 = vpack.c.bf16 %v8260_v30, %v8260_v30 }
 0x676   : > { %v5677_v37 = vpack.c.bf16 %v8261_v27, %v8261_v27  ;;  %7078 = vmatpush1.bf16.msra.mxu0 %v9702_v29 }
 0x678   : > { %7079 = vmatprep.mubr.bf16.mxu0 %v5677_v37 }
 0x679   : > { %7080 = vmatmul.mubr.bf16.vlgmr.msra.gmra.mrb[12].mxu0 %v5676_v38 }
 0x74c   : > { %v7081_v60 = vpop.f32.mrb[12].mxu0 }
 0x74d   : > { %v8262_v40 = vadd.f32 %v7081_v60, %v5875_v39  ;;  %v7083_v42 = vpop.f32.mrb[13].mxu0 }
 0x74e   : > { %v8263_v43 = vadd.f32 %v7083_v42, %v5879_v57  ;;  %v7085_v47 = vpop.f32.mrb[14].mxu0 }
 0x74f   : > { %v7090_v48 = vand.u32 2147483647, %v8262_v40  ;;  %v7086_v49 = vpop.f32.mrb[15].mxu0  ;;  %v7088_v63 = vmax.f32 %v8262_v40, 0.0 }
 0x750   : > { %v7091_v50 = vand.u32 2147483647, %v8263_v43  ;;  %v7089_v2 = vmax.f32 %v8263_v43, 0.0 }
 0x751   : > { %v7092_v21 = vsub.f32 0.0, %v7090_v48 }
 0x752   : > { %v7093_v51 = vsub.f32 0.0, %v7091_v50 }
 0x753   : > { %v7094_v45 = vmul.f32 1.442695, %v7092_v21 }
 0x754   : > { %v7096_v52 = vmul.f32 1.442695, %v7093_v51 }
 0x755   : > { %9705 = vpow2.f32 %v7094_v45 }
 0x756   : > { %9707 = vpow2.f32 %v7096_v52 }
 0x75f   : > { %v9706_v17 = vpop.eup %9705 }
 0x760   : > { %v9708_v53 = vpop.eup %9707  ;;  %v7098_v54 = vadd.f32 1.0, %v9706_v17  ;;  %v7101_v35 = vmul.f32 -0.5, %v9706_v17  ;;  %v7104_v10 = vand.u32 2147483647, %v9706_v17 }
 0x761   : > { %v7107_v55 = vadd.f32 1.0, %v9708_v53  ;;  %v7110_v56 = vmul.f32 -0.5, %v9708_v53  ;;  %v7113_v31 = vand.u32 2147483647, %v9708_v53 }
 0x762   : > { %9709 = vlog2.f32 %v7098_v54  ;;  %v7102_v58 = vadd.f32 1.0, %v7101_v35  ;;  %vm7105_vm4 = vcmp.lt.f32.partialorder %v7104_v10, 0.0004427343 }
 0x763   : > { %9711 = vlog2.f32 %v7107_v55  ;;  %v7111_v9 = vadd.f32 1.0, %v7110_v56  ;;  %vm7114_vm5 = vcmp.lt.f32.partialorder %v7113_v31, 0.0004427343 }
 0x764   : > { %v7103_v62 = vmul.f32 %v9706_v17, %v7102_v58 }
 0x765   : > { %v7112_v7 = vmul.f32 %v9708_v53, %v7111_v9 }
 0x76c   : > { %v9710_v59 = vpop.eup %9709 }
 0x76d   : > { %v9712_v41 = vpop.eup %9711  ;;  %v7100_v61 = vmul.f32 0.6931472, %v9710_v59 }
 0x76e   : > { %v7109_v0 = vmul.f32 0.6931472, %v9712_v41 }
 0x76f   : > { %v7106_v1 = vsel %vm7105_vm4, %v7103_v62, %v7100_v61 }
 0x770   : > { %v7116_v3 = vadd.f32 %v7106_v1, %v7088_v63  ;;  %v7115_v4 = vsel %vm7114_vm5, %v7112_v7, %v7109_v0 }
 0x771   : > { %v7117_v5 = vadd.f32 %v7115_v4, %v7089_v2 }
 0x772   : > { %9713 = vtanh.f32 %v7116_v3 }
 0x773   : > { %9715 = vtanh.f32 %v7117_v5 }
 0x77c   : > { %v9714_v6 = vpop.eup %9713 }
 0x77d   : > { %v9716_v44 = vpop.eup %9715  ;;  %v7120_v8 = vmul.f32 %v9714_v6, %v8262_v40 }
 0x77e   : > { %v7121_v12 = vmul.f32 %v9716_v44, %v8263_v43 }
 0x77f   : > { %v7122_v46 = vmul.f32 %v10888_v32, %v7120_v8 }
 0x780   : > { %v7123_v16 = vmul.f32 %v10890_v34, %v7121_v12 }
 0x781   : > { %v7136_v19 = vmul.f32 %v7129_v11, %v7122_v46 }
 0x782   : > { %v7137_v20 = vmul.f32 %v7133_v14, %v7123_v16 }
 0x784   : > { %v7140_v23 = vcombine.low %v7136_v19, %v7137_v20 }
 0x786   : > { %8226 = vst.sshfl [vmem:[%s626_s19] sm:$0x33 pattern:$0x76325410] %v7140_v23 }
 0x787 PF: > { %s11272_s20 = sld [smem:[#allocation26_spill]]  ;;  %s11273_s23 = sld [smem:[#allocation24_spill]] }
 0x788   : > { %s11274_s19 = sld [smem:[#allocation27_spill]]  ;;  %s11275_s17 = smov %s10054_s18 }
 0x78d   : > { %p30_p6 = scmp.ge.s32.totalorder %s11272_s20, 6   ;;  %s11276_s18 = smov %s11273_s23 }
 0x78f   :  { %32 = sbr.rel (!%p30_p6) target bundleno = 17 (0x11), region = 173 }
 0x796   :  { %7172 = vsyncpa [#allocation3], 1 }
 0x797   :  { %7174 = vsyncpa [#allocation3 + $0x1], 1 }
 0x798   :  { %7175 = vsyncpa [#allocation5], 1 }
 0x799   :  { %7177 = vsyncpa [#allocation5 + $0x1], 1 }
 0x79a   :  { %7178 = vsyncpa [#allocation8], 1 }
 0x79b   :  { %7179 = vsyncpa [#allocation11], 1 }
 0x79c   :  { %7180 = vsyncpa [#allocation14], 1 }
 0x79d   :  { %7182 = vsyncpa [#allocation14 + $0x1], 1 }
 0x79e   :  { %7183 = vsyncpa [#allocation17], 1 }
 0x79f   :  { %7185 = vsyncpa [#allocation17 + $0x1], 1 }

</bundles_post_ra>
